<compile_context>
chip_gen: v7x
topology: tpu7x:2x2x1
jax: 0.10.0
libtpu: 0.0.40
codegen_flags: <defaults>
</compile_context>

<pallas_src>
import math
import functools

import numpy as np
import jax
import jax.numpy as jnp
from jax import lax
from jax.experimental import pallas as pl
from jax.experimental.pallas import tpu as pltpu


def _pair(v):
    return (v, v) if isinstance(v, int) else tuple(v)


def _round_up(x, m):
    return (x + m - 1) // m * m


def _preferred_tn():
    """MXU N-tile: 128 on 128-wide MXU generations (<= v5), 256 on v6e/v7x."""
    try:
        kind = jax.devices()[0].device_kind.lower()
    except Exception:
        return 256
    for tag in ("v2", "v3", "v4", "v5"):
        if tag in kind:
            return 128
    return 256


def _choose_cout_tiling(out_planes):
    tn_pref = _preferred_tn()
    tn = 256 if (tn_pref == 256 and out_planes > 128) else 128
    return _round_up(out_planes, tn), tn


# --- block-size selection ----------------------------------------------------
_ACC_BUDGET_BYTES = 2 << 20      # budget for the f32 accumulator block
_IN_BUDGET_BYTES = 4 << 20       # budget for a single input block (bf16)
_MAX_M = 4096                    # cap on matmul M rows per block


def _pick_blocks(n, ho, wo, tn, h_ext, w_ext, cin, n_ct, in_itemsize):
    acc_row_bytes = max(1, wo * tn * 4)
    row_cap = max(1, _ACC_BUDGET_BYTES // acc_row_bytes)
    # With batch 1 and a single Cout tile, keep >= 2 row blocks so the second
    # TensorCore (v7x megacore) has a 'parallel' axis to shard.
    if n == 1 and n_ct == 1 and ho > 1:
        row_cap = min(row_cap, max(1, ho // 2))
    ho_blk = 1
    for d in range(1, ho + 1):
        if ho % d == 0 and d <= row_cap:
            ho_blk = d

    b_blk = 1
    if ho_blk == ho:   # whole image per step -> fold batch into the matmul M
        img_bytes = h_ext * w_ext * cin * in_itemsize
        for d in range(1, n + 1):
            if (n % d == 0
                    and d * ho * wo <= _MAX_M
                    and d * ho * wo * tn * 4 <= _ACC_BUDGET_BYTES
                    and d * img_bytes <= _IN_BUDGET_BYTES):
                b_blk = d
    return b_blk, ho_blk


# --- kernel -------------------------------------------------------------------
def _conv_bn_relu_kernel(x_ref, w_ref, shift_ref, o_ref, *,
                         kh, kw, sh, sw, dh, dw, ho_blk, wo, use_relu):
    # x_ref:     (b_blk, h_ext, w_ext, Cin)   bf16 zero-padded NHWC input
    # w_ref:     (kh*kw*Cin, tn)              bf16, BN scale folded in
    # shift_ref: (1, tn)                      f32 folded BN shift (+ conv bias)
    # o_ref:     (b_blk, ho_blk, wo, tn)      lane-dense output block
    b_blk = o_ref.shape[0]
    tn = o_ref.shape[-1]
    k_total = w_ref.shape[0]
    hb = pl.program_id(1)
    row0 = hb * (ho_blk * sh)          # first padded-input row of this block

    # Gather the kh*kw shifted taps and stack them along the channel axis so
    # the MXU contraction is K = kh*kw*Cin wide (single dot, no per-tap acc RMW).
    taps = []
    for r in range(kh):                # statically unrolled
        h0 = row0 + r * dh
        h_idx = pl.ds(h0, ho_blk) if sh == 1 else pl.ds(h0, ho_blk, sh)
        for s in range(kw):
            s0 = s * dw
            w_idx = pl.ds(s0, wo) if sw == 1 else pl.ds(s0, wo, sw)
            taps.append(x_ref[:, h_idx, w_idx, :])    # (b_blk, ho_blk, wo, Cin)
    patch = jnp.concatenate(taps, axis=-1)             # (b_blk, ho_blk, wo, K)

    m = b_blk * ho_blk * wo
    patch2d = patch.reshape(m, k_total)                # view when wo % 8 == 0
    acc = jnp.dot(patch2d, w_ref[...],
                  preferred_element_type=jnp.float32)  # (m, tn) f32
    acc = acc + shift_ref[...]                         # f32 epilogue
    if use_relu:
        acc = jnp.maximum(acc, 0.0)
    o_ref[...] = acc.reshape(b_blk, ho_blk, wo, tn).astype(o_ref.dtype)


# --- wrapper ------------------------------------------------------------------
def _fused_conv_bn_relu(x_nhwc, w_flat, shift, *, kernel_size, stride, padding,
                        dilation, relu, tn, compute_dtype=jnp.bfloat16,
                        out_dtype=None):
    """x_nhwc: (N,H,W,Cin); w_flat: (kh*kw*Cin, Coutp); shift: (Coutp,)."""
    n, h, w, cin = x_nhwc.shape
    kh, kw = kernel_size
    k_total, coutp = w_flat.shape
    assert k_total == kh * kw * cin and coutp % tn == 0
    sh, sw = stride
    ph, pw = padding
    dh, dw = dilation
    ho = (h + 2 * ph - dh * (kh - 1) - 1) // sh + 1
    wo = (w + 2 * pw - dw * (kw - 1) - 1) // sw + 1
    out_dtype = out_dtype or x_nhwc.dtype
    out_itemsize = jnp.dtype(out_dtype).itemsize
    cd_itemsize = jnp.dtype(compute_dtype).itemsize

    # Cast BEFORE padding: only one (bf16) padded copy is materialized in HBM.
    x_pad = jnp.pad(x_nhwc.astype(compute_dtype),
                    ((0, 0), (ph, ph), (pw, pw), (0, 0)))
    w_flat = w_flat.astype(compute_dtype)
    shift = shift.astype(jnp.float32).reshape(1, coutp)

    h_ext, w_ext = h + 2 * ph, w + 2 * pw
    n_ct = coutp // tn
    b_blk, ho_blk = _pick_blocks(n, ho, wo, tn, h_ext, w_ext, cin, n_ct,
                                 cd_itemsize)
    n_b, n_hb = n // b_blk, ho // ho_blk
    grid = (n_b, n_hb, n_ct)

    # Explicit VMEM budget derived from the actual double-buffered block sizes.
    m = b_blk * ho_blk * wo
    in_blk = b_blk * h_ext * w_ext * cin * cd_itemsize
    w_blk = k_total * tn * cd_itemsize
    out_blk = m * tn * out_itemsize
    work = m * k_total * cd_itemsize * 2 + m * tn * 4 * 2   # patch + f32 acc
    vmem_est = 2 * (in_blk + w_blk + tn * 4 + out_blk) + work
    vmem_limit = int(min(64 << 20, max(2 * vmem_est, 32 << 20)))

    flops = 2 * n * ho * wo * k_total * coutp
    w_reloads = (n_b * n_hb * n_ct) if n_ct > 1 else 1
    bytes_accessed = int(x_pad.size * cd_itemsize
                         + w_flat.size * cd_itemsize * w_reloads
                         + shift.size * 4
                         + n * ho * wo * coutp * out_itemsize)

    kernel = functools.partial(
        _conv_bn_relu_kernel, kh=kh, kw=kw, sh=sh, sw=sw, dh=dh, dw=dw,
        ho_blk=ho_blk, wo=wo, use_relu=relu)

    out = pl.pallas_call(
        kernel,
        out_shape=jax.ShapeDtypeStruct((n, ho, wo, coutp), out_dtype),
        grid_spec=pltpu.PrefetchScalarGridSpec(
            num_scalar_prefetch=0,
            grid=grid,
            in_specs=[
                # Full padded image along H/W; Pallas elides the re-DMA while
                # the batch-block index is unchanged across grid steps.
                pl.BlockSpec((b_blk, h_ext, w_ext, cin),
                             lambda nb, hb, j: (nb, 0, 0, 0)),
                pl.BlockSpec((k_total, tn), lambda nb, hb, j: (0, j)),
                pl.BlockSpec((1, tn), lambda nb, hb, j: (0, j)),
            ],
            out_specs=pl.BlockSpec((b_blk, ho_blk, wo, tn),
                                   lambda nb, hb, j: (nb, hb, 0, j)),
        ),
        compiler_params=pltpu.CompilerParams(
            dimension_semantics=("parallel", "parallel", "parallel"),
            vmem_limit_bytes=vmem_limit),
        cost_estimate=pl.CostEstimate(flops=flops, transcendentals=0,
                                      bytes_accessed=bytes_accessed),
    )(x_pad, w_flat, shift)
    return out


# --- module -------------------------------------------------------------------
class BasicConv:
    """JAX/Pallas port of the PyTorch BasicConv module (inference semantics)."""

    def __init__(self, key, in_planes, out_planes, kernel_size, stride=1,
                 padding=0, dilation=1, groups=1, relu=True, bn=True, bias=False,
                 dtype=jnp.float32, compute_dtype=jnp.bfloat16, out_dtype=None):
        if groups != 1:
            # TODO(synk): grouped conv not implemented in this Pallas port
            raise NotImplementedError("groups != 1 not supported")
        self.in_planes = in_planes
        self.out_planes = out_planes
        self.kernel_size = _pair(kernel_size)
        self.stride = _pair(stride)
        self.padding = _pair(padding)
        self.dilation = _pair(dilation)
        self.use_relu = relu
        self.use_bn = bn
        self.eps = 1e-5
        self.dtype = dtype
        self.compute_dtype = compute_dtype
        # Pass out_dtype=jnp.bfloat16 to halve output HBM traffic when the
        # consumer accepts bf16 activations.
        self.out_dtype = out_dtype or dtype

        kh, kw = self.kernel_size
        k_w, k_b, k_g, k_beta = jax.random.split(key, 4)
        fan_in = in_planes * kh * kw
        bound = 1.0 / math.sqrt(fan_in)
        # Deterministic, PyTorch-style uniform init for the conv weight.
        self.weight = jax.random.uniform(
            k_w, (out_planes, in_planes, kh, kw), dtype, -bound, bound)
        self.bias = (jax.random.uniform(k_b, (out_planes,), dtype, -bound, bound)
                     if bias else None)
        if bn:
            self.gamma = jax.random.uniform(k_g, (out_planes,), dtype, 0.5, 1.5)
            self.beta = jax.random.uniform(k_beta, (out_planes,), dtype, -0.5, 0.5)
            # Deterministic, non-trivial running statistics.
            self.running_mean = 0.1 * jnp.arange(out_planes, dtype=dtype)
            self.running_var = 1.0 + 0.05 * jnp.arange(out_planes, dtype=dtype)
        else:
            self.gamma = self.beta = None
            self.running_mean = self.running_var = None

        self.coutp, self.tn = _choose_cout_tiling(out_planes)

    def _folded_params(self):
        """(kh*kw*Cin, Coutp) weight with BN scale folded in, and f32 shift."""
        # Note: folding the BN scale into bf16 weights loses a little precision
        # when running_var is tiny; apply scale in the f32 epilogue if tighter
        # accuracy is ever required.
        if self.use_bn:
            scale = self.gamma / jnp.sqrt(self.running_var + self.eps)
            shift = self.beta - self.running_mean * scale
        else:
            scale = jnp.ones((self.out_planes,), self.dtype)
            shift = jnp.zeros((self.out_planes,), self.dtype)
        if self.bias is not None:
            shift = shift + self.bias * scale

        kh, kw = self.kernel_size
        # (Cout, Cin, kh, kw) -> (kh, kw, Cin, Cout), fold scale into weights.
        w = jnp.transpose(self.weight, (2, 3, 1, 0)) * scale[None, None, None, :]

        pad = self.coutp - self.out_planes
        if pad:
            w = jnp.pad(w, ((0, 0), (0, 0), (0, 0), (0, pad)))
            shift = jnp.pad(shift, ((0, pad),))
        # Flatten (kh, kw, Cin) -> K in the same order the kernel concatenates
        # its taps: (r*kw + s)*Cin + c.
        w_flat = w.reshape(kh * kw * self.in_planes, self.coutp)
        return w_flat, shift

    def forward_nhwc(self, x_nhwc):
        """Channels-last forward: (N,H,W,Cin) -> (N,Ho,Wo,Cout)."""
        w_flat, shift = self._folded_params()
        y = _fused_conv_bn_relu(
            x_nhwc, w_flat, shift,
            kernel_size=self.kernel_size, stride=self.stride,
            padding=self.padding, dilation=self.dilation,
            relu=self.use_relu, tn=self.tn,
            compute_dtype=self.compute_dtype, out_dtype=self.out_dtype)
        return y[..., :self.out_planes]

    def __call__(self, x):
        # PyTorch-facing boundary: NCHW in / NCHW out. Transposes touch only the
        # raw activation (1x size); internals are NHWC end-to-end.
        x_nhwc = jnp.transpose(x, (0, 2, 3, 1))
        y_nhwc = self.forward_nhwc(x_nhwc)
        return jnp.transpose(y_nhwc, (0, 3, 1, 2))

    # Pure-JAX reference (for correctness checking only). Uses the same bf16
    # operand dtype as the kernel (f32 accumulation), so tolerances stay tight.
    def reference(self, x):
        cd = self.compute_dtype
        y = lax.conv_general_dilated(
            x.astype(cd), self.weight.astype(cd),
            window_strides=self.stride,
            padding=[(self.padding[0], self.padding[0]),
                     (self.padding[1], self.padding[1])],
            rhs_dilation=self.dilation,
            dimension_numbers=("NCHW", "OIHW", "NCHW"),
            preferred_element_type=jnp.float32)
        if self.bias is not None:
            y = y + self.bias[None, :, None, None]
        if self.use_bn:
            scale = self.gamma / jnp.sqrt(self.running_var + self.eps)
            shift = self.beta - self.running_mean * scale
            y = y * scale[None, :, None, None] + shift[None, :, None, None]
        if self.use_relu:
            y = jnp.maximum(y, 0.0)
        return y.astype(self.out_dtype)


if __name__ == "__main__":
    key = jax.random.PRNGKey(0)
    k_param, k_x = jax.random.split(key)

    # Small shapes consistent with the module: N=2, Cin=4, H=W=16, Cout=8, 3x3 conv.
    x = jax.random.normal(k_x, (2, 4, 16, 16), jnp.float32)
    model = BasicConv(k_param, in_planes=4, out_planes=8, kernel_size=3,
                      stride=1, padding=1, relu=True, bn=True, bias=False)

    y = jax.block_until_ready(model(x))
    assert y.shape == (2, 8, 16, 16)

    y_ref = jax.block_until_ready(model.reference(x))
    # bf16 operands on both sides; small slack for the BN-scale-folded weight
    # rounding difference.
    np.testing.assert_allclose(np.asarray(y), np.asarray(y_ref),
                               rtol=3e-2, atol=3e-2)

    print("KERNEL_OK")
</pallas_src>

<mosaic_0001>
module attributes {stable_mosaic.version = 11 : i64} {
  func.func @_conv_bn_relu_kernel(%arg0: i32, %arg1: i32, %arg2: i32, %arg3: memref<2x18x18x4xbf16, #tpu.memory_space<vmem>>, %arg4: memref<36x128xbf16, #tpu.memory_space<vmem>>, %arg5: memref<1x128xf32, #tpu.memory_space<vmem>>, %arg6: memref<2x16x16x128xf32, #tpu.memory_space<vmem>>) attributes {dimension_semantics = [#tpu.dimension_semantics<parallel>, #tpu.dimension_semantics<parallel>, #tpu.dimension_semantics<parallel>], iteration_bounds = array<i64: 1, 1, 1>, scalar_prefetch = 0 : i64, scratch_operands = 0 : i64, tpu.core_type = #tpu.core_type<tc>, window_params = [{transform_indices = @transform_0, window_bounds = array<i64: 2, 18, 18, 4>}, {transform_indices = @transform_1, window_bounds = array<i64: 36, 128>}, {transform_indices = @transform_2, window_bounds = array<i64: 1, 128>}, {transform_indices = @transform_3, window_bounds = array<i64: 2, 16, 16, 128>}]} {
    %c16_i32 = arith.constant 16 : i32
    %0 = arith.muli %arg1, %c16_i32 : i32
    %c0_i32 = arith.constant 0 : i32
    %1 = arith.addi %0, %c0_i32 : i32
    %c0 = arith.constant 0 : index
    %2 = arith.index_cast %1 : i32 to index
    %c0_0 = arith.constant 0 : index
    %c0_1 = arith.constant 0 : index
    %3 = vector.load %arg3[%c0, %2, %c0_0, %c0_1] : memref<2x18x18x4xbf16, #tpu.memory_space<vmem>>, vector<2x16x16x4xbf16>
    %c0_2 = arith.constant 0 : index
    %4 = arith.index_cast %1 : i32 to index
    %c1 = arith.constant 1 : index
    %c0_3 = arith.constant 0 : index
    %5 = vector.load %arg3[%c0_2, %4, %c1, %c0_3] : memref<2x18x18x4xbf16, #tpu.memory_space<vmem>>, vector<2x16x16x4xbf16>
    %c0_4 = arith.constant 0 : index
    %6 = arith.index_cast %1 : i32 to index
    %c2 = arith.constant 2 : index
    %c0_5 = arith.constant 0 : index
    %7 = vector.load %arg3[%c0_4, %6, %c2, %c0_5] : memref<2x18x18x4xbf16, #tpu.memory_space<vmem>>, vector<2x16x16x4xbf16>
    %c1_i32 = arith.constant 1 : i32
    %8 = arith.addi %0, %c1_i32 : i32
    %c0_6 = arith.constant 0 : index
    %9 = arith.index_cast %8 : i32 to index
    %c0_7 = arith.constant 0 : index
    %c0_8 = arith.constant 0 : index
    %10 = vector.load %arg3[%c0_6, %9, %c0_7, %c0_8] : memref<2x18x18x4xbf16, #tpu.memory_space<vmem>>, vector<2x16x16x4xbf16>
    %c0_9 = arith.constant 0 : index
    %11 = arith.index_cast %8 : i32 to index
    %c1_10 = arith.constant 1 : index
    %c0_11 = arith.constant 0 : index
    %12 = vector.load %arg3[%c0_9, %11, %c1_10, %c0_11] : memref<2x18x18x4xbf16, #tpu.memory_space<vmem>>, vector<2x16x16x4xbf16>
    %c0_12 = arith.constant 0 : index
    %13 = arith.index_cast %8 : i32 to index
    %c2_13 = arith.constant 2 : index
    %c0_14 = arith.constant 0 : index
    %14 = vector.load %arg3[%c0_12, %13, %c2_13, %c0_14] : memref<2x18x18x4xbf16, #tpu.memory_space<vmem>>, vector<2x16x16x4xbf16>
    %c2_i32 = arith.constant 2 : i32
    %15 = arith.addi %0, %c2_i32 : i32
    %c0_15 = arith.constant 0 : index
    %16 = arith.index_cast %15 : i32 to index
    %c0_16 = arith.constant 0 : index
    %c0_17 = arith.constant 0 : index
    %17 = vector.load %arg3[%c0_15, %16, %c0_16, %c0_17] : memref<2x18x18x4xbf16, #tpu.memory_space<vmem>>, vector<2x16x16x4xbf16>
    %c0_18 = arith.constant 0 : index
    %18 = arith.index_cast %15 : i32 to index
    %c1_19 = arith.constant 1 : index
    %c0_20 = arith.constant 0 : index
    %19 = vector.load %arg3[%c0_18, %18, %c1_19, %c0_20] : memref<2x18x18x4xbf16, #tpu.memory_space<vmem>>, vector<2x16x16x4xbf16>
    %c0_21 = arith.constant 0 : index
    %20 = arith.index_cast %15 : i32 to index
    %c2_22 = arith.constant 2 : index
    %c0_23 = arith.constant 0 : index
    %21 = vector.load %arg3[%c0_21, %20, %c2_22, %c0_23] : memref<2x18x18x4xbf16, #tpu.memory_space<vmem>>, vector<2x16x16x4xbf16>
    %22 = tpu.concatenate %3, %5, %7, %10, %12, %14, %17, %19, %21 in 3 : vector<2x16x16x4xbf16>, vector<2x16x16x4xbf16>, vector<2x16x16x4xbf16>, vector<2x16x16x4xbf16>, vector<2x16x16x4xbf16>, vector<2x16x16x4xbf16>, vector<2x16x16x4xbf16>, vector<2x16x16x4xbf16>, vector<2x16x16x4xbf16> -> vector<2x16x16x36xbf16>
    %23 = vector.shape_cast %22 : vector<2x16x16x36xbf16> to vector<512x36xbf16>
    %c0_24 = arith.constant 0 : index
    %c0_25 = arith.constant 0 : index
    %24 = vector.load %arg4[%c0_24, %c0_25] : memref<36x128xbf16, #tpu.memory_space<vmem>>, vector<36x128xbf16>
    %cst = arith.constant dense<0.000000e+00> : vector<512x128xf32>
    %25 = tpu.matmul %23, %24, %cst {dimension_numbers = #tpu.dot_dimension_numbers<[1], [0], [0], [1], [0, 0, 1, 1], [], []>} : vector<512x36xbf16>, vector<36x128xbf16>, vector<512x128xf32> -> vector<512x128xf32>
    %c0_26 = arith.constant 0 : index
    %c0_27 = arith.constant 0 : index
    %26 = vector.load %arg5[%c0_26, %c0_27] : memref<1x128xf32, #tpu.memory_space<vmem>>, vector<1x128xf32>
    %27 = vector.broadcast %26 : vector<1x128xf32> to vector<512x128xf32>
    %28 = arith.addf %25, %27 : vector<512x128xf32>
    %cst_28 = arith.constant 0.000000e+00 : f32
    %29 = vector.broadcast %cst_28 : f32 to vector<512x128xf32>
    %30 = arith.maximumf %28, %29 : vector<512x128xf32>
    %31 = vector.shape_cast %30 : vector<512x128xf32> to vector<2x16x16x128xf32>
    %c0_29 = arith.constant 0 : index
    %c0_30 = arith.constant 0 : index
    %c0_31 = arith.constant 0 : index
    %c0_32 = arith.constant 0 : index
    %32 = vector.load %arg6[%c0_29, %c0_30, %c0_31, %c0_32] : memref<2x16x16x128xf32, #tpu.memory_space<vmem>>, vector<2x16x16x128xf32>
    tpu.vector_store %arg6[%c0_29, %c0_30, %c0_31, %c0_32], %31 {strides = array<i32>} : memref<2x16x16x128xf32, #tpu.memory_space<vmem>>, vector<2x16x16x128xf32>,
    return
  }
  func.func @transform_0(%arg0: i32, %arg1: i32, %arg2: i32) -> (i32, i32, i32, i32) {
    %c0_i32 = arith.constant 0 : i32
    %c0_i32_0 = arith.constant 0 : i32
    %c0_i32_1 = arith.constant 0 : i32
    %c0_i32_2 = arith.constant 0 : i32
    return %arg0, %c0_i32, %c0_i32_0, %c0_i32_1 : i32, i32, i32, i32
  }
  func.func @transform_1(%arg0: i32, %arg1: i32, %arg2: i32) -> (i32, i32) {
    %c0_i32 = arith.constant 0 : i32
    %c0_i32_0 = arith.constant 0 : i32
    return %c0_i32, %arg2 : i32, i32
  }
  func.func @transform_2(%arg0: i32, %arg1: i32, %arg2: i32) -> (i32, i32) {
    %c0_i32 = arith.constant 0 : i32
    %c0_i32_0 = arith.constant 0 : i32
    return %c0_i32, %arg2 : i32, i32
  }
  func.func @transform_3(%arg0: i32, %arg1: i32, %arg2: i32) -> (i32, i32, i32, i32) {
    %c0_i32 = arith.constant 0 : i32
    %c0_i32_0 = arith.constant 0 : i32
    return %arg0, %arg1, %c0_i32, %arg2 : i32, i32, i32, i32
  }
}

</mosaic_0001>

<bundles_post_ra>
// kernel: tpu_custom_call.1
= control target key start
LH: loop header
LB: loop body
LE: loop exit
PB: predicated region body
PF: predicated region fallthrough
CT: control target
= control target key end

     0   :  { %vm668_vm0 = vsmask.f32 7424  ;;  %s5503_s13 = smov 4   ;;  %vm1213_vm1 = vcmask 1046528   ;;  %s5504_s25 = smov 8   ;;  %vm4034_vm2 = vcmask 1041408   ;;  %s9168_s0 = inlined_call_operand.vmem [shape: bf16[2,18,18,4], index: 0, kind: input, shape index: {}]   ;;  %s9169_s1 = inlined_call_operand.vmem [shape: bf16[36,128], index: 1, kind: input, shape index: {}]   ;;  %s9170_s2 = inlined_call_operand.vmem [shape: f32[1,128], index: 2, kind: input, shape index: {}]   ;;  %s9171_s3 = inlined_call_operand.hbm [shape: f32[2,16,16,128], index: 3, kind: output, shape index: {}]  }
   0x1   :  { %v24_v0 = vld [vmem:[%s9168_s0 + $0x18] sm:$0xf]  ;;  %v5539_v1 = vld [vmem:[%s9168_s0 + $0x1c] sm:$0xf]  ;;  %v20_v4 = vld [vmem:[%s9168_s0] sm:$0xf] }
   0x2   :  { %v5542_v2 = vcombine.low %v24_v0, %v5539_v1  ;;  %v5547_v3 = vld [vmem:[%s9168_s0 + $0x20] ss:$0 sps:$4 sm:$0x11]   ;;  %v5555_v5 = vld [vmem:[%s9168_s0 + $0x4] sm:$0xf]  ;;  %s5505_s23 = smov 12  }
   0x3   :  { %v701_v8 = vshll.u32 %v5547_v3, 16  ;;  %v5561_v9 = vcombine.low %v20_v4, %v5555_v5  ;;  %v5566_v10 = vld [vmem:[%s9168_s0 + $0x8] ss:$0 sps:$4 sm:$0x11]   ;;  %v26_v11 = vld [vmem:[%s9168_s0 + $0x24] sm:$0xf] }
   0x4   :  { %9236 = vst [vmem:[#allocation5_spill] sm:$0xff] %v5542_v2  ;;  %v694_v6 = vshrl.u32 %v5542_v2, 16  ;;  %v696_v7 = vshll.u32 %v5542_v2, 16  ;;  %v5574_v12 = vld [vmem:[%s9168_s0 + $0x28] sm:$0xf]  ;;  %v677_v18 = vshll.u32 %v5566_v10, 16 }
   0x5   :  { %9237 = vst [vmem:[#allocation6_spill] sm:$0xff] %v5561_v9  ;;  %v703_v14 = vrot.slane %v701_v8, 1  ;;  %v670_v15 = vshrl.u32 %v5561_v9, 16  ;;  %v672_v16 = vshll.u32 %v5561_v9, 16  ;;  %v22_v17 = vld [vmem:[%s9168_s0 + $0xc] sm:$0xf]  ;;  %v5583_v19 = vcombine.low %v26_v11, %v5574_v12 }
   0x6   :  { %v698_v13 = vrot.slane %v696_v7, 1  ;;  %v5588_v20 = vld [vmem:[%s9168_s0 + $0x2c] ss:$0 sps:$4 sm:$0x11]   ;;  %v5593_v21 = vld [vmem:[%s9168_s0 + $0x10] sm:$0xf] }
   0x7   :  { %9238 = vst [vmem:[#allocation7_spill] sm:$0xff] %v5583_v19  ;;  %v674_v23 = vrot.slane %v672_v16, 1  ;;  %v5596_v24 = vcombine.low %v22_v17, %v5593_v21  ;;  %v5601_v25 = vld [vmem:[%s9168_s0 + $0x14] ss:$0 sps:$4 sm:$0x11]   ;;  %v679_v26 = vrot.slane %v677_v18, 1 }
   0x8   :  { %v699_v22 = vor.u32 %v698_v13, %v694_v6  ;;  %v706_v27 = vshrl.u32 %v5583_v19, 16  ;;  %v708_v28 = vshll.u32 %v5583_v19, 16  ;;  %v713_v29 = vshll.u32 %v5588_v20, 16  ;;  %v30_v30 = vld [vmem:[%s9168_s0 + $0x3c] sm:$0xf]  ;;  %s5506_s11 = smov 16  }
   0x9   :  { %9239 = vst [vmem:[#allocation8_spill] sm:$0xff] %v5596_v24  ;;  %v675_v32 = vor.u32 %v674_v23, %v670_v15  ;;  %v682_v33 = vshrl.u32 %v5596_v24, 16  ;;  %v684_v34 = vshll.u32 %v5596_v24, 16  ;;  %v5615_v35 = vld [vmem:[%s9168_s0 + $0x40] sm:$0xf]  ;;  %v689_v38 = vshll.u32 %v5601_v25, 16 }
   0xa   :  { %v704_v31 = vsel %vm668_vm0, %v699_v22, %v703_v14  ;;  %v710_v36 = vrot.slane %v708_v28, 1  ;;  %v715_v37 = vrot.slane %v713_v29, 1  ;;  %v5620_v39 = vcombine.low %v30_v30, %v5615_v35  ;;  %v5625_v40 = vld [vmem:[%s9168_s0 + $0x44] ss:$0 sps:$4 sm:$0x11]   ;;  %s5507_s5 = smov 20  }
   0xb   :  { %1057 = vrot.lane.b32.xlu1 %v704_v31, %s5503_s13  ;;  %v680_v41 = vsel %vm668_vm0, %v675_v32, %v679_v26  ;;  %v686_v42 = vrot.slane %v684_v34, 1  ;;  %v28_v43 = vld [vmem:[%s9168_s0 + $0x30] sm:$0xf]  ;;  %v5634_v44 = vld [vmem:[%s9168_s0 + $0x34] sm:$0xf]  ;;  %v691_v46 = vrot.slane %v689_v38, 1 }
   0xc   :  { %9240 = vst [vmem:[#allocation9_spill] sm:$0xff] %v5620_v39  ;;  %1053 = vrot.lane.b32.xlu0 %v680_v41, %s5503_s13  ;;  %v711_v45 = vor.u32 %v710_v36, %v706_v27  ;;  %v730_v47 = vshrl.u32 %v5620_v39, 16  ;;  %v732_v48 = vshll.u32 %v5620_v39, 16  ;;  %v737_v50 = vshll.u32 %v5625_v40, 16  ;;  %v34_v53 = vld [vmem:[%s9168_s0 + $0x54] sm:$0xf] }
   0xd   :  { %v687_v49 = vor.u32 %v686_v42, %v682_v33  ;;  %v5641_v51 = vcombine.low %v28_v43, %v5634_v44  ;;  %v5646_v52 = vld [vmem:[%s9168_s0 + $0x38] ss:$0 sps:$4 sm:$0x11]   ;;  %v5665_v62 = vld [vmem:[%s9168_s0 + $0x5c] ss:$0 sps:$4 sm:$0x11]  }
   0xe   :  { %v716_v54 = vsel %vm668_vm0, %v711_v45, %v715_v37  ;;  %v734_v55 = vrot.slane %v732_v48, 1  ;;  %v5655_v56 = vld [vmem:[%s9168_s0 + $0x58] sm:$0xf]  ;;  %v739_v59 = vrot.slane %v737_v50, 1  ;;  %v725_v0 = vshll.u32 %v5646_v52, 16  ;;  %s5508_s18 = smov 24  }
   0xf   :  { %9241 = vst [vmem:[#allocation10_spill] sm:$0xff] %v5641_v51  ;;  %1059 = vrot.lane.b32.xlu1 %v716_v54, %s5503_s13  ;;  %v692_v58 = vsel %vm668_vm0, %v687_v49, %v691_v46  ;;  %v718_v60 = vshrl.u32 %v5641_v51, 16  ;;  %v720_v61 = vshll.u32 %v5641_v51, 16  ;;  %v5670_v4 = vcombine.low %v34_v53, %v5655_v56  ;;  %v32_v6 = vld [vmem:[%s9168_s0 + $0x48] sm:$0xf]  ;;  %s5510_s19 = smov 32  }
  0x10   :  { %1055 = vrot.lane.b32.xlu0 %v692_v58, %s5503_s13  ;;  %v735_v63 = vor.u32 %v734_v55, %v730_v47  ;;  %v5678_v7 = vld [vmem:[%s9168_s0 + $0x4c] sm:$0xf]  ;;  %v761_v13 = vshll.u32 %v5665_v62, 16  ;;  %v727_v17 = vrot.slane %v725_v0, 1  ;;  %v5702_v30 = vld [vmem:[%s9168_s0 + $0x70] sm:$0xf] }
  0x11   :  { %9242 = vst [vmem:[#allocation11_spill] sm:$0xff] %v5670_v4  ;;  %v722_v11 = vrot.slane %v720_v61, 1  ;;  %v5683_v14 = vcombine.low %v32_v6, %v5678_v7  ;;  %v38_v15 = vld [vmem:[%s9168_s0 + $0x6c] sm:$0xf]  ;;  %v754_v18 = vshrl.u32 %v5670_v4, 16  ;;  %v756_v22 = vshll.u32 %v5670_v4, 16 }
  0x12   :  { %v740_v16 = vsel %vm668_vm0, %v735_v63, %v739_v59  ;;  %v5694_v23 = vld [vmem:[%s9168_s0 + $0x50] ss:$0 sps:$4 sm:$0x11]   ;;  %v763_v27 = vrot.slane %v761_v13, 1  ;;  %v5706_v33 = vcombine.low %v38_v15, %v5702_v30  ;;  %v36_v34 = vld [vmem:[%s9168_s0 + $0x60] sm:$0xf] }
  0x13   :  { %9243 = vst [vmem:[#allocation12_spill] sm:$0xff] %v5683_v14  ;;  %1063 = vrot.lane.b32.xlu1 %v740_v16, %s5503_s13  ;;  %v723_v26 = vor.u32 %v722_v11, %v718_v60  ;;  %v742_v28 = vshrl.u32 %v5683_v14, 16  ;;  %v744_v29 = vshll.u32 %v5683_v14, 16  ;;  %v758_v31 = vrot.slane %v756_v22, 1  ;;  %v5720_v41 = vld [vmem:[%s9168_s0 + $0x64] sm:$0xf] }
  0x14   :  { %v749_v32 = vshll.u32 %v5694_v23, 16  ;;  %9244 = vst [vmem:[#allocation13_spill] sm:$0xff] %v5706_v33  ;;  %v5715_v38 = vld [vmem:[%s9168_s0 + $0x74] ss:$0 sps:$4 sm:$0x11]   ;;  %v778_v45 = vshrl.u32 %v5706_v33, 16  ;;  %v5727_v49 = vcombine.low %v36_v34, %v5720_v41 }
  0x15   :  { %v728_v36 = vsel %vm668_vm0, %v723_v26, %v727_v17  ;;  %v746_v37 = vrot.slane %v744_v29, 1  ;;  %v759_v42 = vor.u32 %v758_v31, %v754_v18  ;;  %v780_v46 = vshll.u32 %v5706_v33, 16  ;;  %v5732_v50 = vld [vmem:[%s9168_s0 + $0x68] ss:$0 sps:$4 sm:$0x11]  }
  0x16   :  { %1061 = vrot.lane.b32.xlu0 %v728_v36, %s5503_s13  ;;  %v751_v43 = vrot.slane %v749_v32, 1  ;;  %v785_v48 = vshll.u32 %v5715_v38, 16  ;;  %9245 = vst [vmem:[#allocation14_spill] sm:$0xff] %v5727_v49  ;;  %v42_v53 = vld [vmem:[%s9168_s0 + $0x84] sm:$0xf]  ;;  %v766_v63 = vshrl.u32 %v5727_v49, 16 }
  0x17   :  { %v747_v47 = vor.u32 %v746_v37, %v742_v28  ;;  %v764_v54 = vsel %vm668_vm0, %v759_v42, %v763_v27  ;;  %v782_v55 = vrot.slane %v780_v46, 1  ;;  %v5741_v58 = vld [vmem:[%s9168_s0 + $0x88] sm:$0xf]  ;;  %v768_v0 = vshll.u32 %v5727_v49, 16  ;;  %v40_v16 = vld [vmem:[%s9168_s0 + $0x78] sm:$0xf] }
  0x18   :  { %1067 = vrot.lane.b32.xlu1 %v764_v54, %s5503_s13  ;;  %v787_v61 = vrot.slane %v785_v48, 1  ;;  %v5751_v6 = vld [vmem:[%s9168_s0 + $0x8c] ss:$0 sps:$4 sm:$0x11]   ;;  %v773_v13 = vshll.u32 %v5732_v50, 16  ;;  %v5756_v15 = vcombine.low %v42_v53, %v5741_v58 }
  0x19   :  { %v752_v60 = vsel %vm668_vm0, %v747_v47, %v751_v43  ;;  %v783_v11 = vor.u32 %v782_v55, %v778_v45  ;;  %v5764_v17 = vld [vmem:[%s9168_s0 + $0x7c] sm:$0xf]  ;;  %v770_v22 = vrot.slane %v768_v0, 1  ;;  %v809_v26 = vshll.u32 %v5751_v6, 16  ;;  %v5788_v46 = vld [vmem:[%s9168_s0 + $0xa0] sm:$0xf] }
  0x1a   :  { %1065 = vrot.lane.b32.xlu0 %v752_v60, %s5503_s13  ;;  %9246 = vst [vmem:[#allocation15_spill] sm:$0xff] %v5756_v15  ;;  %v5769_v27 = vcombine.low %v40_v16, %v5764_v17  ;;  %v46_v28 = vld [vmem:[%s9168_s0 + $0x9c] sm:$0xf]  ;;  %v775_v31 = vrot.slane %v773_v13, 1  ;;  %v802_v32 = vshrl.u32 %v5756_v15, 16  ;;  %v804_v34 = vshll.u32 %v5756_v15, 16 }
  0x1b   :  { %v788_v29 = vsel %vm668_vm0, %v783_v11, %v787_v61  ;;  %v5780_v36 = vld [vmem:[%s9168_s0 + $0x80] ss:$0 sps:$4 sm:$0x11]   ;;  %v771_v37 = vor.u32 %v770_v22, %v766_v63  ;;  %v811_v42 = vrot.slane %v809_v26, 1  ;;  %v5792_v53 = vcombine.low %v46_v28, %v5788_v46  ;;  %v44_v54 = vld [vmem:[%s9168_s0 + $0x90] sm:$0xf] }
  0x1c   :  { %9247 = vst [vmem:[#allocation16_spill] sm:$0xff] %v5769_v27  ;;  %1071 = vrot.lane.b32.xlu1 %v788_v29, %s5503_s13  ;;  %v790_v43 = vshrl.u32 %v5769_v27, 16  ;;  %v792_v45 = vshll.u32 %v5769_v27, 16  ;;  %v806_v47 = vrot.slane %v804_v34, 1  ;;  %v797_v48 = vshll.u32 %v5780_v36, 16 }
  0x1d   :  { %9248 = vst [vmem:[#allocation17_spill] sm:$0xff] %v5792_v53  ;;  %v776_v55 = vsel %vm668_vm0, %v771_v37, %v775_v31  ;;  %v5801_v61 = vld [vmem:[%s9168_s0 + $0xa4] ss:$0 sps:$4 sm:$0x11]   ;;  %v5806_v63 = vld [vmem:[%s9168_s0 + $0x94] sm:$0xf] }
  0x1e   :  { %v794_v60 = vrot.slane %v792_v45, 1  ;;  %1069 = vrot.lane.b32.xlu0 %v776_v55, %s5503_s13  ;;  %v807_v0 = vor.u32 %v806_v47, %v802_v32  ;;  %v799_v11 = vrot.slane %v797_v48, 1  ;;  %v826_v13 = vshrl.u32 %v5792_v53, 16  ;;  %v5818_v29 = vld [vmem:[%s9168_s0 + $0x98] ss:$0 sps:$4 sm:$0x11]  }
  0x1f   :  { %v828_v16 = vshll.u32 %v5792_v53, 16  ;;  %v833_v26 = vshll.u32 %v5801_v61, 16  ;;  %v5813_v28 = vcombine.low %v44_v54, %v5806_v63  ;;  %v50_v31 = vld [vmem:[%s9168_s0 + $0xb4] sm:$0xf]  ;;  %v5827_v37 = vld [vmem:[%s9168_s0 + $0xb8] sm:$0xf] }
  0x20   :  { %v795_v22 = vor.u32 %v794_v60, %v790_v43  ;;  %v812_v32 = vsel %vm668_vm0, %v807_v0, %v811_v42  ;;  %v5837_v42 = vld [vmem:[%s9168_s0 + $0xbc] ss:$0 sps:$4 sm:$0x11]   ;;  %v821_v60 = vshll.u32 %v5818_v29, 16  ;;  %v5842_v0 = vcombine.low %v50_v31, %v5827_v37  ;;  %v54_v31 = vld [vmem:[%s9168_s0 + $0xe4] sm:$0xf] }
  0x21   :  { %9249 = vst [vmem:[#allocation18_spill] sm:$0xff] %v5813_v28  ;;  %v830_v34 = vrot.slane %v828_v16, 1  ;;  %1075 = vrot.lane.b32.xlu1 %v812_v32, %s5503_s13  ;;  %v835_v47 = vrot.slane %v833_v26, 1  ;;  %v814_v48 = vshrl.u32 %v5813_v28, 16  ;;  %v816_v54 = vshll.u32 %v5813_v28, 16 }
  0x22   :  { %v800_v45 = vsel %vm668_vm0, %v795_v22, %v799_v11  ;;  %9250 = vst [vmem:[#allocation19_spill] sm:$0xff] %v5842_v0  ;;  %v48_v11 = vld [vmem:[%s9168_s0 + $0xa8] sm:$0xf]  ;;  %v5850_v16 = vld [vmem:[%s9168_s0 + $0xac] sm:$0xf]  ;;  %v857_v32 = vshll.u32 %v5837_v42, 16 }
  0x23   :  { %1073 = vrot.lane.b32.xlu0 %v800_v45, %s5503_s13  ;;  %v831_v55 = vor.u32 %v830_v34, %v826_v13  ;;  %v818_v26 = vrot.slane %v816_v54, 1  ;;  %v5855_v13 = vcombine.low %v48_v11, %v5850_v16  ;;  %v823_v45 = vrot.slane %v821_v60, 1  ;;  %v5866_v54 = vld [vmem:[%s9168_s0 + $0xb0] ss:$0 sps:$4 sm:$0x11]  }
  0x24   :  { %v850_v43 = vshrl.u32 %v5842_v0, 16  ;;  %v852_v18 = vshll.u32 %v5842_v0, 16  ;;  %v859_v22 = vrot.slane %v857_v32, 1  ;;  %v845_v60 = vshll.u32 %v5866_v54, 16 }
  0x25   :  { %9251 = vst [vmem:[#allocation20_spill] sm:$0xff] %v5855_v13  ;;  %v836_v34 = vsel %vm668_vm0, %v831_v55, %v835_v47  ;;  %v819_v11 = vor.u32 %v818_v26, %v814_v48  ;;  %v838_v59 = vshrl.u32 %v5855_v13, 16  ;;  %v840_v8 = vshll.u32 %v5855_v13, 16  ;;  %v5874_v47 = vld [vmem:[%s9168_s0 + $0xe8] sm:$0xf] }
  0x26   :  { %1079 = vrot.lane.b32.xlu1 %v836_v34, %s5503_s13  ;;  %v854_v55 = vrot.slane %v852_v18, 1  ;;  %v5878_v57 = vcombine.low %v54_v31, %v5874_v47  ;;  %v52_v48 = vld [vmem:[%s9168_s0 + $0xd8] sm:$0xf]  ;;  %v5887_v34 = vld [vmem:[%s9168_s0 + $0xec] ss:$0 sps:$4 sm:$0x11]  }
  0x27   :  { %v824_v26 = vsel %vm668_vm0, %v819_v11, %v823_v45  ;;  %v842_v32 = vrot.slane %v840_v8, 1  ;;  %v5892_v18 = vld [vmem:[%s9168_s0 + $0xdc] sm:$0xf]  ;;  %v847_v0 = vrot.slane %v845_v60, 1  ;;  %v881_v8 = vshll.u32 %v5887_v34, 16 }
  0x28   :  { %9252 = vst [vmem:[#allocation21_spill] sm:$0xff] %v5878_v57  ;;  %1077 = vrot.lane.b32.xlu0 %v824_v26, %s5503_s13  ;;  %v855_v31 = vor.u32 %v854_v55, %v850_v43  ;;  %v874_v13 = vshrl.u32 %v5878_v57, 16  ;;  %v876_v53 = vshll.u32 %v5878_v57, 16  ;;  %v5899_v11 = vcombine.low %v52_v48, %v5892_v18  ;;  %v5904_v28 = vld [vmem:[%s9168_s0 + $0xe0] ss:$0 sps:$4 sm:$0x11]  }
  0x29   :  { %v843_v45 = vor.u32 %v842_v32, %v838_v59  ;;  %v58_v43 = vld [vmem:[%s9168_s0 + $0xfc] sm:$0xf]  ;;  %v5913_v59 = vld [vmem:[%s9168_s0 + $0x100] sm:$0xf]  ;;  %v883_v32 = vrot.slane %v881_v8, 1 }
  0x2a   :  { %9253 = vst [vmem:[#allocation22_spill] sm:$0xff] %v5899_v11  ;;  %v860_v55 = vsel %vm668_vm0, %v855_v31, %v859_v22  ;;  %v878_v60 = vrot.slane %v876_v53, 1  ;;  %v862_v15 = vshrl.u32 %v5899_v11, 16  ;;  %v864_v27 = vshll.u32 %v5899_v11, 16 }
  0x2b   :  { %1083 = vrot.lane.b32.xlu1 %v860_v55, %s5503_s13  ;;  %v848_v26 = vsel %vm668_vm0, %v843_v45, %v847_v0  ;;  %v5923_v53 = vld [vmem:[%s9168_s0 + $0x104] ss:$0 sps:$4 sm:$0x11]   ;;  %v869_v31 = vshll.u32 %v5904_v28, 16  ;;  %v5928_v48 = vcombine.low %v58_v43, %v5913_v59  ;;  %v56_v0 = vld [vmem:[%s9168_s0 + $0xf0] sm:$0xf] }
  0x2c   :  { %1081 = vrot.lane.b32.xlu0 %v848_v26, %s5503_s13  ;;  %v879_v22 = vor.u32 %v878_v60, %v874_v13  ;;  %v5936_v45 = vld [vmem:[%s9168_s0 + $0xf4] sm:$0xf]  ;;  %v866_v55 = vrot.slane %v864_v27, 1  ;;  %v905_v26 = vshll.u32 %v5923_v53, 16 }
  0x2d   :  { %9254 = vst [vmem:[#allocation23_spill] sm:$0xff] %v5928_v48  ;;  %v5941_v13 = vcombine.low %v56_v0, %v5936_v45  ;;  %v62_v43 = vld [vmem:[%s9168_s0 + $0x114] sm:$0xf]  ;;  %v871_v49 = vrot.slane %v869_v31, 1  ;;  %v898_v33 = vshrl.u32 %v5928_v48, 16  ;;  %v900_v14 = vshll.u32 %v5928_v48, 16 }
  0x2e   :  { %v884_v60 = vsel %vm668_vm0, %v879_v22, %v883_v32  ;;  %v5952_v27 = vld [vmem:[%s9168_s0 + $0xf8] ss:$0 sps:$4 sm:$0x11]   ;;  %v867_v0 = vor.u32 %v866_v55, %v862_v15  ;;  %v907_v8 = vrot.slane %v905_v26, 1  ;;  %v60_v15 = vld [vmem:[%s9168_s0 + $0x108] sm:$0xf] }
  0x2f   :  { %9255 = vst [vmem:[#allocation24_spill] sm:$0xff] %v5941_v13  ;;  %1087 = vrot.lane.b32.xlu1 %v884_v60, %s5503_s13  ;;  %v886_v4 = vshrl.u32 %v5941_v13, 16  ;;  %v888_v51 = vshll.u32 %v5941_v13, 16  ;;  %v5960_v32 = vld [vmem:[%s9168_s0 + $0x118] sm:$0xf]  ;;  %v902_v22 = vrot.slane %v900_v14, 1 }
  0x30   :  { %v893_v31 = vshll.u32 %v5952_v27, 16  ;;  %v5964_v39 = vcombine.low %v62_v43, %v5960_v32  ;;  %v872_v55 = vsel %vm668_vm0, %v867_v0, %v871_v49  ;;  %v5973_v60 = vld [vmem:[%s9168_s0 + $0x11c] ss:$0 sps:$4 sm:$0x11]   ;;  %v5978_v14 = vld [vmem:[%s9168_s0 + $0x10c] sm:$0xf] }
  0x31   :  { %v890_v26 = vrot.slane %v888_v51, 1  ;;  %1085 = vrot.lane.b32.xlu0 %v872_v55, %s5503_s13  ;;  %v903_v43 = vor.u32 %v902_v22, %v898_v33  ;;  %v929_v51 = vshll.u32 %v5973_v60, 16  ;;  %v5985_v0 = vcombine.low %v60_v15, %v5978_v14  ;;  %v5990_v2 = vld [vmem:[%s9168_s0 + $0x110] ss:$0 sps:$4 sm:$0x11]  }
  0x32   :  { %9256 = vst [vmem:[#allocation25_spill] sm:$0xff] %v5964_v39  ;;  %v895_v13 = vrot.slane %v893_v31, 1  ;;  %v922_v48 = vshrl.u32 %v5964_v39, 16  ;;  %v924_v19 = vshll.u32 %v5964_v39, 16  ;;  %v66_v33 = vld [vmem:[%s9168_s0 + $0x12c] sm:$0xf] }
  0x33   :  { %v891_v49 = vor.u32 %v890_v26, %v886_v4  ;;  %9257 = vst [vmem:[#allocation26_spill] sm:$0xff] %v5985_v0  ;;  %v908_v22 = vsel %vm668_vm0, %v903_v43, %v907_v8  ;;  %v5999_v4 = vld [vmem:[%s9168_s0 + $0x130] sm:$0xf]  ;;  %v931_v26 = vrot.slane %v929_v51, 1  ;;  %v910_v39 = vshrl.u32 %v5985_v0, 16 }
  0x34   :  { %v926_v31 = vrot.slane %v924_v19, 1  ;;  %9258 = vst [vmem:[#allocation27_spill] sm:$0xff] %v5999_v4  ;;  %1091 = vrot.lane.b32.xlu1 %v908_v22, %s5503_s13  ;;  %v912_v11 = vshll.u32 %v5985_v0, 16  ;;  %v6009_v19 = vld [vmem:[%s9168_s0 + $0x134] ss:$0 sps:$4 sm:$0x11]   ;;  %v6014_v15 = vcombine.low %v66_v33, %v5999_v4 }
  0x35   :  { %v896_v55 = vsel %vm668_vm0, %v891_v49, %v895_v13  ;;  %9259 = vst [vmem:[#allocation28_spill] sm:$0xff] %v6009_v19  ;;  %v917_v43 = vshll.u32 %v5990_v2, 16  ;;  %v64_v13 = vld [vmem:[%s9168_s0 + $0x120] sm:$0xf]  ;;  %v6022_v49 = vld [vmem:[%s9168_s0 + $0x124] sm:$0xf] }
  0x36   :  { %1089 = vrot.lane.b32.xlu0 %v896_v55, %s5503_s13  ;;  %v927_v8 = vor.u32 %v926_v31, %v922_v48  ;;  %9260 = vst [vmem:[#allocation29_spill] sm:$0xff] %v6014_v15  ;;  %9261 = vst [vmem:[#allocation30_spill] sm:$0xff] %v6022_v49  ;;  %v914_v22 = vrot.slane %v912_v11, 1  ;;  %v953_v55 = vshll.u32 %v6009_v19, 16  ;;  %v6027_v48 = vcombine.low %v64_v13, %v6022_v49  ;;  %v70_v33 = vld [vmem:[%s9168_s0 + $0x144] sm:$0xf] }
  0x37   :  { %v919_v0 = vrot.slane %v917_v43, 1  ;;  %v946_v57 = vshrl.u32 %v6014_v15, 16  ;;  %v948_v24 = vshll.u32 %v6014_v15, 16  ;;  %v6038_v11 = vld [vmem:[%s9168_s0 + $0x128] ss:$0 sps:$4 sm:$0x11]  }
  0x38   :  { %9262 = vst [vmem:[#allocation31_spill] sm:$0xff] %v6027_v48  ;;  %v932_v31 = vsel %vm668_vm0, %v927_v8, %v931_v26  ;;  %9263 = vst [vmem:[#allocation32_spill] sm:$0xff] %v6038_v11  ;;  %v915_v13 = vor.u32 %v914_v22, %v910_v39  ;;  %v955_v51 = vrot.slane %v953_v55, 1  ;;  %v934_v9 = vshrl.u32 %v6027_v48, 16  ;;  %v6046_v26 = vld [vmem:[%s9168_s0 + $0x148] sm:$0xf] }
  0x39   :  { %1095 = vrot.lane.b32.xlu1 %v932_v31, %s5503_s13  ;;  %v936_v49 = vshll.u32 %v6027_v48, 16  ;;  %9264 = vst [vmem:[#allocation33_spill] sm:$0xff] %v6046_v26  ;;  %v950_v8 = vrot.slane %v948_v24, 1  ;;  %v941_v43 = vshll.u32 %v6038_v11, 16  ;;  %v6050_v15 = vcombine.low %v70_v33, %v6046_v26  ;;  %v68_v39 = vld [vmem:[%s9168_s0 + $0x138] sm:$0xf] }
  0x3a   :  { %v920_v22 = vsel %vm668_vm0, %v915_v13, %v919_v0  ;;  %v6059_v31 = vld [vmem:[%s9168_s0 + $0x14c] ss:$0 sps:$4 sm:$0x11]   ;;  %v6064_v24 = vld [vmem:[%s9168_s0 + $0x13c] sm:$0xf] }
  0x3b   :  { %9265 = vst [vmem:[#allocation34_spill] sm:$0xff] %v6050_v15  ;;  %v938_v55 = vrot.slane %v936_v49, 1  ;;  %9266 = vst [vmem:[#allocation35_spill] sm:$0xff] %v6059_v31  ;;  %1093 = vrot.lane.b32.xlu0 %v920_v22, %s5503_s13  ;;  %v951_v33 = vor.u32 %v950_v8, %v946_v57  ;;  %v943_v48 = vrot.slane %v941_v43, 1  ;;  %v970_v26 = vshrl.u32 %v6050_v15, 16 }
  0x3c   :  { %9267 = vst [vmem:[#allocation36_spill] sm:$0xff] %v6064_v24  ;;  %v972_v11 = vshll.u32 %v6050_v15, 16  ;;  %v977_v49 = vshll.u32 %v6059_v31, 16  ;;  %v6071_v13 = vcombine.low %v68_v39, %v6064_v24  ;;  %v6076_v19 = vld [vmem:[%s9168_s0 + $0x140] ss:$0 sps:$4 sm:$0x11]  }
  0x3d   :  { %v939_v0 = vor.u32 %v938_v55, %v934_v9  ;;  %9269 = vst [vmem:[#allocation38_spill] sm:$0xff] %v6076_v19  ;;  %v74_v57 = vld [vmem:[%s9168_s0 + $0x15c] sm:$0xf]  ;;  %v956_v8 = vsel %vm668_vm0, %v951_v33, %v955_v51  ;;  %v6085_v9 = vld [vmem:[%s9168_s0 + $0x160] sm:$0xf]  ;;  %v965_v33 = vshll.u32 %v6076_v19, 16 }
  0x3e   :  { %9268 = vst [vmem:[#allocation37_spill] sm:$0xff] %v6071_v13  ;;  %v974_v43 = vrot.slane %v972_v11, 1  ;;  %9270 = vst [vmem:[#allocation39_spill] sm:$0xff] %v6085_v9  ;;  %1099 = vrot.lane.b32.xlu1 %v956_v8, %s5503_s13  ;;  %v979_v55 = vrot.slane %v977_v49, 1  ;;  %v958_v15 = vshrl.u32 %v6071_v13, 16  ;;  %v960_v24 = vshll.u32 %v6071_v13, 16 }
  0x3f   :  { %v944_v22 = vsel %vm668_vm0, %v939_v0, %v943_v48  ;;  %v6095_v51 = vld [vmem:[%s9168_s0 + $0x164] ss:$0 sps:$4 sm:$0x11]   ;;  %v6100_v39 = vcombine.low %v74_v57, %v6085_v9  ;;  %v72_v48 = vld [vmem:[%s9168_s0 + $0x150] sm:$0xf]  ;;  %v967_v13 = vrot.slane %v965_v33, 1 }
  0x40   :  { %9271 = vst [vmem:[#allocation40_spill] sm:$0xff] %v6095_v51  ;;  %1097 = vrot.lane.b32.xlu0 %v944_v22, %s5503_s13  ;;  %v975_v11 = vor.u32 %v974_v43, %v970_v26  ;;  %v6108_v0 = vld [vmem:[%s9168_s0 + $0x154] sm:$0xf]  ;;  %v962_v8 = vrot.slane %v960_v24, 1  ;;  %v1001_v22 = vshll.u32 %v6095_v51, 16 }
  0x41   :  { %9272 = vst [vmem:[#allocation41_spill] sm:$0xff] %v6100_v39  ;;  %9273 = vst [vmem:[#allocation42_spill] sm:$0xff] %v6108_v0  ;;  %v6113_v26 = vcombine.low %v72_v48, %v6108_v0  ;;  %v78_v57 = vld [vmem:[%s9168_s0 + $0x174] sm:$0xf]  ;;  %v994_v9 = vshrl.u32 %v6100_v39, 16  ;;  %v996_v19 = vshll.u32 %v6100_v39, 16 }
  0x42   :  { %v980_v43 = vsel %vm668_vm0, %v975_v11, %v979_v55  ;;  %v6124_v24 = vld [vmem:[%s9168_s0 + $0x158] ss:$0 sps:$4 sm:$0x11]   ;;  %v963_v48 = vor.u32 %v962_v8, %v958_v15  ;;  %v1003_v49 = vrot.slane %v1001_v22, 1  ;;  %v76_v15 = vld [vmem:[%s9168_s0 + $0x168] sm:$0xf] }
  0x43   :  { %9274 = vst [vmem:[#allocation43_spill] sm:$0xff] %v6113_v26  ;;  %9275 = vst [vmem:[#allocation44_spill] sm:$0xff] %v6124_v24  ;;  %1103 = vrot.lane.b32.xlu1 %v980_v43, %s5503_s13  ;;  %v982_v0 = vshrl.u32 %v6113_v26, 16  ;;  %v984_v51 = vshll.u32 %v6113_v26, 16  ;;  %v6132_v55 = vld [vmem:[%s9168_s0 + $0x178] sm:$0xf] }
  0x44   :  { %9276 = vst [vmem:[#allocation45_spill] sm:$0xff] %v6132_v55  ;;  %v998_v11 = vrot.slane %v996_v19, 1  ;;  %v989_v33 = vshll.u32 %v6124_v24, 16  ;;  %v6136_v39 = vcombine.low %v78_v57, %v6132_v55  ;;  %v968_v8 = vsel %vm668_vm0, %v963_v48, %v967_v13  ;;  %v6145_v43 = vld [vmem:[%s9168_s0 + $0x17c] ss:$0 sps:$4 sm:$0x11]  }
  0x45   :  { %v986_v22 = vrot.slane %v984_v51, 1  ;;  %9278 = vst [vmem:[#allocation47_spill] sm:$0xff] %v6145_v43  ;;  %v6150_v19 = vld [vmem:[%s9168_s0 + $0x16c] sm:$0xf]  ;;  %1101 = vrot.lane.b32.xlu0 %v968_v8, %s5503_s13  ;;  %v1025_v51 = vshll.u32 %v6145_v43, 16 }
  0x46   :  { %9277 = vst [vmem:[#allocation46_spill] sm:$0xff] %v6136_v39  ;;  %9279 = vst [vmem:[#allocation48_spill] sm:$0xff] %v6150_v19  ;;  %v999_v57 = vor.u32 %v998_v11, %v994_v9  ;;  %v991_v26 = vrot.slane %v989_v33, 1  ;;  %v1018_v55 = vshrl.u32 %v6136_v39, 16  ;;  %v1020_v24 = vshll.u32 %v6136_v39, 16 }
  0x47   :  { %v987_v13 = vor.u32 %v986_v22, %v982_v0  ;;  %v6157_v48 = vcombine.low %v76_v15, %v6150_v19  ;;  %v6162_v31 = vld [vmem:[%s9168_s0 + $0x170] ss:$0 sps:$4 sm:$0x11]   ;;  %v82_v9 = vld [vmem:[%s9168_s0 + $0x18c] sm:$0xf]  ;;  %v1027_v22 = vrot.slane %v1025_v51, 1 }
  0x48   :  { %9281 = vst [vmem:[#allocation50_spill] sm:$0xff] %v6162_v31  ;;  %v1004_v11 = vsel %vm668_vm0, %v999_v57, %v1003_v49  ;;  %v1022_v33 = vrot.slane %v1020_v24, 1  ;;  %v6171_v0 = vld [vmem:[%s9168_s0 + $0x190] sm:$0xf]  ;;  %v1013_v57 = vshll.u32 %v6162_v31, 16 }
  0x49   :  { %9280 = vst [vmem:[#allocation49_spill] sm:$0xff] %v6157_v48  ;;  %9282 = vst [vmem:[#allocation51_spill] sm:$0xff] %v6171_v0  ;;  %1107 = vrot.lane.b32.xlu1 %v1004_v11, %s5503_s13  ;;  %v992_v8 = vsel %vm668_vm0, %v987_v13, %v991_v26  ;;  %v1006_v39 = vshrl.u32 %v6157_v48, 16  ;;  %v1008_v19 = vshll.u32 %v6157_v48, 16  ;;  %v6186_v15 = vcombine.low %v82_v9, %v6171_v0  ;;  %v80_v26 = vld [vmem:[%s9168_s0 + $0x180] sm:$0xf] }
  0x4a   :  { %v6181_v49 = vld [vmem:[%s9168_s0 + $0x194] ss:$0 sps:$4 sm:$0x11]   ;;  %1105 = vrot.lane.b32.xlu0 %v992_v8, %s5503_s13  ;;  %v1023_v24 = vor.u32 %v1022_v33, %v1018_v55  ;;  %v6194_v13 = vld [vmem:[%s9168_s0 + $0x184] sm:$0xf]  ;;  %v1015_v48 = vrot.slane %v1013_v57, 1 }
  0x4b   :  { %9283 = vst [vmem:[#allocation52_spill] sm:$0xff] %v6181_v49  ;;  %9284 = vst [vmem:[#allocation53_spill] sm:$0xff] %v6186_v15  ;;  %v1010_v11 = vrot.slane %v1008_v19, 1  ;;  %v1049_v8 = vshll.u32 %v6181_v49, 16  ;;  %v6199_v55 = vcombine.low %v80_v26, %v6194_v13  ;;  %v117_v9 = vld [vmem:[%s9168_s0 + $0xc] sm:$0xe] }
  0x4c   :  { %9285 = vst [vmem:[#allocation54_spill] sm:$0xff] %v6194_v13  ;;  %v1028_v33 = vsel %vm668_vm0, %v1023_v24, %v1027_v22  ;;  %v1042_v0 = vshrl.u32 %v6186_v15, 16  ;;  %v1044_v31 = vshll.u32 %v6186_v15, 16  ;;  %v6210_v19 = vld [vmem:[%s9168_s0 + $0x188] ss:$0 sps:$4 sm:$0x11]   ;;  %v4794_v15 = vcombine.low %v117_v9, %v5593_v21 }
  0x4d   :  { %9286 = vst [vmem:[#allocation55_spill] sm:$0xff] %v6199_v55  ;;  %9287 = vst [vmem:[#allocation56_spill] sm:$0xff] %v6210_v19  ;;  %1111 = vrot.lane.b32.xlu1 %v1028_v33, %s5503_s13  ;;  %v1011_v26 = vor.u32 %v1010_v11, %v1006_v39  ;;  %v1051_v51 = vrot.slane %v1049_v8, 1  ;;  %v1030_v13 = vshrl.u32 %v6199_v55, 16  ;;  %v1032_v49 = vshll.u32 %v6199_v55, 16 }
  0x4e   :  { %v116_v22 = vld [vmem:[%s9168_s0] sm:$0xe]  ;;  %v1046_v24 = vrot.slane %v1044_v31, 1  ;;  %v1037_v57 = vshll.u32 %v6210_v19, 16  ;;  %v119_v39 = vld [vmem:[%s9168_s0 + $0x24] sm:$0xe] }
  0x4f   :  { %v4793_v43 = vcombine.low %v116_v22, %v5555_v5  ;;  %v118_v11 = vld [vmem:[%s9168_s0 + $0x18] sm:$0xe]  ;;  %v1016_v8 = vsel %vm668_vm0, %v1011_v26, %v1015_v48  ;;  %v1034_v33 = vrot.slane %v1032_v49, 1  ;;  %v4796_v55 = vcombine.low %v119_v39, %v5574_v12  ;;  %v121_v21 = vld [vmem:[%s9168_s0 + $0x3c] sm:$0xe] }
  0x50   :  { %v4795_v31 = vcombine.low %v118_v11, %v5539_v1  ;;  %v120_v5 = vld [vmem:[%s9168_s0 + $0x30] sm:$0xe]  ;;  %1109 = vrot.lane.b32.xlu0 %v1016_v8, %s5503_s13  ;;  %v1047_v9 = vor.u32 %v1046_v24, %v1042_v0  ;;  %v1039_v22 = vrot.slane %v1037_v57, 1  ;;  %v1217_v19 = vrot.slane %v4794_v15, 1  ;;  %v123_v12 = vld [vmem:[%s9168_s0 + $0x54] sm:$0xe] }
  0x51   :  { %v1214_v4 = vrot.slane %v4793_v43, 1  ;;  %v1035_v48 = vor.u32 %v1034_v33, %v1030_v13  ;;  %v1223_v1 = vrot.slane %v4796_v55, 1  ;;  %v4798_v26 = vcombine.low %v121_v21, %v5615_v35  ;;  %v122_v39 = vld [vmem:[%s9168_s0 + $0x48] sm:$0xe]  ;;  %v125_v0 = vld [vmem:[%s9168_s0 + $0x6c] sm:$0xe] }
  0x52   :  { %v1220_v49 = vrot.slane %v4795_v31, 1  ;;  %v1052_v15 = vsel %vm668_vm0, %v1047_v9, %v1051_v51  ;;  %v9288_v43 = vrot.slane %v5601_v25, 1  ;;  %v9289_v13 = vrot.slane %v5566_v10, 1  ;;  %v124_v57 = vld [vmem:[%s9168_s0 + $0x60] sm:$0xe] }
  0x53   :  { %v4797_v35 = vcombine.low %v120_v5, %v5634_v44  ;;  %v127_v11 = vld [vmem:[%s9168_s0 + $0x84] sm:$0xe]  ;;  %v126_v25 = vld [vmem:[%s9168_s0 + $0x78] sm:$0xe]  ;;  %1115 = vrot.lane.b32.xlu1 %v1052_v15, %s5503_s13  ;;  %v1040_v10 = vsel %vm668_vm0, %v1035_v48, %v1039_v22  ;;  %v9291_v51 = vrot.slane %v5547_v3, 1  ;;  %v1229_v8 = vrot.slane %v4798_v26, 1 }
  0x54   :  { %v1219_v24 = vsel %vm1213_vm1, %v1217_v19, %v9288_v43  ;;  %v1216_v55 = vsel %vm1213_vm1, %v1214_v4, %v9289_v13  ;;  %v9290_v4 = vrot.slane %v5588_v20, 1  ;;  %1113 = vrot.lane.b32.xlu0 %v1040_v10, %s5503_s13  ;;  %v4800_v31 = vcombine.low %v123_v12, %v5655_v56  ;;  %v129_v20 = vld [vmem:[%s9168_s0 + $0x9c] sm:$0xe]  ;;  %v128_v56 = vld [vmem:[%s9168_s0 + $0x90] sm:$0xe] }
  0x55   :  { %v1222_v19 = vsel %vm1213_vm1, %v1220_v49, %v9291_v51  ;;  %v1226_v33 = vrot.slane %v4797_v35, 1  ;;  %v4799_v21 = vcombine.low %v122_v39, %v5678_v7  ;;  %v4802_v5 = vcombine.low %v125_v0, %v5702_v30  ;;  %v132_v10 = vld [vmem:[%s9168_s0 + $0xd8] sm:$0xe] }
  0x56   :  { %v1225_v44 = vsel %vm1213_vm1, %v1223_v1, %v9290_v4  ;;  %v9292_v9 = vrot.slane %v5625_v40, 1  ;;  %v4801_v22 = vcombine.low %v124_v57, %v5720_v41  ;;  %v4804_v48 = vcombine.low %v127_v11, %v5741_v58  ;;  %v131_v40 = vld [vmem:[%s9168_s0 + $0xb4] sm:$0xe]  ;;  %v133_v57 = vld [vmem:[%s9168_s0 + $0xe4] sm:$0xe] }
  0x57   :  { %v4803_v1 = vcombine.low %v126_v25, %v5764_v17  ;;  %v9293_v7 = vrot.slane %v5646_v52, 1  ;;  %v1235_v12 = vrot.slane %v4800_v31, 1  ;;  %v1232_v49 = vrot.slane %v4799_v21, 1  ;;  %1312 = vrot.lane.b32.xlu1 %v1219_v24, %s5504_s25  ;;  %v130_v52 = vld [vmem:[%s9168_s0 + $0xa8] sm:$0xe] }
  0x58   :  { %v1231_v3 = vsel %vm1213_vm1, %v1229_v8, %v9292_v9  ;;  %v1241_v26 = vrot.slane %v4802_v5, 1  ;;  %v1238_v41 = vrot.slane %v4801_v22, 1  ;;  %v1247_v58 = vrot.slane %v4804_v48, 1  ;;  %1310 = vrot.lane.b32.xlu0 %v1216_v55, %s5504_s25  ;;  %v135_v8 = vld [vmem:[%s9168_s0 + $0xfc] sm:$0xe] }
  0x59   :  { %v1228_v30 = vsel %vm1213_vm1, %v1226_v33, %v9293_v7  ;;  %v1244_v17 = vrot.slane %v4803_v1, 1  ;;  %v4806_v39 = vcombine.low %v129_v20, %v5788_v46  ;;  %v9294_v0 = vrot.slane %v5665_v62, 1 }
  0x5a   :  { %v9295_v43 = vrot.slane %v5694_v23, 1  ;;  %v9296_v24 = vrot.slane %v5715_v38, 1  ;;  %v4805_v46 = vcombine.low %v128_v56, %v5806_v63  ;;  %v9297_v55 = vrot.slane %v5732_v50, 1 }
  0x5b   :  { %v1237_v15 = vsel %vm1213_vm1, %v1235_v12, %v9294_v0  ;;  %v9298_v23 = vrot.slane %v5751_v6, 1  ;;  %v9299_v38 = vrot.slane %v5780_v36, 1  ;;  %v1253_v63 = vrot.slane %v4806_v39, 1  ;;  %1316 = vrot.lane.b32.xlu1 %v1225_v44, %s5504_s25  ;;  %v138_v12 = vld [vmem:[%s9168_s0 + $0x120] sm:$0xe]  ;;  %v9304_v0 = vld [vmem:[#allocation30_spill] sm:$0xff] }
  0x5c   :  { %v1234_v13 = vsel %vm1213_vm1, %v1232_v49, %v9295_v43  ;;  %v6309_v35 = vsel %vm1213_vm1, %v1241_v26, %v9296_v24  ;;  %v6318_v62 = vsel %vm1213_vm1, %v1238_v41, %v9297_v55  ;;  %v1250_v4 = vrot.slane %v4805_v46, 1  ;;  %1314 = vrot.lane.b32.xlu0 %v1222_v19, %s5504_s25  ;;  %v9306_v55 = vld [vmem:[#allocation33_spill] sm:$0xff] }
  0x5d   :  { %v6323_v11 = vsel %vm1213_vm1, %v1247_v58, %v9298_v23  ;;  %v6328_v25 = vsel %vm1213_vm1, %v1244_v17, %v9299_v38  ;;  %v4808_v50 = vcombine.low %v131_v40, %v5827_v37  ;;  %v1260_v51 = vrot.slane %v5837_v42, 1  ;;  %v134_v42 = vld [vmem:[%s9168_s0 + $0xf0] sm:$0xe]  ;;  %v9302_v58 = vld [vmem:[#allocation27_spill] sm:$0xff]  ;;  %v140_v17 = vld [vmem:[%s9168_s0 + $0x138] sm:$0xe] }
  0x5e   :  { %v4807_v6 = vcombine.low %v130_v52, %v5850_v16  ;;  %v9300_v36 = vrot.slane %v5801_v61, 1  ;;  %v1257_v31 = vrot.slane %v5866_v54, 1  ;;  %v4810_v21 = vcombine.low %v133_v57, %v5874_v47  ;;  %v137_v54 = vld [vmem:[%s9168_s0 + $0x114] sm:$0xe]  ;;  %v9305_v57 = vld [vmem:[#allocation32_spill] sm:$0xff] }
  0x5f   :  { %v1266_v37 = vrot.slane %v5887_v34, 1  ;;  %v9301_v16 = vrot.slane %v5818_v29, 1  ;;  %v1259_v61 = vrot.slane %v4808_v50, 1  ;;  %v4809_v20 = vcombine.low %v132_v10, %v5892_v18  ;;  %v136_v29 = vld [vmem:[%s9168_s0 + $0x108] sm:$0xe]  ;;  %1320 = vrot.lane.b32.xlu1 %v1231_v3, %s5504_s25 }
  0x60   :  { %v6343_v33 = vsel %vm1213_vm1, %v1253_v63, %v9300_v36  ;;  %v1256_v5 = vrot.slane %v4807_v6, 1  ;;  %v1265_v47 = vrot.slane %v4810_v21, 1  ;;  %v1263_v34 = vrot.slane %v5904_v28, 1  ;;  %v139_v28 = vld [vmem:[%s9168_s0 + $0x12c] sm:$0xe]  ;;  %1318 = vrot.lane.b32.xlu0 %v1228_v30, %s5504_s25  ;;  %v9309_v21 = vld [vmem:[#allocation38_spill] sm:$0xff] }
  0x61   :  { %v6355_v44 = vsel %vm1213_vm1, %v1250_v4, %v9301_v16  ;;  %v4812_v9 = vcombine.low %v135_v8, %v5913_v59  ;;  %v1272_v19 = vrot.slane %v5923_v53, 1  ;;  %v6368_v22 = vsel %vm1213_vm1, %v1259_v61, %v1260_v51  ;;  %v143_v38 = vld [vmem:[%s9168_s0 + $0x15c] sm:$0xe]  ;;  %v9307_v4 = vld [vmem:[#allocation35_spill] sm:$0xff]  ;;  %v9308_v51 = vld [vmem:[#allocation36_spill] sm:$0xff] }
  0x62   :  { %v6371_v18 = vsel %vm1213_vm1, %v1256_v5, %v1257_v31  ;;  %v1262_v48 = vrot.slane %v4809_v20, 1  ;;  %v4811_v1 = vcombine.low %v134_v42, %v5936_v45  ;;  %v6379_v59 = vsel %vm1213_vm1, %v1265_v47, %v1266_v37  ;;  %v142_v6 = vld [vmem:[%s9168_s0 + $0x150] sm:$0xe]  ;;  %v145_v8 = vld [vmem:[%s9168_s0 + $0x174] sm:$0xe]  ;;  %v9310_v61 = vld [vmem:[#allocation39_spill] sm:$0xff] }
  0x63   :  { %v1271_v53 = vrot.slane %v4812_v9, 1  ;;  %v1269_v56 = vrot.slane %v5952_v27, 1  ;;  %v4814_v7 = vcombine.low %v137_v54, %v5960_v32  ;;  %v1278_v3 = vrot.slane %v5973_v60, 1  ;;  %v141_v27 = vld [vmem:[%s9168_s0 + $0x144] sm:$0xe]  ;;  %1324 = vrot.lane.b32.xlu1 %v1237_v15, %s5504_s25  ;;  %v9311_v20 = vld [vmem:[#allocation40_spill] sm:$0xff] }
  0x64   :  { %v6388_v45 = vsel %vm1213_vm1, %v1262_v48, %v1263_v34  ;;  %v1268_v49 = vrot.slane %v4811_v1, 1  ;;  %v4813_v26 = vcombine.low %v136_v29, %v5978_v14  ;;  %v1275_v41 = vrot.slane %v5990_v2, 1  ;;  %v9303_v14 = vld [vmem:[#allocation28_spill] sm:$0xff]  ;;  %1322 = vrot.lane.b32.xlu0 %v1234_v13, %s5504_s25  ;;  %v9312_v9 = vld [vmem:[#allocation42_spill] sm:$0xff]  ;;  %v9314_v1 = vld [vmem:[#allocation45_spill] sm:$0xff] }
  0x65   :  { %v6396_v32 = vsel %vm1213_vm1, %v1271_v53, %v1272_v19  ;;  %v1277_v40 = vrot.slane %v4814_v7, 1  ;;  %v4816_v30 = vcombine.low %v139_v28, %v9302_v58  ;;  %v1284_v52 = vrot.slane %v9303_v14, 1  ;;  %v144_v37 = vld [vmem:[%s9168_s0 + $0x168] sm:$0xe]  ;;  %v147_v47 = vld [vmem:[%s9168_s0 + $0x18c] sm:$0xe] }
  0x66   :  { %v1270_v60 = vsel %vm1213_vm1, %v1268_v49, %v1269_v56  ;;  %v1274_v39 = vrot.slane %v4813_v26, 1  ;;  %v4815_v43 = vcombine.low %v138_v12, %v9304_v0  ;;  %v1281_v2 = vrot.slane %v9305_v57, 1  ;;  %v9313_v29 = vld [vmem:[#allocation44_spill] sm:$0xff]  ;;  %v146_v53 = vld [vmem:[%s9168_s0 + $0x180] sm:$0xe]  ;;  %v9320_v0 = vld [vmem:[#allocation54_spill] sm:$0xff] }
  0x67   :  { %v1279_v24 = vsel %vm1213_vm1, %v1277_v40, %v1278_v3  ;;  %v1283_v46 = vrot.slane %v4816_v30, 1  ;;  %v4818_v23 = vcombine.low %v141_v27, %v9306_v55  ;;  %v1290_v50 = vrot.slane %v9307_v4, 1  ;;  %1328 = vrot.lane.b32.xlu1 %v6309_v35, %s5504_s25  ;;  %v9315_v12 = vld [vmem:[#allocation47_spill] sm:$0xff]  ;;  %v9316_v49 = vld [vmem:[#allocation48_spill] sm:$0xff]  ;;  %v9317_v40 = vld [vmem:[#allocation50_spill] sm:$0xff] }
  0x68   :  { %v1276_v63 = vsel %vm1213_vm1, %v1274_v39, %v1275_v41  ;;  %v1280_v10 = vrot.slane %v4815_v43, 1  ;;  %v4817_v15 = vcombine.low %v140_v17, %v9308_v51  ;;  %v1287_v13 = vrot.slane %v9309_v21, 1  ;;  %1326 = vrot.lane.b32.xlu0 %v6318_v62, %s5504_s25  ;;  %v9318_v58 = vld [vmem:[#allocation51_spill] sm:$0xff]  ;;  %v9319_v14 = vld [vmem:[#allocation52_spill] sm:$0xff]  ;;  %v6522_v51 = vld [vmem:[%s9168_s0 + $0x10] sm:$0xf] }
  0x69   :  { %v1285_v36 = vsel %vm1213_vm1, %v1283_v46, %v1284_v52  ;;  %v1289_v31 = vrot.slane %v4818_v23, 1  ;;  %v4820_v5 = vcombine.low %v143_v38, %v9310_v61  ;;  %v1296_v54 = vrot.slane %v9311_v20, 1  ;;  %v4484_v20 = vld [vmem:[%s9168_s0 + $0x4c] sm:$0xf] }
  0x6a   :  { %v1282_v42 = vsel %vm1213_vm1, %v1280_v10, %v1281_v2  ;;  %v1286_v16 = vrot.slane %v4817_v15, 1  ;;  %v4819_v19 = vcombine.low %v142_v6, %v9312_v9  ;;  %v1293_v48 = vrot.slane %v9313_v29, 1  ;;  %v9321_v2 = vld [vmem:[#allocation56_spill] sm:$0xff]  ;;  %v4487_v29 = vld [vmem:[%s9168_s0 + $0x60] sm:$0xf] }
  0x6b   :  { %v1291_v34 = vsel %vm1213_vm1, %v1289_v31, %v1290_v50  ;;  %v4822_v28 = vcombine.low %v145_v8, %v9314_v1  ;;  %v1295_v7 = vrot.slane %v4820_v5, 1  ;;  %v1302_v35 = vrot.slane %v9315_v12, 1  ;;  %1332 = vrot.lane.b32.xlu1 %v6323_v11, %s5504_s25  ;;  %v4473_v50 = vld [vmem:[%s9168_s0 + $0xc] sm:$0xf]  ;;  %v6540_v31 = vld [vmem:[%s9168_s0 + $0x34] sm:$0xf] }
  0x6c   :  { %v1288_v56 = vsel %vm1213_vm1, %v1286_v16, %v1287_v13  ;;  %v4821_v3 = vcombine.low %v144_v37, %v9316_v49  ;;  %v1292_v26 = vrot.slane %v4819_v19, 1  ;;  %v1299_v41 = vrot.slane %v9317_v40, 1  ;;  %1330 = vrot.lane.b32.xlu0 %v6328_v25, %s5504_s25  ;;  %v4477_v13 = vld [vmem:[%s9168_s0 + $0x24] sm:$0xf]  ;;  %v6550_v37 = vld [vmem:[%s9168_s0 + $0x28] sm:$0xf] }
  0x6d   :  { %v1301_v27 = vrot.slane %v4822_v28, 1  ;;  %v4824_v30 = vcombine.low %v147_v47, %v9318_v58  ;;  %v1297_v17 = vsel %vm1213_vm1, %v1295_v7, %v1296_v54  ;;  %v1308_v52 = vrot.slane %v9319_v14, 1  ;;  %v4483_v16 = vld [vmem:[%s9168_s0 + $0x48] sm:$0xf]  ;;  %v4481_v54 = vld [vmem:[%s9168_s0 + $0x3c] sm:$0xf] }
  0x6e   :  { %v1298_v39 = vrot.slane %v4821_v3, 1  ;;  %v4823_v62 = vcombine.low %v146_v53, %v9320_v0  ;;  %v1294_v43 = vsel %vm1213_vm1, %v1292_v26, %v1293_v48  ;;  %v1305_v55 = vrot.slane %v9321_v2, 1  ;;  %v4482_v47 = vld [vmem:[%s9168_s0 + $0x40] sm:$0xf]  ;;  %v4488_v48 = vld [vmem:[%s9168_s0 + $0x64] sm:$0xf] }
  0x6f   :  { %v1303_v46 = vsel %vm1213_vm1, %v1301_v27, %v1302_v35  ;;  %v1307_v57 = vrot.slane %v4824_v30, 1  ;;  %1336 = vrot.lane.b32.xlu1 %v6343_v33, %s5504_s25  ;;  %v6532_v8 = vcombine.low %v4473_v50, %v6522_v51  ;;  %v6565_v5 = vcombine.low %v4477_v13, %v6550_v37  ;;  %v4485_v1 = vld [vmem:[%s9168_s0 + $0x54] sm:$0xf]  ;;  %v4486_v28 = vld [vmem:[%s9168_s0 + $0x58] sm:$0xf] }
  0x70   :  { %v1300_v23 = vsel %vm1213_vm1, %v1298_v39, %v1299_v41  ;;  %v1304_v38 = vrot.slane %v4823_v62, 1  ;;  %1334 = vrot.lane.b32.xlu0 %v6355_v44, %s5504_s25  ;;  %v6580_v9 = vcombine.low %v4483_v16, %v4484_v20  ;;  %v6584_v19 = vcombine.low %v4481_v54, %v4482_v47  ;;  %v4491_v35 = vld [vmem:[%s9168_s0 + $0x78] sm:$0xf]  ;;  %v4492_v49 = vld [vmem:[%s9168_s0 + $0x7c] sm:$0xf] }
  0x71   :  { %v1309_v10 = vsel %vm1213_vm1, %v1307_v57, %v1308_v52  ;;  %v6604_v7 = vcombine.low %v4487_v29, %v4488_v48  ;;  %v6608_v12 = vcombine.low %v4485_v1, %v4486_v28  ;;  %v4489_v3 = vld [vmem:[%s9168_s0 + $0x6c] sm:$0xf]  ;;  %v4490_v26 = vld [vmem:[%s9168_s0 + $0x70] sm:$0xf]  ;;  %v6626_v40 = vcombine.low %v4491_v35, %v4492_v49  ;;  %v4493_v39 = vld [vmem:[%s9168_s0 + $0x84] sm:$0xf] }
  0x72   :  { %v1306_v4 = vsel %vm1213_vm1, %v1304_v38, %v1305_v55  ;;  %v6630_v41 = vcombine.low %v4489_v3, %v4490_v26  ;;  %v4495_v30 = vld [vmem:[%s9168_s0 + $0x90] sm:$0xf]  ;;  %v4494_v14 = vld [vmem:[%s9168_s0 + $0x88] sm:$0xf]  ;;  %v4500_v57 = vld [vmem:[%s9168_s0 + $0xac] sm:$0xf] }
  0x73   :  { %1340 = vrot.lane.b32.xlu1 %v6368_v22, %s5504_s25  ;;  %v6654_v62 = vcombine.low %v4493_v39, %v4494_v14  ;;  %v4497_v2 = vld [vmem:[%s9168_s0 + $0x9c] sm:$0xf]  ;;  %v4498_v55 = vld [vmem:[%s9168_s0 + $0xa0] sm:$0xf]  ;;  %v4501_v50 = vld [vmem:[%s9168_s0 + $0xb4] sm:$0xf] }
  0x74   :  { %1338 = vrot.lane.b32.xlu0 %v6371_v18, %s5504_s25  ;;  %v4505_v16 = vld [vmem:[%s9168_s0 + $0xe4] sm:$0xf]  ;;  %v6700_v20 = vld [vmem:[%s9168_s0 + $0xe8] sm:$0xf]  ;;  %v4507_v29 = vld [vmem:[%s9168_s0 + $0xf0] sm:$0xf] }
  0x75   :  { %9335 = vst [vmem:[#allocation47_spill] sm:$0xff] %v6654_v62  ;;  %v6716_v48 = vld [vmem:[%s9168_s0 + $0xf4] sm:$0xf]  ;;  %v4841_v28 = vcombine.low %v4505_v16, %v6700_v20  ;;  %v1697_v49 = vshll.u32 %v6532_v8, 16  ;;  %v6740_v39 = vld [vmem:[%s9168_s0 + $0x10c] sm:$0xf] }
  0x76   :  { %v4842_v3 = vcombine.low %v4507_v29, %v6716_v48  ;;  %v4509_v14 = vld [vmem:[%s9168_s0 + $0xfc] sm:$0xf] }
  0x77   :  { %1344 = vrot.lane.b32.xlu1 %v6379_v59, %s5504_s25  ;;  %v1889_v26 = vshll.u32 %v4841_v28, 16  ;;  %v1887_v29 = vshrl.u32 %v4841_v28, 16 }
  0x78   :  { %1342 = vrot.lane.b32.xlu0 %v6388_v45, %s5504_s25 }
  0x7b   :  { %1348 = vrot.lane.b32.xlu1 %v6396_v32, %s5504_s25 }
  0x7c   :  { %1346 = vrot.lane.b32.xlu0 %v1270_v60, %s5504_s25  ;;  %v4475_v60 = vld [vmem:[%s9168_s0 + $0x18] sm:$0xf] }
  0x7d   :  { %v6475_v11 = vpop.permute.xlu1 %1057 }
  0x7e   :  { %v6480_v25 = vpop.permute.xlu0 %1053 }
  0x7f   :  { %1352 = vrot.lane.b32.xlu1 %v1279_v24, %s5504_s25  ;;  %v6512_v24 = vld [vmem:[%s9168_s0 + $0x1c] sm:$0xf] }
  0x80   :  { %1350 = vrot.lane.b32.xlu0 %v1276_v63, %s5504_s25  ;;  %v6526_v15 = vcombine.low %v4475_v60, %v6512_v24  ;;  %v4504_v60 = vld [vmem:[%s9168_s0 + $0xc4] sm:$0xf] }
  0x81   :  { %v6483_v33 = vpop.permute.xlu1 %1059 }
  0x82   :  { %v6486_v44 = vpop.permute.xlu0 %1055 }
  0x83   :  { %1356 = vrot.lane.b32.xlu1 %v1285_v36, %s5504_s25  ;;  %v4479_v36 = vld [vmem:[%s9168_s0 + $0x30] sm:$0xf] }
  0x84   :  { %1354 = vrot.lane.b32.xlu0 %v1282_v42, %s5504_s25  ;;  %v6555_v42 = vcombine.low %v4479_v36, %v6540_v31  ;;  %v4502_v36 = vld [vmem:[%s9168_s0 + $0xb8] sm:$0xf] }
  0x85   :  { %v6489_v22 = vpop.permute.xlu1 %1063  ;;  %v6708_v47 = vcombine.low %v4501_v50, %v4502_v36  ;;  %v6764_v50 = vld [vmem:[%s9168_s0 + $0x124] sm:$0xf]  ;;  %v4513_v36 = vld [vmem:[%s9168_s0 + $0x114] sm:$0xf] }
  0x86   :  { %9322 = vst [vmem:[#allocation27_spill] sm:$0xff] %v6489_v22 }
  0x87   :  { %1360 = vrot.lane.b32.xlu1 %v1291_v34, %s5504_s25  ;;  %9341 = vst [vmem:[#allocation56_spill] sm:$0xff] %v6708_v47 }
  0x88   :  { %v6492_v18 = vpop.permute.xlu0 %1061  ;;  %1358 = vrot.lane.b32.xlu0 %v1288_v56, %s5504_s25 }
  0x89   :  { %9323 = vst [vmem:[#allocation28_spill] sm:$0xff] %v6492_v18 }
  0x8a   :  { %v6496_v59 = vpop.permute.xlu1 %1067 }
  0x8b   :  { %9324 = vst [vmem:[#allocation30_spill] sm:$0xff] %v6496_v59  ;;  %1364 = vrot.lane.b32.xlu1 %v1297_v17, %s5504_s25  ;;  %v4496_v17 = vld [vmem:[%s9168_s0 + $0x94] sm:$0xf] }
  0x8c   :  { %v6498_v45 = vpop.permute.xlu0 %1065  ;;  %1362 = vrot.lane.b32.xlu0 %v1294_v43, %s5504_s25  ;;  %v6648_v52 = vcombine.low %v4495_v30, %v4496_v17  ;;  %v6730_v30 = vld [vmem:[%s9168_s0 + $0xec] ss:$0 sps:$4 sm:$0x11]   ;;  %v4511_v17 = vld [vmem:[%s9168_s0 + $0x108] sm:$0xf] }
  0x8d   :  { %9325 = vst [vmem:[#allocation32_spill] sm:$0xff] %v6498_v45  ;;  %v6771_v16 = vcombine.low %v4511_v17, %v6740_v39  ;;  %v6788_v17 = vld [vmem:[%s9168_s0 + $0x118] sm:$0xf] }
  0x8e   :  { %v6502_v32 = vpop.permute.xlu1 %1071  ;;  %9334 = vst [vmem:[#allocation45_spill] sm:$0xff] %v6648_v52 }
  0x8f   :  { %9326 = vst [vmem:[#allocation33_spill] sm:$0xff] %v6502_v32  ;;  %1368 = vrot.lane.b32.xlu1 %v1303_v46, %s5504_s25  ;;  %v4499_v46 = vld [vmem:[%s9168_s0 + $0xa8] sm:$0xf]  ;;  %v4585_v32 = vld [vmem:[%s9168_s0 + $0xe4] sm:$0xe] }
  0x90   :  { %1366 = vrot.lane.b32.xlu0 %v1300_v23, %s5504_s25  ;;  %v6514_v63 = vpop.permute.xlu0 %1069  ;;  %v6672_v23 = vcombine.low %v4499_v46, %v4500_v57  ;;  %v6750_v57 = vld [vmem:[%s9168_s0 + $0x100] sm:$0xf] }
  0x91   :  { %9327 = vst [vmem:[#allocation35_spill] sm:$0xff] %v6514_v63  ;;  %v6795_v63 = vld [vmem:[%s9168_s0 + $0x20] ss:$0 sps:$4 sm:$0x11]  }
  0x92   :  { %9336 = vst [vmem:[#allocation48_spill] sm:$0xff] %v6672_v23 }
  0x93   :  { %1372 = vrot.lane.b32.xlu1 %v1309_v10, %s5504_s25  ;;  %v6528_v6 = vpop.permute.xlu1 %1075  ;;  %v6678_v10 = vcombine.low %v4497_v2, %v4498_v55  ;;  %v6755_v2 = vld [vmem:[%s9168_s0 + $0x14] ss:$0 sps:$4 sm:$0x11]   ;;  %v1709_v55 = vshll.u32 %v6526_v15, 16 }
  0x94   :  { %9328 = vst [vmem:[#allocation36_spill] sm:$0xff] %v6528_v6  ;;  %1370 = vrot.lane.b32.xlu0 %v1306_v4, %s5504_s25  ;;  %v4503_v4 = vld [vmem:[%s9168_s0 + $0xc0] sm:$0xf]  ;;  %v6783_v6 = vcombine.low %v4509_v14, %v6750_v57 }
  0x95   :  { %v6542_v21 = vpop.permute.xlu0 %1073  ;;  %9338 = vst [vmem:[#allocation51_spill] sm:$0xff] %v6678_v10  ;;  %v6704_v54 = vcombine.low %v4503_v4, %v4504_v60  ;;  %v1901_v4 = vshll.u32 %v4842_v3, 16  ;;  %v4515_v60 = vld [vmem:[%s9168_s0 + $0x120] sm:$0xf]  ;;  %v1711_v45 = vrot.slane %v1709_v55, 1 }
  0x96   :  { %9329 = vst [vmem:[#allocation38_spill] sm:$0xff] %v6542_v21  ;;  %v1699_v21 = vrot.slane %v1697_v49, 1  ;;  %v6802_v14 = vcombine.low %v4515_v60, %v6764_v50 }
  0x97   :  { %1536 = vrot.lane.b32.xlu1 %v6526_v15, %s5505_s23  ;;  %9340 = vst [vmem:[#allocation54_spill] sm:$0xff] %v6704_v54 }
  0x98   :  { %v6560_v61 = vpop.permute.xlu1 %1079  ;;  %1534 = vrot.lane.b32.xlu0 %v6532_v8, %s5505_s23 }
  0x99   :  { %9330 = vst [vmem:[#allocation39_spill] sm:$0xff] %v6560_v61  ;;  %v6777_v61 = vld [vmem:[%s9168_s0 + $0xf8] ss:$0 sps:$4 sm:$0x11]  }
  0x9a   :  { %v6576_v34 = vpop.permute.xlu0 %1077  ;;  %v1906_v60 = vshll.u32 %v6777_v61, 16 }
  0x9b   :  { %9331 = vst [vmem:[#allocation40_spill] sm:$0xff] %v6576_v34  ;;  %1540 = vrot.lane.b32.xlu1 %v6555_v42, %s5505_s23 }
  0x9c   :  { %1538 = vrot.lane.b32.xlu0 %v6565_v5, %s5505_s23 }
  0x9d   :  { %v6598_v53 = vpop.permute.xlu1 %1083 }
  0x9e   :  { %9332 = vst [vmem:[#allocation42_spill] sm:$0xff] %v6598_v53  ;;  %v6600_v56 = vpop.permute.xlu0 %1081  ;;  %v1891_v53 = vrot.slane %v1889_v26, 1  ;;  %v1695_v26 = vshrl.u32 %v6532_v8, 16 }
  0x9f   :  { %9333 = vst [vmem:[#allocation44_spill] sm:$0xff] %v6600_v56  ;;  %1544 = vrot.lane.b32.xlu1 %v6580_v9, %s5505_s23  ;;  %v1894_v56 = vshll.u32 %v6730_v30, 16 }
  0xa0   :  { %1542 = vrot.lane.b32.xlu0 %v6584_v19, %s5505_s23  ;;  %v1892_v8 = vor.u32 %v1891_v53, %v1887_v29  ;;  %v1714_v53 = vshll.u32 %v6795_v63, 16 }
  0xa1   :  { %v6622_v27 = vpop.permute.xlu1 %1087  ;;  %v1896_v49 = vrot.slane %v1894_v56, 1  ;;  %v4569_v56 = vld [vmem:[%s9168_s0 + $0xc] sm:$0xe] }
  0xa2   :  { %v4889_v55 = vcombine.low %v4569_v56, %v6522_v51  ;;  %v1716_v59 = vrot.slane %v1714_v53, 1  ;;  %v2290_v56 = vrot.slane %v6777_v61, 1 }
  0xa3   :  { %1548 = vrot.lane.b32.xlu1 %v6604_v7, %s5505_s23  ;;  %v6632_v58 = vpop.permute.xlu0 %1085 }
  0xa4   :  { %1546 = vrot.lane.b32.xlu0 %v6608_v12, %s5505_s23 }
  0xa6   :  { %v6650_v0 = vpop.permute.xlu1 %1091 }
  0xa7   :  { %1552 = vrot.lane.b32.xlu1 %v6626_v40, %s5505_s23 }
  0xa8   :  { %1550 = vrot.lane.b32.xlu0 %v6630_v41, %s5505_s23  ;;  %v6656_v43 = vpop.permute.xlu0 %1089 }
  0xab   :  { %1556 = vrot.lane.b32.xlu1 %v6648_v52, %s5505_s23  ;;  %v6674_v38 = vpop.permute.xlu1 %1095 }
  0xac   :  { %9337 = vst [vmem:[#allocation50_spill] sm:$0xff] %v6674_v38  ;;  %1554 = vrot.lane.b32.xlu0 %v6654_v62, %s5505_s23 }
  0xad   :  { %v6692_v13 = vpop.permute.xlu0 %1093 }
  0xae   :  { %9339 = vst [vmem:[#allocation52_spill] sm:$0xff] %v6692_v13 }
  0xaf   :  { %1560 = vrot.lane.b32.xlu1 %v6672_v23, %s5505_s23  ;;  %v4713_v23 = vld [vmem:[%s9168_s0 + $0xf0] sm:$0xe] }
  0xb0   :  { %1558 = vrot.lane.b32.xlu0 %v6678_v10, %s5505_s23  ;;  %v6718_v1 = vpop.permute.xlu1 %1099 }
  0xb1   :  { %9342 = vst [vmem:[#allocation57_spill] sm:$0xff] %v6718_v1 }
  0xb2   :  { %v6721_v35 = vpop.permute.xlu0 %1097 }
  0xb3   :  { %9343 = vst [vmem:[#allocation58_spill] sm:$0xff] %v6721_v35  ;;  %1564 = vrot.lane.b32.xlu1 %v6704_v54, %s5505_s23  ;;  %v1899_v35 = vshrl.u32 %v4842_v3, 16 }
  0xb4   :  { %1562 = vrot.lane.b32.xlu0 %v6708_v47, %s5505_s23  ;;  %v1700_v47 = vor.u32 %v1699_v21, %v1695_v26  ;;  %v4905_v21 = vcombine.low %v4585_v32, %v6700_v20  ;;  %v4570_v32 = vld [vmem:[%s9168_s0 + $0x18] sm:$0xe] }
  0xb5   :  { %v6745_v46 = vpop.permute.xlu1 %1103 }
  0xb6   :  { %9344 = vst [vmem:[#allocation59_spill] sm:$0xff] %v6745_v46  ;;  %v1702_v46 = vshll.u32 %v6755_v2, 16 }
  0xb7   :  { %1568 = vrot.lane.b32.xlu1 %v4842_v3, %s5505_s23  ;;  %v6780_v34 = vpop.permute.xlu0 %1101  ;;  %v1897_v3 = vsel %vm668_vm0, %v1892_v8, %v1896_v49  ;;  %v2238_v49 = vrot.slane %v4889_v55, 1 }
  0xb8   :  { %1566 = vrot.lane.b32.xlu0 %v4841_v28, %s5505_s23  ;;  %9345 = vst [vmem:[#allocation60_spill] sm:$0xff] %v6780_v34  ;;  %v6805_v34 = vcombine.low %v4513_v36, %v6788_v17  ;;  %v1704_v1 = vrot.slane %v1702_v46, 1  ;;  %v1707_v36 = vshrl.u32 %v6526_v15, 16  ;;  %v1908_v46 = vrot.slane %v1906_v60, 1 }
  0xb9   :  { %v2239_v60 = vrot.slane %v6755_v2, 1 }
  0xba   :  { %v1705_v26 = vsel %vm668_vm0, %v1700_v47, %v1704_v1  ;;  %v2287_v47 = vrot.slane %v6730_v30, 1 }
  0xbb   :  { %1572 = vrot.lane.b32.xlu1 %v6771_v16, %s5505_s23  ;;  %v6799_v28 = vpop.permute.xlu1 %1107  ;;  %v2240_v55 = vsel %vm1213_vm1, %v2238_v49, %v2239_v60 }
  0xbc   :  { %9346 = vst [vmem:[#allocation61_spill] sm:$0xff] %v6799_v28  ;;  %1570 = vrot.lane.b32.xlu0 %v6783_v6, %s5505_s23  ;;  %v6812_v54 = vpop.permute.xlu0 %1105  ;;  %v1903_v28 = vrot.slane %v1901_v4, 1  ;;  %v4586_v4 = vld [vmem:[%s9168_s0 + $0xf0] sm:$0xe] }
  0xbd   :  { %9347 = vst [vmem:[#allocation62_spill] sm:$0xff] %v6812_v54  ;;  %v1712_v54 = vor.u32 %v1711_v45, %v1707_v36  ;;  %v4890_v45 = vcombine.low %v4570_v32, %v6512_v24  ;;  %v6854_v36 = vld [vmem:[%s9168_s0 + $0xf4] sm:$0xf]  ;;  %v4601_v24 = vld [vmem:[%s9168_s0 + $0x18] sm:$0xf] }
  0xbe   :  { %v1904_v15 = vor.u32 %v1903_v28, %v1899_v35  ;;  %v4906_v35 = vcombine.low %v4586_v4, %v6716_v48  ;;  %v2286_v28 = vrot.slane %v4905_v21, 1  ;;  %v4633_v48 = vld [vmem:[%s9168_s0 + $0xf0] sm:$0xf] }
  0xbf   :  { %1576 = vrot.lane.b32.xlu1 %v6802_v14, %s5505_s23  ;;  %v6822_v29 = vpop.permute.xlu1 %1111  ;;  %v1717_v8 = vsel %vm668_vm0, %v1712_v54, %v1716_v59  ;;  %v6864_v59 = vld [vmem:[%s9168_s0 + $0x1c] sm:$0xf]  ;;  %v4937_v21 = vcombine.low %v4633_v48, %v6854_v36  ;;  %v2241_v4 = vrot.slane %v4890_v45, 1  ;;  %v6910_v48 = vld [vmem:[%s9168_s0 + $0x20] ss:$0 sps:$4 sm:$0x11]  }
  0xc0   :  { %9348 = vst [vmem:[#allocation63_spill] sm:$0xff] %v6822_v29  ;;  %1574 = vrot.lane.b32.xlu0 %v6805_v34, %s5505_s23  ;;  %v1909_v51 = vsel %vm668_vm0, %v1904_v15, %v1908_v46  ;;  %v4635_v54 = vld [vmem:[%s9168_s0 + $0xfc] sm:$0xf]  ;;  %v2288_v30 = vsel %vm1213_vm1, %v2286_v28, %v2287_v47  ;;  %v2289_v2 = vrot.slane %v4906_v35, 1  ;;  %v4603_v15 = vld [vmem:[%s9168_s0 + $0x24] sm:$0xf]  ;;  %v4921_v61 = vcombine.low %v4601_v24, %v6864_v59 }
  0xc1   :  { %v6892_v35 = vld [vmem:[%s9168_s0 + $0x28] sm:$0xf]  ;;  %v2913_v28 = vshll.u32 %v4937_v21, 16  ;;  %v6931_v29 = vld [vmem:[%s9168_s0 + $0x2c] ss:$0 sps:$4 sm:$0x11]  }
  0xc2   :  { %v6836_v20 = vpop.permute.xlu0 %1109  ;;  %v2721_v49 = vshll.u32 %v4921_v61, 16  ;;  %v4922_v60 = vcombine.low %v4603_v15, %v6892_v35  ;;  %v2719_v15 = vshrl.u32 %v4921_v61, 16  ;;  %v2738_v52 = vshll.u32 %v6931_v29, 16 }
  0xc3   :  { %9349 = vst [vmem:[#allocation64_spill] sm:$0xff] %v6836_v20  ;;  %2110 = vrot.lane.b32.xlu1 %v1897_v3, %s5506_s11  ;;  %v6877_v3 = vld [vmem:[%s9168_s0 + $0x100] sm:$0xf] }
  0xc4   :  { %2078 = vrot.lane.b32.xlu0 %v1705_v26, %s5506_s11  ;;  %v2242_v26 = vrot.slane %v6795_v63, 1  ;;  %v2291_v63 = vsel %vm1213_vm1, %v2289_v2, %v2290_v56  ;;  %v4938_v47 = vcombine.low %v4635_v54, %v6877_v3  ;;  %v2911_v54 = vshrl.u32 %v4937_v21, 16  ;;  %v6921_v2 = vld [vmem:[%s9168_s0 + $0x104] ss:$0 sps:$4 sm:$0x11]  }
  0xc5   :  { %v6844_v1 = vpop.permute.xlu1 %1115  ;;  %v2915_v56 = vrot.slane %v2913_v28, 1  ;;  %v5375_v28 = vld [vmem:[%s9169_s1 + $0x8] sm:$0xff]   ;;  %v2731_v20 = vshrl.u32 %v4922_v60, 16 }
  0xc6   :  { %9350 = vst [vmem:[#allocation65_spill] sm:$0xff] %v6844_v1  ;;  %v6856_v53 = vpop.permute.xlu0 %1113  ;;  %v2733_v1 = vshll.u32 %v4922_v60, 16 }
  0xc7   :  { %9351 = vst [vmem:[#allocation66_spill] sm:$0xff] %v6856_v53  ;;  %2112 = vrot.lane.b32.xlu1 %v1909_v51, %s5506_s11  ;;  %v6897_v51 = vld [vmem:[%s9168_s0 + $0xf8] ss:$0 sps:$4 sm:$0x11]   ;;  %v2723_v53 = vrot.slane %v2721_v49, 1  ;;  %v2923_v49 = vshrl.u32 %v4938_v47, 16 }
  0xc8   :  { %2080 = vrot.lane.b32.xlu0 %v1717_v8, %s5506_s11  ;;  %v2243_v8 = vsel %vm1213_vm1, %v2241_v4, %v2242_v26  ;;  %v2918_v4 = vshll.u32 %v6897_v51, 16 }
  0xc9   :  { %v6882_v46 = vpop.permute.xlu1 %1312  ;;  %v2724_v18 = vor.u32 %v2723_v53, %v2719_v15  ;;  %v4698_v15 = vld [vmem:[%s9168_s0 + $0x24] sm:$0xe] }
  0xca   :  { %v6887_v32 = vpop.permute.xlu0 %1310  ;;  %v2920_v13 = vrot.slane %v2918_v4, 1 }
  0xcb   :  { %2366 = vrot.lane.b32.xlu1 %v2288_v30, %s5507_s5  ;;  %v5372_v30 = vld [vmem:[%s9169_s1] sm:$0xff]  }
  0xcc   :  { %2334 = vrot.lane.b32.xlu0 %v2240_v55, %s5507_s5  ;;  %v2925_v55 = vshll.u32 %v4938_v47, 16  ;;  %5088 = vmatprep.subr.bf16.mxu0 %v5372_v30 }
  0xcd   :  { %v6903_v45 = vpop.permute.xlu1 %1316  ;;  %5158 = vmatprep.subr.bf16.mxu1 %v5372_v30  ;;  %5089 = vmatpush3.bf16.msra.mxu0 %v5372_v30 }
  0xce   :  { %v6912_v24 = vpop.permute.xlu0 %1314  ;;  %5161 = vmatpush3.bf16.msra.mxu1 %v5372_v30  ;;  %v2927_v10 = vrot.slane %v2925_v55, 1  ;;  %v2930_v30 = vshll.u32 %v6921_v2, 16  ;;  %5090 = vmatprep.subr.bf16.mxu0 %v5375_v28  ;;  %v5001_v55 = vcombine.low %v4713_v23, %v6854_v36 }
  0xcf   :  { %9352 = vst [vmem:[#allocation67_spill] sm:$0xff] %v6912_v24  ;;  %2368 = vrot.lane.b32.xlu1 %v2291_v63, %s5507_s5  ;;  %v2726_v63 = vshll.u32 %v6910_v48, 16  ;;  %5159 = vmatprep.subr.bf16.mxu1 %v5375_v28 }
  0xd0   :  { %2336 = vrot.lane.b32.xlu0 %v2243_v8, %s5507_s5 }
  0xd1   :  { %v6925_v26 = vpop.permute.xlu1 %1320  ;;  %v2728_v22 = vrot.slane %v2726_v63, 1  ;;  %5091 = vmatpush3.bf16.msra.mxu0 %v5375_v28  ;;  %v2928_v63 = vor.u32 %v2927_v10, %v2923_v49  ;;  %v3263_v49 = vrot.slane %v6910_v48, 1 }
  0xd2   :  { %9353 = vst [vmem:[#allocation68_spill] sm:$0xff] %v6925_v26  ;;  %v6933_v8 = vpop.permute.xlu0 %1318  ;;  %v2916_v26 = vor.u32 %v2915_v56, %v2911_v54  ;;  %5162 = vmatpush3.bf16.msra.mxu1 %v5375_v28  ;;  %v5378_v54 = vld [vmem:[%s9169_s1 + $0x10] ss:$0 sps:$4 sm:$0x33]   ;;  %v1721_v56 = vshll.u32 %v6565_v5, 16  ;;  %v2932_v28 = vrot.slane %v2930_v30, 1 }
  0xd3   :  { %9354 = vst [vmem:[#allocation69_spill] sm:$0xff] %v6933_v8  ;;  %2590 = vrot.lane.b32.xlu1 %v4937_v21, %s5508_s18  ;;  %v4697_v8 = vld [vmem:[%s9168_s0 + $0x18] sm:$0xe]  ;;  %v2735_v21 = vrot.slane %v2733_v1, 1  ;;  %v4714_v1 = vld [vmem:[%s9168_s0 + $0xfc] sm:$0xe]  ;;  %v2729_v23 = vsel %vm668_vm0, %v2724_v18, %v2728_v22  ;;  %5164 = vmatprep.subr.msk.bf16.mxu0 %vm4034_vm2, %v5378_v54  ;;  %v4986_v22 = vcombine.low %v4698_v15, %v6892_v35 }
  0xd4   :  { %2558 = vrot.lane.b32.xlu0 %v4921_v61, %s5508_s18  ;;  %v4985_v53 = vcombine.low %v4697_v8, %v6864_v59  ;;  %v2921_v4 = vsel %vm668_vm0, %v2916_v26, %v2920_v13  ;;  %v1719_v59 = vshrl.u32 %v6565_v5, 16  ;;  %v1913_v8 = vshll.u32 %v6783_v6, 16  ;;  %5165 = vmatprep.subr.msk.bf16.mxu1 %vm4034_vm2, %v5378_v54  ;;  %s5509_s1 = smov 28   ;;  %v6983_v18 = vld [vmem:[%s9168_s0 + $0x104] ss:$0 sps:$4 sm:$0x11]  }
  0xd5   :  { %v6947_v38 = vpop.permute.xlu1 %1324  ;;  %v2736_v36 = vor.u32 %v2735_v21, %v2731_v20  ;;  %v1723_v10 = vrot.slane %v1721_v56, 1  ;;  %v3310_v13 = vrot.slane %v5001_v55, 1  ;;  %v3311_v20 = vrot.slane %v6897_v51, 1  ;;  %v6996_v30 = vld [vmem:[%s9168_s0 + $0x2c] ss:$0 sps:$4 sm:$0x11]  }
  0xd6   :  { %9355 = vst [vmem:[#allocation70_spill] sm:$0xff] %v6947_v38  ;;  %v6950_v61 = vpop.permute.xlu0 %1322  ;;  %v2740_v38 = vrot.slane %v2738_v52, 1  ;;  %v3262_v5 = vrot.slane %v4985_v53, 1  ;;  %v2933_v52 = vsel %vm668_vm0, %v2928_v63, %v2932_v28  ;;  %v4036_v26 = vsel %vm4034_vm2, %v5378_v54, 0 }
  0xd7   :  { %9356 = vst [vmem:[#allocation71_spill] sm:$0xff] %v6950_v61  ;;  %2592 = vrot.lane.b32.xlu1 %v4938_v47, %s5508_s18  ;;  %v1733_v47 = vshll.u32 %v6555_v42, 16  ;;  %5093 = vmatpush3.bf16.msra.mxu0 %v4036_v26  ;;  %v1925_v21 = vshll.u32 %v6771_v16, 16  ;;  %v1911_v56 = vshrl.u32 %v6783_v6, 16  ;;  %v1915_v51 = vrot.slane %v1913_v8, 1 }
  0xd8   :  { %2560 = vrot.lane.b32.xlu0 %v4922_v60, %s5508_s18  ;;  %v5002_v60 = vcombine.low %v4714_v1, %v6877_v3  ;;  %v2741_v35 = vsel %vm668_vm0, %v2736_v36, %v2740_v38  ;;  %5163 = vmatpush3.bf16.msra.mxu1 %v4036_v26  ;;  %v7005_v38 = vld [vmem:[%s9168_s0 + $0x110] ss:$0 sps:$4 sm:$0x11]   ;;  %v3265_v54 = vrot.slane %v4986_v22, 1  ;;  %v3312_v6 = vsel %vm1213_vm1, %v3310_v13, %v3311_v20 }
  0xd9   :  { %v6967_v61 = vpop.permute.xlu1 %1328  ;;  %v7011_v1 = vld [vmem:[%s9168_s0 + $0x38] ss:$0 sps:$4 sm:$0x11]   ;;  %v3314_v53 = vrot.slane %v6921_v2, 1  ;;  %v1918_v15 = vshll.u32 %v6983_v18, 16  ;;  %v3264_v63 = vsel %vm1213_vm1, %v3262_v5, %v3263_v49  ;;  %v3266_v28 = vrot.slane %v6931_v29, 1 }
  0xda   :  { %9357 = vst [vmem:[#allocation72_spill] sm:$0xff] %v6967_v61  ;;  %v6973_v62 = vpop.permute.xlu0 %1326  ;;  %v3313_v48 = vrot.slane %v5002_v60, 1  ;;  %v1731_v36 = vshrl.u32 %v6555_v42, 16  ;;  %v1735_v8 = vrot.slane %v1733_v47, 1  ;;  %v4571_v60 = vld [vmem:[%s9168_s0 + $0x24] sm:$0xe]  ;;  %v1916_v29 = vor.u32 %v1915_v51, %v1911_v56 }
  0xdb   :  { %9358 = vst [vmem:[#allocation73_spill] sm:$0xff] %v6973_v62  ;;  %3134 = vrot.lane.b32.xlu1 %v2921_v4, %s5509_s1  ;;  %v4587_v2 = vld [vmem:[%s9168_s0 + $0xfc] sm:$0xe]  ;;  %v1923_v22 = vshrl.u32 %v6771_v16, 16  ;;  %v1927_v5 = vrot.slane %v1925_v21, 1  ;;  %v1920_v47 = vrot.slane %v1918_v15, 1  ;;  %v3267_v26 = vsel %vm1213_vm1, %v3265_v54, %v3266_v28 }
  0xdc   :  { %3102 = vrot.lane.b32.xlu0 %v2729_v23, %s5509_s1  ;;  %v1726_v23 = vshll.u32 %v6996_v30, 16  ;;  %v3315_v42 = vsel %vm1213_vm1, %v3313_v48, %v3314_v53  ;;  %v1738_v16 = vshll.u32 %v7011_v1, 16  ;;  %v4891_v21 = vcombine.low %v4571_v60, %v6550_v37  ;;  %v4588_v56 = vld [vmem:[%s9168_s0 + $0x108] sm:$0xe]  ;;  %v4572_v53 = vld [vmem:[%s9168_s0 + $0x30] sm:$0xe] }
  0xdd   :  { %v6989_v3 = vpop.permute.xlu1 %1332  ;;  %v1921_v51 = vsel %vm668_vm0, %v1916_v29, %v1920_v47  ;;  %v1736_v54 = vor.u32 %v1735_v8, %v1731_v36  ;;  %v4637_v60 = vld [vmem:[%s9168_s0 + $0x108] sm:$0xf]  ;;  %v7066_v36 = vld [vmem:[%s9168_s0 + $0x10c] sm:$0xf] }
  0xde   :  { %9359 = vst [vmem:[#allocation74_spill] sm:$0xff] %v6989_v3  ;;  %v7000_v55 = vpop.permute.xlu0 %1330  ;;  %v1728_v49 = vrot.slane %v1726_v23, 1  ;;  %v2244_v15 = vrot.slane %v4891_v21, 1 }
  0xdf   :  { %9360 = vst [vmem:[#allocation75_spill] sm:$0xff] %v7000_v55  ;;  %3136 = vrot.lane.b32.xlu1 %v2933_v52, %s5509_s1  ;;  %v1930_v52 = vshll.u32 %v7005_v38, 16 }
  0xe0   :  { %3104 = vrot.lane.b32.xlu0 %v2741_v35, %s5509_s1  ;;  %v1724_v35 = vor.u32 %v1723_v10, %v1719_v59  ;;  %v1928_v59 = vor.u32 %v1927_v5, %v1923_v22  ;;  %v4605_v22 = vld [vmem:[%s9168_s0 + $0x30] sm:$0xf]  ;;  %v4892_v5 = vcombine.low %v4572_v53, %v6540_v31 }
  0xe1   :  { %v7017_v4 = vpop.permute.xlu1 %1336  ;;  %v1932_v10 = vrot.slane %v1930_v52, 1 }
  0xe2   :  { %9361 = vst [vmem:[#allocation76_spill] sm:$0xff] %v7017_v4  ;;  %v7029_v13 = vpop.permute.xlu0 %1334  ;;  %v1729_v37 = vsel %vm668_vm0, %v1724_v35, %v1728_v49 }
  0xe3   :  { %9362 = vst [vmem:[#allocation77_spill] sm:$0xff] %v7029_v13  ;;  %3390 = vrot.lane.b32.xlu1 %v3312_v6, %s5510_s19  ;;  %v4907_v6 = vcombine.low %v4587_v2, %v6750_v57  ;;  %v1740_v57 = vrot.slane %v1738_v16, 1  ;;  %v1933_v8 = vsel %vm668_vm0, %v1928_v59, %v1932_v10  ;;  %v2245_v2 = vrot.slane %v6996_v30, 1 }
  0xe4   :  { %3358 = vrot.lane.b32.xlu0 %v3264_v63, %s5510_s19  ;;  %v4908_v63 = vcombine.low %v4588_v56, %v6740_v39  ;;  %v2293_v39 = vrot.slane %v6983_v18, 1  ;;  %v7085_v18 = vld [vmem:[%s9168_s0 + $0x34] sm:$0xf]  ;;  %v4939_v30 = vcombine.low %v4637_v60, %v7066_v36 }
  0xe5   :  { %v7036_v20 = vpop.permute.xlu1 %1340  ;;  %v2292_v28 = vrot.slane %v4907_v6, 1  ;;  %v1741_v29 = vsel %vm668_vm0, %v1736_v54, %v1740_v57 }
  0xe6   :  { %9363 = vst [vmem:[#allocation78_spill] sm:$0xff] %v7036_v20  ;;  %v7042_v4 = vpop.permute.xlu0 %1338  ;;  %v2295_v47 = vrot.slane %v4908_v63, 1 }
  0xe7   :  { %9364 = vst [vmem:[#allocation79_spill] sm:$0xff] %v7042_v4  ;;  %3392 = vrot.lane.b32.xlu1 %v3315_v42, %s5510_s19  ;;  %v2294_v31 = vsel %vm1213_vm1, %v2292_v28, %v2293_v39 }
  0xe8   :  { %3360 = vrot.lane.b32.xlu0 %v3267_v26, %s5510_s19  ;;  %v2296_v26 = vrot.slane %v7005_v38, 1 }
  0xe9   :  { %v7050_v48 = vpop.permute.xlu1 %1344 }
  0xea   :  { %v7057_v23 = vpop.permute.xlu0 %1342 }
  0xeb   :  { %2114 = vrot.lane.b32.xlu1 %v1921_v51, %s5506_s11 }
  0xec   :  { %2082 = vrot.lane.b32.xlu0 %v1729_v37, %s5506_s11 }
  0xed   :  { %v7076_v42 = vpop.permute.xlu1 %1348 }
  0xee   :  { %9365 = vst [vmem:[#allocation80_spill] sm:$0xff] %v7076_v42  ;;  %v7079_v52 = vpop.permute.xlu0 %1346 }
  0xef   :  { %9366 = vst [vmem:[#allocation81_spill] sm:$0xff] %v7079_v52  ;;  %2116 = vrot.lane.b32.xlu1 %v1933_v8, %s5506_s11 }
  0xf0   :  { %2084 = vrot.lane.b32.xlu0 %v1741_v29, %s5506_s11 }
  0xf1   :  { %8 = vsyncpa [#allocation3], 0  ;;  %v2247_v35 = vrot.slane %v4892_v5, 1  ;;  %v7091_v49 = vpop.permute.xlu1 %1352  ;;  %v2246_v16 = vsel %vm1213_vm1, %v2244_v15, %v2245_v2  ;;  %v2248_v38 = vrot.slane %v7011_v1, 1  ;;  %v4923_v21 = vcombine.low %v4605_v22, %v7085_v18  ;;  %v4639_v6 = vld [vmem:[%s9168_s0 + $0x114] sm:$0xf] }
  0xf2   :  { %9367 = vst [vmem:[#allocation82_spill] sm:$0xff] %v7091_v49  ;;  %v7102_v56 = vld [vmem:[%s9168_s0 + $0x118] sm:$0xf]  ;;  %v7104_v51 = vpop.permute.xlu0 %1350  ;;  %v4607_v59 = vld [vmem:[%s9168_s0 + $0x3c] sm:$0xf]  ;;  %v2297_v54 = vsel %vm1213_vm1, %v2295_v47, %v2296_v26  ;;  %v2937_v53 = vshll.u32 %v4939_v30, 16 }
  0xf3   :  { %9368 = vst [vmem:[#allocation83_spill] sm:$0xff] %v7104_v51  ;;  %v7112_v1 = vld [vmem:[%s9168_s0 + $0x40] sm:$0xf]  ;;  %2370 = vrot.lane.b32.xlu1 %v2294_v31, %s5507_s5  ;;  %v7118_v10 = vld [vmem:[%s9168_s0 + $0x110] ss:$0 sps:$4 sm:$0x11]   ;;  %v4940_v57 = vcombine.low %v4639_v6, %v7102_v56  ;;  %v2249_v63 = vsel %vm1213_vm1, %v2247_v35, %v2248_v38 }
  0xf4   :  { %v7123_v37 = vld [vmem:[%s9168_s0 + $0x38] ss:$0 sps:$4 sm:$0x11]   ;;  %2338 = vrot.lane.b32.xlu0 %v2246_v16, %s5507_s5  ;;  %v4924_v28 = vcombine.low %v4607_v59, %v7112_v1  ;;  %v2745_v60 = vshll.u32 %v4923_v21, 16  ;;  %v2942_v39 = vshll.u32 %v7118_v10, 16  ;;  %v2935_v22 = vshrl.u32 %v4939_v30, 16 }
  0xf5   :  { %v7128_v15 = vpop.permute.xlu1 %1356  ;;  %v2750_v2 = vshll.u32 %v7123_v37, 16  ;;  %v2939_v5 = vrot.slane %v2937_v53, 1  ;;  %v7141_v29 = vld [vmem:[%s9168_s0 + $0x11c] ss:$0 sps:$4 sm:$0x11]   ;;  %v2949_v47 = vshll.u32 %v4940_v57, 16 }
  0xf6   :  { %9369 = vst [vmem:[#allocation84_spill] sm:$0xff] %v7128_v15  ;;  %v7132_v8 = vpop.permute.xlu0 %1354  ;;  %v2743_v31 = vshrl.u32 %v4923_v21, 16  ;;  %v2747_v35 = vrot.slane %v2745_v60, 1  ;;  %v7148_v16 = vld [vmem:[%s9168_s0 + $0x44] ss:$0 sps:$4 sm:$0x11]  }
  0xf7   :  { %9370 = vst [vmem:[#allocation85_spill] sm:$0xff] %v7132_v8  ;;  %2372 = vrot.lane.b32.xlu1 %v2297_v54, %s5507_s5  ;;  %v2757_v38 = vshll.u32 %v4924_v28, 16  ;;  %v2944_v59 = vrot.slane %v2942_v39, 1  ;;  %v2752_v54 = vrot.slane %v2750_v2, 1  ;;  %v2940_v53 = vor.u32 %v2939_v5, %v2935_v22  ;;  %v9397_v49 = vld [vmem:[#allocation6_spill] sm:$0xff] }
  0xf8   :  { %2340 = vrot.lane.b32.xlu0 %v2249_v63, %s5507_s5  ;;  %v2947_v63 = vshrl.u32 %v4940_v57, 16  ;;  %v2951_v20 = vrot.slane %v2949_v47, 1  ;;  %v2954_v4 = vshll.u32 %v7141_v29, 16  ;;  %v2748_v13 = vor.u32 %v2747_v35, %v2743_v31 }
  0xf9   :  { %v7143_v26 = vpop.permute.xlu1 %1360  ;;  %v2755_v3 = vshrl.u32 %v4924_v28, 16  ;;  %v2759_v55 = vrot.slane %v2757_v38, 1  ;;  %v2945_v2 = vsel %vm668_vm0, %v2940_v53, %v2944_v59  ;;  %v3269_v53 = vrot.slane %v7123_v37, 1 }
  0xfa   :  { %9371 = vst [vmem:[#allocation86_spill] sm:$0xff] %v7143_v26  ;;  %v7150_v6 = vpop.permute.xlu0 %1358  ;;  %v2762_v26 = vshll.u32 %v7148_v16, 16  ;;  %v2952_v22 = vor.u32 %v2951_v20, %v2947_v63  ;;  %v2956_v5 = vrot.slane %v2954_v4, 1  ;;  %v2753_v35 = vsel %vm668_vm0, %v2748_v13, %v2752_v54  ;;  %v4700_v4 = vld [vmem:[%s9168_s0 + $0x3c] sm:$0xe] }
  0xfb   :  { %9372 = vst [vmem:[#allocation87_spill] sm:$0xff] %v7150_v6  ;;  %2594 = vrot.lane.b32.xlu1 %v4939_v30, %s5508_s18  ;;  %v4715_v30 = vld [vmem:[%s9168_s0 + $0x108] sm:$0xe]  ;;  %v2760_v38 = vor.u32 %v2759_v55, %v2755_v3  ;;  %v1745_v20 = vshll.u32 %v6584_v19, 16  ;;  %v3317_v13 = vrot.slane %v7118_v10, 1  ;;  %v4988_v63 = vcombine.low %v4700_v4, %v7112_v1 }
  0xfc   :  { %2562 = vrot.lane.b32.xlu0 %v4923_v21, %s5508_s18  ;;  %v4699_v21 = vld [vmem:[%s9168_s0 + $0x30] sm:$0xe]  ;;  %v5003_v47 = vcombine.low %v4715_v30, %v7066_v36  ;;  %v1937_v36 = vshll.u32 %v6805_v34, 16  ;;  %v2957_v3 = vsel %vm668_vm0, %v2952_v22, %v2956_v5  ;;  %v7202_v10 = vld [vmem:[%s9168_s0 + $0x44] ss:$0 sps:$4 sm:$0x11]  }
  0xfd   :  { %v7155_v60 = vpop.permute.xlu1 %1364  ;;  %v1743_v30 = vshrl.u32 %v6584_v19, 16  ;;  %v1949_v22 = vshll.u32 %v6802_v14, 16  ;;  %v3320_v5 = vrot.slane %v7141_v29, 1  ;;  %v7218_v19 = vld [vmem:[%s9168_s0 + $0x128] ss:$0 sps:$4 sm:$0x11]  }
  0xfe   :  { %9373 = vst [vmem:[#allocation88_spill] sm:$0xff] %v7155_v60  ;;  %v7161_v39 = vpop.permute.xlu0 %1362  ;;  %v2764_v60 = vrot.slane %v2762_v26, 1  ;;  %v3316_v55 = vrot.slane %v5003_v47, 1  ;;  %v1750_v4 = vshll.u32 %v7202_v10, 16  ;;  %vm3422_vm3 = vcmask 31744  }
  0xff   :  { %9374 = vst [vmem:[#allocation89_spill] sm:$0xff] %v7161_v39  ;;  %2596 = vrot.lane.b32.xlu1 %v4940_v57, %s5508_s18  ;;  %v4987_v39 = vcombine.low %v4699_v21, %v7085_v18  ;;  %v4716_v57 = vld [vmem:[%s9168_s0 + $0x114] sm:$0xe]  ;;  %v7228_v29 = vld [vmem:[%s9168_s0 + $0x50] ss:$0 sps:$4 sm:$0x11]  }
 0x100   :  { %2564 = vrot.lane.b32.xlu0 %v4924_v28, %s5508_s18  ;;  %v5004_v18 = vcombine.low %v4716_v57, %v7102_v56  ;;  %v7192_v28 = vld [vmem:[%s9168_s0 + $0x11c] ss:$0 sps:$4 sm:$0x11]   ;;  %v2765_v59 = vsel %vm668_vm0, %v2760_v38, %v2764_v60  ;;  %v1757_v56 = vshll.u32 %v6580_v9, 16  ;;  %v1935_v60 = vshrl.u32 %v6805_v34, 16 }
 0x101   :  { %v7170_v31 = vpop.permute.xlu1 %1368  ;;  %v3268_v54 = vrot.slane %v4987_v39, 1  ;;  %v1939_v39 = vrot.slane %v1937_v36, 1  ;;  %v3318_v1 = vsel %vm1213_vm1, %v3316_v55, %v3317_v13  ;;  %v1942_v47 = vshll.u32 %v7192_v28, 16 }
 0x102   :  { %9375 = vst [vmem:[#allocation90_spill] sm:$0xff] %v7170_v31  ;;  %v7177_v6 = vpop.permute.xlu0 %1366  ;;  %v3319_v37 = vrot.slane %v5004_v18, 1  ;;  %v3271_v38 = vrot.slane %v4988_v63, 1  ;;  %v3272_v57 = vrot.slane %v7148_v16, 1  ;;  %v1755_v36 = vshrl.u32 %v6580_v9, 16 }
 0x103   :  { %9376 = vst [vmem:[#allocation91_spill] sm:$0xff] %v7177_v6  ;;  %3138 = vrot.lane.b32.xlu1 %v2945_v2, %s5509_s1  ;;  %v1747_v2 = vrot.slane %v1745_v20, 1  ;;  %v3270_v34 = vsel %vm1213_vm1, %v3268_v54, %v3269_v53  ;;  %v1947_v55 = vshrl.u32 %v6802_v14, 16  ;;  %v1951_v13 = vrot.slane %v1949_v22, 1  ;;  %v4589_v53 = vld [vmem:[%s9168_s0 + $0x114] sm:$0xe] }
 0x104   :  { %3106 = vrot.lane.b32.xlu0 %v2753_v35, %s5509_s1  ;;  %v3321_v16 = vsel %vm1213_vm1, %v3319_v37, %v3320_v5  ;;  %v1940_v18 = vor.u32 %v1939_v39, %v1935_v60  ;;  %v1954_v54 = vshll.u32 %v7218_v19, 16  ;;  %v3273_v9 = vsel %vm1213_vm1, %v3271_v38, %v3272_v57 }
 0x105   :  { %v7194_v26 = vpop.permute.xlu1 %1372  ;;  %v1748_v14 = vor.u32 %v1747_v2, %v1743_v30  ;;  %v1762_v22 = vshll.u32 %v7228_v29, 16  ;;  %v4909_v39 = vcombine.low %v4589_v53, %v6788_v17  ;;  %v1952_v5 = vor.u32 %v1951_v13, %v1947_v55  ;;  %v5467_v30 = vld [vmem:[%s9168_s0 + $0x40] sm:$0xf]  ;;  %v4574_v55 = vld [vmem:[%s9168_s0 + $0x48] sm:$0xe] }
 0x106   :  { %9377 = vst [vmem:[#allocation92_spill] sm:$0xff] %v7194_v26  ;;  %v7206_v21 = vpop.permute.xlu0 %1370  ;;  %vm3487_vm4 = vcmask 64512   ;;  %vm3552_vm5 = vcmask 97280   ;;  %vm3617_vm6 = vcmask 130048   ;;  %vm3682_vm7 = vcmask 162816  }
 0x107   :  { %9378 = vst [vmem:[#allocation93_spill] sm:$0xff] %v7206_v21  ;;  %3140 = vrot.lane.b32.xlu1 %v2957_v3, %s5509_s1  ;;  %v1759_v3 = vrot.slane %v1757_v56, 1  ;;  %v1752_v56 = vrot.slane %v1750_v4, 1  ;;  %v1764_v4 = vrot.slane %v1762_v22, 1  ;;  %vm3747_vm8 = vcmask 195584  }
 0x108   :  { %3108 = vrot.lane.b32.xlu0 %v2765_v59, %s5509_s1  ;;  %v1944_v59 = vrot.slane %v1942_v47, 1  ;;  %v1956_v47 = vrot.slane %v1954_v54, 1  ;;  %v2299_v54 = vrot.slane %v7192_v28, 1  ;;  %v7286_v28 = vld [vmem:[%s9168_s0 + $0x124] sm:$0xf]  ;;  %vm3812_vm9 = vcmask 228352  }
 0x109   :  { %v7220_v35 = vpop.permute.xlu1 %1536  ;;  %v1753_v57 = vsel %vm668_vm0, %v1748_v14, %v1752_v56  ;;  %v1760_v17 = vor.u32 %v1759_v3, %v1755_v36  ;;  %v5468_v36 = vld [vmem:[%s9168_s0 + $0x4c] sm:$0xf]  ;;  %v2251_v56 = vrot.slane %v7202_v10, 1  ;;  %vm3877_vm10 = vcmask 261120  }
 0x10a   :  { %v7230_v20 = vpop.permute.xlu0 %1534  ;;  %v1945_v37 = vsel %vm668_vm0, %v1940_v18, %v1944_v59  ;;  %v2298_v18 = vrot.slane %v4909_v39, 1  ;;  %v1957_v59 = vsel %vm668_vm0, %v1952_v5, %v1956_v47  ;;  %v4894_v3 = vcombine.low %v4574_v55, %v5468_v36  ;;  %v7296_v39 = vld [vmem:[%s9168_s0 + $0x4c] sm:$0xf]  ;;  %v7314_v55 = vld [vmem:[%s9168_s0 + $0x130] sm:$0xf] }
 0x10b   :  { %3394 = vrot.lane.b32.xlu1 %v3318_v1, %s5510_s19  ;;  %v4573_v1 = vld [vmem:[%s9168_s0 + $0x3c] sm:$0xe]  ;;  %v1765_v14 = vsel %vm668_vm0, %v1760_v17, %v1764_v4  ;;  %v2302_v5 = vrot.slane %v7218_v19, 1  ;;  %v4643_v4 = vld [vmem:[%s9168_s0 + $0x12c] sm:$0xf]  ;;  %vm3969_vm11 = vcmask 293888  }
 0x10c   :  { %3362 = vrot.lane.b32.xlu0 %v3270_v34, %s5510_s19  ;;  %v4893_v2 = vcombine.low %v4573_v1, %v5467_v30  ;;  %v4590_v34 = vld [vmem:[%s9168_s0 + $0x120] sm:$0xe]  ;;  %v4609_v1 = vld [vmem:[%s9168_s0 + $0x48] sm:$0xf]  ;;  %v2253_v30 = vrot.slane %v4894_v3, 1 }
 0x10d   :  { %v7241_v63 = vpop.permute.xlu1 %1540  ;;  %v4925_v17 = vcombine.low %v4609_v1, %v7296_v39  ;;  %v7338_v3 = vld [vmem:[%s9168_s0 + $0x50] ss:$0 sps:$4 sm:$0x11]  }
 0x10e   :  { %9379 = vst [vmem:[#allocation94_spill] sm:$0xff] %v7241_v63  ;;  %v7248_v60 = vpop.permute.xlu0 %1538  ;;  %v2250_v53 = vrot.slane %v4893_v2, 1 }
 0x10f   :  { %9380 = vst [vmem:[#allocation95_spill] sm:$0xff] %v7248_v60  ;;  %3396 = vrot.lane.b32.xlu1 %v3321_v16, %s5510_s19  ;;  %v4910_v16 = vcombine.low %v4590_v34, %v6764_v50  ;;  %v4641_v50 = vld [vmem:[%s9168_s0 + $0x120] sm:$0xf] }
 0x110   :  { %3364 = vrot.lane.b32.xlu0 %v3273_v9, %s5510_s19  ;;  %v4941_v47 = vcombine.low %v4641_v50, %v7286_v28  ;;  %v2252_v34 = vsel %vm1213_vm1, %v2250_v53, %v2251_v56  ;;  %v2769_v50 = vshll.u32 %v4925_v17, 16 }
 0x111   :  { %v7260_v38 = vpop.permute.xlu1 %1544  ;;  %v2301_v10 = vrot.slane %v4910_v16, 1  ;;  %v4611_v16 = vld [vmem:[%s9168_s0 + $0x54] sm:$0xf] }
 0x112   :  { %9381 = vst [vmem:[#allocation96_spill] sm:$0xff] %v7260_v38  ;;  %v7266_v13 = vpop.permute.xlu0 %1542  ;;  %v2961_v36 = vshll.u32 %v4941_v47, 16  ;;  %v2771_v21 = vrot.slane %v2769_v50, 1  ;;  %v4717_v50 = vld [vmem:[%s9168_s0 + $0x120] sm:$0xe] }
 0x113   :  { %9382 = vst [vmem:[#allocation97_spill] sm:$0xff] %v7266_v13  ;;  %2118 = vrot.lane.b32.xlu1 %v1945_v37, %s5506_s11  ;;  %v2300_v37 = vsel %vm1213_vm1, %v2298_v18, %v2299_v54  ;;  %v7330_v18 = vld [vmem:[%s9168_s0 + $0x128] ss:$0 sps:$4 sm:$0x11]   ;;  %v4942_v54 = vcombine.low %v4643_v4, %v7314_v55 }
 0x114   :  { %2086 = vrot.lane.b32.xlu0 %v1753_v57, %s5506_s11  ;;  %v2254_v57 = vrot.slane %v7228_v29, 1  ;;  %v7324_v29 = vld [vmem:[%s9168_s0 + $0x58] sm:$0xf] }
 0x115   :  { %v7276_v9 = vpop.permute.xlu1 %1548  ;;  %v4926_v56 = vcombine.low %v4611_v16, %v7324_v29  ;;  %v2767_v16 = vshrl.u32 %v4925_v17, 16  ;;  %v2971_v6 = vshrl.u32 %v4942_v54, 16 }
 0x116   :  { %9383 = vst [vmem:[#allocation98_spill] sm:$0xff] %v7276_v9  ;;  %v7288_v22 = vpop.permute.xlu0 %1546 }
 0x117   :  { %9384 = vst [vmem:[#allocation99_spill] sm:$0xff] %v7288_v22  ;;  %2120 = vrot.lane.b32.xlu1 %v1957_v59, %s5506_s11  ;;  %v2303_v59 = vsel %vm1213_vm1, %v2301_v10, %v2302_v5  ;;  %v2966_v10 = vshll.u32 %v7330_v18, 16  ;;  %v2959_v5 = vshrl.u32 %v4941_v47, 16  ;;  %v2781_v26 = vshll.u32 %v4926_v56, 16 }
 0x118   :  { %2088 = vrot.lane.b32.xlu0 %v1765_v14, %s5506_s11  ;;  %v2255_v14 = vsel %vm1213_vm1, %v2253_v30, %v2254_v57  ;;  %v2774_v30 = vshll.u32 %v7338_v3, 16  ;;  %v2973_v57 = vshll.u32 %v4942_v54, 16  ;;  %v2779_v62 = vshrl.u32 %v4926_v56, 16 }
 0x119   :  { %v7303_v2 = vpop.permute.xlu1 %1552 }
 0x11a   :  { %9385 = vst [vmem:[#allocation100_spill] sm:$0xff] %v7303_v2  ;;  %v7316_v19 = vpop.permute.xlu0 %1550  ;;  %v2772_v2 = vor.u32 %v2771_v21, %v2767_v16 }
 0x11b   :  { %9386 = vst [vmem:[#allocation101_spill] sm:$0xff] %v7316_v19  ;;  %2374 = vrot.lane.b32.xlu1 %v2300_v37, %s5507_s5  ;;  %v7351_v37 = vld [vmem:[%s9168_s0 + $0x134] ss:$0 sps:$4 sm:$0x11]  }
 0x11c   :  { %2342 = vrot.lane.b32.xlu0 %v2252_v34, %s5507_s5  ;;  %v2963_v34 = vrot.slane %v2961_v36, 1 }
 0x11d   :  { %v7340_v53 = vpop.permute.xlu1 %1556 }
 0x11e   :  { %9387 = vst [vmem:[#allocation102_spill] sm:$0xff] %v7340_v53  ;;  %v7344_v1 = vpop.permute.xlu0 %1554  ;;  %v2964_v36 = vor.u32 %v2963_v34, %v2959_v5  ;;  %v2776_v53 = vrot.slane %v2774_v30, 1  ;;  %v5005_v5 = vcombine.low %v4717_v50, %v7286_v28  ;;  %v4517_v28 = vld [vmem:[%s9168_s0 + $0x12c] sm:$0xf]  ;;  %v3275_v50 = vrot.slane %v7338_v3, 1 }
 0x11f   :  { %9388 = vst [vmem:[#allocation103_spill] sm:$0xff] %v7344_v1  ;;  %2376 = vrot.lane.b32.xlu1 %v2303_v59, %s5507_s5  ;;  %v7360_v59 = vld [vmem:[%s9168_s0 + $0x5c] ss:$0 sps:$4 sm:$0x11]   ;;  %v2975_v1 = vrot.slane %v2973_v57, 1 }
 0x120   :  { %2344 = vrot.lane.b32.xlu0 %v2255_v14, %s5507_s5  ;;  %v2968_v14 = vrot.slane %v2966_v10, 1  ;;  %v2777_v16 = vsel %vm668_vm0, %v2772_v2, %v2776_v53  ;;  %v7428_v3 = vld [vmem:[%s9168_s0 + $0x134] ss:$0 sps:$4 sm:$0x11]  }
 0x121   :  { %v7355_v4 = vpop.permute.xlu1 %1560  ;;  %v2976_v30 = vor.u32 %v2975_v1, %v2971_v6  ;;  %v7395_v6 = vld [vmem:[%s9168_s0 + $0x130] sm:$0xf]  ;;  %v4702_v1 = vld [vmem:[%s9168_s0 + $0x54] sm:$0xe] }
 0x122   :  { %9389 = vst [vmem:[#allocation104_spill] sm:$0xff] %v7355_v4  ;;  %v7362_v31 = vpop.permute.xlu0 %1558  ;;  %v2978_v4 = vshll.u32 %v7351_v37, 16  ;;  %v2969_v34 = vsel %vm668_vm0, %v2964_v36, %v2968_v14  ;;  %v4847_v53 = vcombine.low %v4517_v28, %v7395_v6  ;;  %v7441_v28 = vld [vmem:[%s9168_s0 + $0x5c] ss:$0 sps:$4 sm:$0x11]  }
 0x123   :  { %9390 = vst [vmem:[#allocation105_spill] sm:$0xff] %v7362_v31  ;;  %2598 = vrot.lane.b32.xlu1 %v4941_v47, %s5508_s18  ;;  %v2783_v31 = vrot.slane %v2781_v26, 1  ;;  %v2786_v47 = vshll.u32 %v7360_v59, 16  ;;  %v4718_v26 = vld [vmem:[%s9168_s0 + $0x12c] sm:$0xe] }
 0x124   :  { %2566 = vrot.lane.b32.xlu0 %v4925_v17, %s5508_s18  ;;  %v4701_v17 = vld [vmem:[%s9168_s0 + $0x48] sm:$0xe]  ;;  %v2980_v21 = vrot.slane %v2978_v4, 1  ;;  %v5006_v2 = vcombine.low %v4718_v26, %v7314_v55 }
 0x125   :  { %v7370_v19 = vpop.permute.xlu1 %1564 }
 0x126   :  { %9391 = vst [vmem:[#allocation106_spill] sm:$0xff] %v7370_v19  ;;  %v7373_v10 = vpop.permute.xlu0 %1562  ;;  %v2784_v19 = vor.u32 %v2783_v31, %v2779_v62  ;;  %v3322_v62 = vrot.slane %v5005_v5, 1  ;;  %v3323_v31 = vrot.slane %v7330_v18, 1  ;;  %v4519_v18 = vld [vmem:[%s9168_s0 + $0x138] sm:$0xf] }
 0x127   :  { %9392 = vst [vmem:[#allocation107_spill] sm:$0xff] %v7373_v10  ;;  %2600 = vrot.lane.b32.xlu1 %v4942_v54, %s5508_s18  ;;  %v2788_v10 = vrot.slane %v2786_v47, 1  ;;  %v4989_v54 = vcombine.low %v4701_v17, %v7296_v39  ;;  %v2981_v39 = vsel %vm668_vm0, %v2976_v30, %v2980_v21  ;;  %v4990_v47 = vcombine.low %v4702_v1, %v7324_v29  ;;  %v7419_v17 = vld [vmem:[%s9168_s0 + $0x13c] sm:$0xf] }
 0x128   :  { %2568 = vrot.lane.b32.xlu0 %v4926_v56, %s5508_s18  ;;  %v3325_v29 = vrot.slane %v5006_v2, 1  ;;  %v4848_v5 = vcombine.low %v4519_v18, %v7419_v17  ;;  %v1769_v30 = vshll.u32 %v6608_v12, 16 }
 0x129   :  { %v7385_v57 = vpop.permute.xlu1 %1568  ;;  %v2789_v14 = vsel %vm668_vm0, %v2784_v19, %v2788_v10  ;;  %v3274_v36 = vrot.slane %v4989_v54, 1  ;;  %v3324_v19 = vsel %vm1213_vm1, %v3322_v62, %v3323_v31  ;;  %v3326_v10 = vrot.slane %v7351_v37, 1 }
 0x12a   :  { %v7397_v56 = vpop.permute.xlu0 %1566  ;;  %v3278_v54 = vrot.slane %v7360_v59, 1  ;;  %v1781_v37 = vshll.u32 %v6604_v7, 16  ;;  %v1966_v62 = vshll.u32 %v7428_v3, 16  ;;  %v7453_v59 = vld [vmem:[%s9168_s0 + $0x140] ss:$0 sps:$4 sm:$0x11]  }
 0x12b   :  { %3142 = vrot.lane.b32.xlu1 %v2969_v34, %s5509_s1  ;;  %v1961_v34 = vshll.u32 %v4847_v53, 16  ;;  %v3276_v26 = vsel %vm1213_vm1, %v3274_v36, %v3275_v50  ;;  %v3327_v31 = vsel %vm1213_vm1, %v3325_v29, %v3326_v10  ;;  %v1767_v36 = vshrl.u32 %v6608_v12, 16  ;;  %v7463_v29 = vld [vmem:[%s9168_s0 + $0x68] ss:$0 sps:$4 sm:$0x11]  }
 0x12c   :  { %3110 = vrot.lane.b32.xlu0 %v2777_v16, %s5509_s1  ;;  %v3277_v16 = vrot.slane %v4990_v47, 1  ;;  %v1771_v50 = vrot.slane %v1769_v30, 1  ;;  %v4575_v12 = vld [vmem:[%s9168_s0 + $0x54] sm:$0xe]  ;;  %v1978_v61 = vshll.u32 %v7453_v59, 16  ;;  %v1783_v22 = vrot.slane %v1781_v37, 1 }
 0x12d   :  { %v7408_v4 = vpop.permute.xlu1 %1572  ;;  %v1963_v2 = vrot.slane %v1961_v34, 1  ;;  %v1779_v34 = vshrl.u32 %v6604_v7, 16  ;;  %v1786_v7 = vshll.u32 %v7463_v29, 16  ;;  %v4576_v37 = vld [vmem:[%s9168_s0 + $0x60] sm:$0xe] }
 0x12e   :  { %9393 = vst [vmem:[#allocation108_spill] sm:$0xff] %v7408_v4  ;;  %v7421_v55 = vpop.permute.xlu0 %1570  ;;  %v3279_v18 = vsel %vm1213_vm1, %v3277_v16, %v3278_v54  ;;  %v1971_v16 = vshrl.u32 %v4848_v5, 16  ;;  %v1772_v8 = vor.u32 %v1771_v50, %v1767_v36  ;;  %v1980_v50 = vrot.slane %v1978_v61, 1  ;;  %v7506_v61 = vld [vmem:[%s9168_s0 + $0x13c] sm:$0xf] }
 0x12f   :  { %9394 = vst [vmem:[#allocation109_spill] sm:$0xff] %v7421_v55  ;;  %3144 = vrot.lane.b32.xlu1 %v2981_v39, %s5509_s1  ;;  %v1959_v39 = vshrl.u32 %v4847_v53, 16  ;;  %v9400_v4 = vld [vmem:[#allocation22_spill] sm:$0xff] }
 0x130   :  { %3112 = vrot.lane.b32.xlu0 %v2789_v14, %s5509_s1  ;;  %v1973_v14 = vshll.u32 %v4848_v5, 16 }
 0x131   :  { %v7434_v21 = vpop.permute.xlu1 %1576  ;;  %v1964_v30 = vor.u32 %v1963_v2, %v1959_v39  ;;  %v5469_v39 = vld [vmem:[%s9168_s0 + $0x58] sm:$0xf] }
 0x132   :  { %9395 = vst [vmem:[#allocation110_spill] sm:$0xff] %v7434_v21  ;;  %v7443_v1 = vpop.permute.xlu0 %1574  ;;  %v1975_v54 = vrot.slane %v1973_v14, 1  ;;  %v4895_v2 = vcombine.low %v4575_v12, %v5469_v39  ;;  %v1788_v12 = vrot.slane %v1786_v7, 1  ;;  %v4647_v7 = vld [vmem:[%s9168_s0 + $0x144] sm:$0xf] }
 0x133   :  { %9396 = vst [vmem:[#allocation111_spill] sm:$0xff] %v7443_v1  ;;  %3398 = vrot.lane.b32.xlu1 %v3324_v19, %s5510_s19  ;;  %v1774_v19 = vshll.u32 %v7441_v28, 16  ;;  %v1784_v1 = vor.u32 %v1783_v22, %v1779_v34  ;;  %v5470_v22 = vld [vmem:[%s9168_s0 + $0x64] sm:$0xf] }
 0x134   :  { %3366 = vrot.lane.b32.xlu0 %v3276_v26, %s5510_s19  ;;  %v1968_v26 = vrot.slane %v1966_v62, 1  ;;  %v4591_v62 = vld [vmem:[%s9168_s0 + $0x12c] sm:$0xe]  ;;  %v1976_v36 = vor.u32 %v1975_v54, %v1971_v16  ;;  %v2256_v34 = vrot.slane %v4895_v2, 1  ;;  %v2305_v16 = vrot.slane %v7428_v3, 1 }
 0x135   :  { %v7456_v47 = vpop.permute.xlu1 %2110  ;;  %v1776_v15 = vrot.slane %v1774_v19, 1 }
 0x136   :  { %v7465_v10 = vpop.permute.xlu0 %2078  ;;  %v1969_v14 = vsel %vm668_vm0, %v1964_v30, %v1968_v26  ;;  %v1981_v26 = vsel %vm668_vm0, %v1976_v36, %v1980_v50  ;;  %v2260_v50 = vrot.slane %v7463_v29, 1  ;;  %v7563_v29 = vld [vmem:[%s9168_s0 + $0x140] ss:$0 sps:$4 sm:$0x11]  }
 0x137   :  { %3400 = vrot.lane.b32.xlu1 %v3327_v31, %s5510_s19  ;;  %v1777_v21 = vsel %vm668_vm0, %v1772_v8, %v1776_v15  ;;  %v4613_v15 = vld [vmem:[%s9168_s0 + $0x60] sm:$0xf]  ;;  %v7514_v8 = vld [vmem:[%s9168_s0 + $0x64] sm:$0xf] }
 0x138   :  { %3368 = vrot.lane.b32.xlu0 %v3279_v18, %s5510_s19  ;;  %v4911_v18 = vcombine.low %v4591_v62, %v7395_v6  ;;  %v4896_v6 = vcombine.low %v4576_v37, %v5470_v22  ;;  %v7530_v62 = vld [vmem:[%s9168_s0 + $0x148] sm:$0xf]  ;;  %v2257_v37 = vrot.slane %v7441_v28, 1  ;;  %v4615_v28 = vld [vmem:[%s9168_s0 + $0x6c] sm:$0xf] }
 0x139   :  { %v7474_v9 = vpop.permute.xlu1 %2112 }
 0x13a   :  { %v7480_v31 = vpop.permute.xlu0 %2080  ;;  %v2304_v30 = vrot.slane %v4911_v18, 1  ;;  %v2259_v36 = vrot.slane %v4896_v6, 1  ;;  %v7547_v18 = vcombine.low %v4647_v7, %v7530_v62  ;;  %v2258_v22 = vsel %vm1213_vm1, %v2256_v34, %v2257_v37  ;;  %v7582_v34 = vld [vmem:[%s9168_s0 + $0x14c] ss:$0 sps:$4 sm:$0x11]  }
 0x13b   :  { %1580 = vrot.lane.b32.xlu1 %v4848_v5, %s5505_s23  ;;  %v4592_v5 = vld [vmem:[%s9168_s0 + $0x138] sm:$0xe] }
 0x13c   :  { %1578 = vrot.lane.b32.xlu0 %v4847_v53, %s5505_s23  ;;  %v4645_v53 = vld [vmem:[%s9168_s0 + $0x138] sm:$0xf]  ;;  %v4912_v54 = vcombine.low %v4592_v5, %v7419_v17  ;;  %v7540_v17 = vcombine.low %v4613_v15, %v7514_v8 }
 0x13d   :  { %v7492_v19 = vpop.permute.xlu1 %2366 }
 0x13e   :  { %v7501_v39 = vpop.permute.xlu0 %2334  ;;  %v2307_v5 = vrot.slane %v4912_v54, 1  ;;  %v2997_v54 = vshll.u32 %v7547_v18, 16 }
 0x13f   :  { %2122 = vrot.lane.b32.xlu1 %v1969_v14, %s5506_s11  ;;  %v7537_v14 = vcombine.low %v4645_v53, %v7506_v61  ;;  %v2308_v53 = vrot.slane %v7453_v59, 1  ;;  %v2261_v59 = vsel %vm1213_vm1, %v2259_v36, %v2260_v50  ;;  %v2791_v50 = vshrl.u32 %v7540_v17, 16 }
 0x140   :  { %2090 = vrot.lane.b32.xlu0 %v1777_v21, %s5506_s11  ;;  %v1789_v21 = vsel %vm668_vm0, %v1784_v1, %v1788_v12  ;;  %v7555_v1 = vld [vmem:[%s9168_s0 + $0x70] sm:$0xf]  ;;  %v2306_v12 = vsel %vm1213_vm1, %v2304_v30, %v2305_v16  ;;  %v2793_v30 = vshll.u32 %v7540_v17, 16 }
 0x141   :  { %v7532_v2 = vpop.permute.xlu1 %2368  ;;  %v2985_v6 = vshll.u32 %v7537_v14, 16  ;;  %v2309_v7 = vsel %vm1213_vm1, %v2307_v5, %v2308_v53  ;;  %v2983_v37 = vshrl.u32 %v7537_v14, 16  ;;  %v9398_v5 = vld [vmem:[#allocation8_spill] sm:$0xff]  ;;  %v9399_v53 = vld [vmem:[#allocation21_spill] sm:$0xff] }
 0x142   :  { %v7542_v3 = vpop.permute.xlu0 %2336  ;;  %v2795_v38 = vrot.slane %v2793_v30, 1  ;;  %v3458_v63 = vsel %vm3422_vm3, %v9399_v53, %v6622_v27  ;;  %v7613_v30 = vld [vmem:[%s9168_s0 + $0x74] ss:$0 sps:$4 sm:$0x11]   ;;  %v4719_v27 = vld [vmem:[%s9168_s0 + $0x138] sm:$0xe] }
 0x143   :  { %2124 = vrot.lane.b32.xlu1 %v1981_v26, %s5506_s11  ;;  %v7572_v26 = vld [vmem:[%s9168_s0 + $0x68] ss:$0 sps:$4 sm:$0x11]   ;;  %v2987_v36 = vrot.slane %v2985_v6, 1  ;;  %v3456_v6 = vsel %vm3422_vm3, %v9400_v4, %v6632_v58  ;;  %v2810_v52 = vshll.u32 %v7613_v30, 16 }
 0x144   :  { %2092 = vrot.lane.b32.xlu0 %v1789_v21, %s5506_s11  ;;  %v7588_v21 = vcombine.low %v4615_v28, %v7555_v1  ;;  %v2798_v51 = vshll.u32 %v7572_v26, 16  ;;  %v3426_v28 = vsel %vm3422_vm3, %v9398_v5, %v6486_v44  ;;  %v2999_v44 = vrot.slane %v2997_v54, 1 }
 0x145   :  { %v7565_v15 = vpop.permute.xlu1 %2590  ;;  %v3491_v58 = vsel %vm3487_vm4, %v3426_v28, %v6882_v46  ;;  %v2988_v53 = vor.u32 %v2987_v36, %v2983_v37  ;;  %v2796_v42 = vor.u32 %v2795_v38, %v2791_v50  ;;  %v5007_v46 = vcombine.low %v4719_v27, %v7506_v61  ;;  %v4703_v61 = vld [vmem:[%s9168_s0 + $0x60] sm:$0xe]  ;;  %v4704_v27 = vld [vmem:[%s9168_s0 + $0x6c] sm:$0xe] }
 0x146   :  { %v7575_v16 = vpop.permute.xlu0 %2558  ;;  %v2800_v55 = vrot.slane %v2798_v51, 1  ;;  %v3521_v37 = vsel %vm3487_vm4, %v3456_v6, %v7057_v23  ;;  %v2803_v51 = vshrl.u32 %v7588_v21, 16  ;;  %v3329_v23 = vrot.slane %v7563_v29, 1 }
 0x147   :  { %2378 = vrot.lane.b32.xlu1 %v2306_v12, %s5507_s5  ;;  %v2990_v12 = vshll.u32 %v7563_v29, 16  ;;  %v2812_v6 = vrot.slane %v2810_v52, 1  ;;  %v3523_v52 = vsel %vm3487_vm4, %v3458_v63, %v7050_v48  ;;  %v4521_v63 = vld [vmem:[%s9168_s0 + $0x144] sm:$0xf] }
 0x148   :  { %2346 = vrot.lane.b32.xlu0 %v2258_v22, %s5507_s5  ;;  %v3424_v22 = vsel %vm3422_vm3, %v9397_v49, %v6480_v25  ;;  %v2995_v25 = vshrl.u32 %v7547_v18, 16  ;;  %v3002_v49 = vshll.u32 %v7582_v34, 16  ;;  %v2801_v50 = vsel %vm668_vm0, %v2796_v42, %v2800_v55 }
 0x149   :  { %v7592_v13 = vpop.permute.xlu1 %2592  ;;  %v3489_v4 = vsel %vm3487_vm4, %v3424_v22, %v6887_v32  ;;  %v2992_v54 = vrot.slane %v2990_v12, 1  ;;  %v4991_v55 = vcombine.low %v4703_v61, %v7514_v8  ;;  %v3332_v61 = vrot.slane %v7582_v34, 1  ;;  %v7744_v34 = vld [vmem:[%s9168_s0 + $0x74] ss:$0 sps:$4 sm:$0x11]  }
 0x14a   :  { %v7608_v60 = vpop.permute.xlu0 %2560  ;;  %v3000_v32 = vor.u32 %v2999_v44, %v2995_v25  ;;  %v3328_v25 = vrot.slane %v5007_v46, 1  ;;  %v4992_v46 = vcombine.low %v4704_v27, %v7555_v1 }
 0x14b   :  { %2380 = vrot.lane.b32.xlu1 %v2309_v7, %s5507_s5  ;;  %v2805_v7 = vshll.u32 %v7588_v21, 16  ;;  %v2993_v36 = vsel %vm668_vm0, %v2988_v53, %v2992_v54 }
 0x14c   :  { %2348 = vrot.lane.b32.xlu0 %v2261_v59, %s5507_s5  ;;  %v3004_v59 = vrot.slane %v3002_v49, 1 }
 0x14d   :  { %v3135_v5 = vpop.permute.xlu1 %3134  ;;  %v2807_v38 = vrot.slane %v2805_v7, 1 }
 0x14e   :  { %v3103_v24 = vpop.permute.xlu0 %3102 }
 0x14f   :  { %2602 = vrot.lane.b32.xlu1 %v7537_v14, %s5508_s18  ;;  %v3586_v14 = vsel %vm3552_vm5, %v3521_v37, %v7397_v56  ;;  %v4720_v56 = vld [vmem:[%s9168_s0 + $0x144] sm:$0xe] }
 0x150   :  { %2570 = vrot.lane.b32.xlu0 %v7540_v17, %s5508_s18  ;;  %v3554_v17 = vsel %vm3552_vm5, %v3489_v4, %v7230_v20  ;;  %v3651_v22 = vsel %vm3617_vm6, %v3586_v14, %v7456_v47  ;;  %v3005_v20 = vsel %vm668_vm0, %v3000_v32, %v3004_v59  ;;  %v5008_v48 = vcombine.low %v4720_v56, %v7530_v62  ;;  %v7733_v14 = vld [vmem:[%s9168_s0 + $0x14c] ss:$0 sps:$4 sm:$0x11]  }
 0x151   :  { %v3137_v12 = vpop.permute.xlu1 %3136  ;;  %v3619_v44 = vsel %vm3617_vm6, %v3554_v17, %v7465_v10  ;;  %v3716_v42 = vsel %vm3682_vm7, %v3651_v22, %v7492_v19  ;;  %v2808_v10 = vor.u32 %v2807_v38, %v2803_v51  ;;  %v3588_v19 = vsel %vm3552_vm5, %v3523_v52, %v7385_v57 }
 0x152   :  { %v3105_v28 = vpop.permute.xlu0 %3104  ;;  %v3684_v47 = vsel %vm3682_vm7, %v3619_v44, %v7501_v39  ;;  %v3781_v29 = vsel %vm3747_vm8, %v3716_v42, %v7565_v15  ;;  %v7679_v39 = vld [vmem:[%s9168_s0 + $0x148] sm:$0xf]  ;;  %v3556_v57 = vsel %vm3552_vm5, %v3491_v58, %v7220_v35  ;;  %v3653_v15 = vsel %vm3617_vm6, %v3588_v19, %v7474_v9 }
 0x153   :  { %2604 = vrot.lane.b32.xlu1 %v7547_v18, %s5508_s18  ;;  %v3749_v18 = vsel %vm3747_vm8, %v3684_v47, %v7575_v16  ;;  %v3846_v8 = vsel %vm3812_vm9, %v3781_v29, %v3135_v5  ;;  %v3621_v4 = vsel %vm3617_vm6, %v3556_v57, %v7480_v31  ;;  %v3718_v7 = vsel %vm3682_vm7, %v3653_v15, %v7532_v2  ;;  %v4523_v2 = vld [vmem:[%s9168_s0 + $0x150] sm:$0xf]  ;;  %v7710_v5 = vld [vmem:[%s9168_s0 + $0x154] sm:$0xf] }
 0x154   :  { %2572 = vrot.lane.b32.xlu0 %v7588_v21, %s5508_s18  ;;  %v3814_v16 = vsel %vm3812_vm9, %v3749_v18, %v3103_v24  ;;  %v3281_v24 = vrot.slane %v7572_v26, 1  ;;  %v3686_v9 = vsel %vm3682_vm7, %v3621_v4, %v7542_v3  ;;  %v3783_v58 = vsel %vm3747_vm8, %v3718_v7, %v7592_v13  ;;  %v4593_v4 = vld [vmem:[%s9168_s0 + $0x144] sm:$0xe]  ;;  %v4577_v7 = vld [vmem:[%s9168_s0 + $0x6c] sm:$0xe] }
 0x155   :  { %v3391_v49 = vpop.permute.xlu1 %3390  ;;  %v3280_v31 = vrot.slane %v4991_v55, 1  ;;  %v7713_v26 = vcombine.low %v4521_v63, %v7679_v39  ;;  %v3751_v13 = vsel %vm3747_vm8, %v3686_v9, %v7608_v60  ;;  %v3848_v3 = vsel %vm3812_vm9, %v3783_v58, %v3137_v12  ;;  %v7762_v55 = vld [vmem:[%s9168_s0 + $0x80] ss:$0 sps:$4 sm:$0x11]   ;;  %v7793_v58 = vld [vmem:[%s9168_s0 + $0x154] sm:$0xf] }
 0x156   :  { %v3359_v21 = vpop.permute.xlu0 %3358  ;;  %v3911_v62 = vsel %vm3877_vm10, %v3846_v8, %v3391_v49  ;;  %v2813_v54 = vsel %vm668_vm0, %v2808_v10, %v2812_v6  ;;  %v3816_v32 = vsel %vm3812_vm9, %v3751_v13, %v3105_v28  ;;  %v4850_v60 = vcombine.low %v4523_v2, %v7710_v5 }
 0x157   :  { %3146 = vrot.lane.b32.xlu1 %v2993_v36, %s5509_s1  ;;  %v3879_v35 = vsel %vm3877_vm10, %v3814_v16, %v3359_v21  ;;  %5126 = vmatprep.mubr.msk.bf16.mxu1 %vm3969_vm11, %v3911_v62  ;;  %v3330_v38 = vsel %vm1213_vm1, %v3328_v25, %v3329_v23  ;;  %v3331_v1 = vrot.slane %v5008_v48, 1  ;;  %v1985_v12 = vshll.u32 %v7713_v26, 16  ;;  %v7753_v25 = vld [vmem:[%s9168_s0 + $0x158] ss:$0 sps:$4 sm:$0x11]  }
 0x158   :  { %3114 = vrot.lane.b32.xlu0 %v2801_v50, %s5509_s1  ;;  %5094 = vmatprep.mubr.msk.bf16.mxu0 %vm3969_vm11, %v3879_v35  ;;  %v1793_v36 = vshll.u32 %v6630_v41, 16  ;;  %v3282_v17 = vsel %vm1213_vm1, %v3280_v31, %v3281_v24  ;;  %v3283_v22 = vrot.slane %v4992_v46, 1  ;;  %v3284_v28 = vrot.slane %v7613_v30, 1 }
 0x159   :  { %v3393_v53 = vpop.permute.xlu1 %3392  ;;  %v1805_v6 = vshll.u32 %v6626_v40, 16  ;;  %v1997_v56 = vshll.u32 %v4850_v60, 16  ;;  %v3333_v30 = vsel %vm1213_vm1, %v3331_v1, %v3332_v61  ;;  %v1983_v44 = vshrl.u32 %v7713_v26, 16 }
 0x15a   :  { %v3913_v59 = vsel %vm3877_vm10, %v3848_v3, %v3393_v53  ;;  %v3361_v37 = vpop.permute.xlu0 %3360  ;;  %v1987_v42 = vrot.slane %v1985_v12, 1  ;;  %v1791_v52 = vshrl.u32 %v6630_v41, 16  ;;  %v1795_v47 = vrot.slane %v1793_v36, 1  ;;  %v5471_v3 = vld [vmem:[%s9168_s0 + $0x70] sm:$0xf] }
 0x15b   :  { %v3881_v51 = vsel %vm3877_vm10, %v3816_v32, %v3361_v37  ;;  %3148 = vrot.lane.b32.xlu1 %v3005_v20, %s5509_s1  ;;  %5127 = vmatmul.mubr.msk.bf16.vlgmr.msra.gmra.mrb[0].mxu1 %vm3969_vm11, %v3913_v59  ;;  %v1990_v20 = vshll.u32 %v7733_v14, 16  ;;  %v3285_v10 = vsel %vm1213_vm1, %v3283_v22, %v3284_v28  ;;  %v1798_v19 = vshll.u32 %v7744_v34, 16  ;;  %v4594_v59 = vld [vmem:[%s9168_s0 + $0x150] sm:$0xe]  ;;  %v4578_v37 = vld [vmem:[%s9168_s0 + $0x78] sm:$0xe] }
 0x15c   :  { %3116 = vrot.lane.b32.xlu0 %v2813_v54, %s5509_s1  ;;  %5095 = vmatmul.mubr.msk.bf16.vlgmr.msra.gmra.mrb[0].mxu0 %vm3969_vm11, %v3881_v51  ;;  %v1995_v8 = vshrl.u32 %v4850_v60, 16  ;;  %v1999_v49 = vrot.slane %v1997_v56, 1  ;;  %v2002_v48 = vshll.u32 %v7753_v25, 16  ;;  %v1988_v63 = vor.u32 %v1987_v42, %v1983_v44  ;;  %v7838_v22 = vld [vmem:[%s9168_s0 + $0x160] sm:$0xf] }
 0x15d   :  { %v7737_v50 = vpop.permute.xlu1 %2114  ;;  %v1992_v57 = vrot.slane %v1990_v20, 1  ;;  %v1810_v41 = vshll.u32 %v7762_v55, 16  ;;  %v1803_v15 = vshrl.u32 %v6626_v40, 16  ;;  %v1807_v16 = vrot.slane %v1805_v6, 1  ;;  %v4649_v40 = vld [vmem:[%s9168_s0 + $0x150] sm:$0xf] }
 0x15e   :  { %v7746_v23 = vpop.permute.xlu0 %2082  ;;  %v1796_v62 = vor.u32 %v1795_v47, %v1791_v52  ;;  %v1800_v27 = vrot.slane %v1798_v19, 1  ;;  %v2000_v24 = vor.u32 %v1999_v49, %v1995_v8  ;;  %v2004_v9 = vrot.slane %v2002_v48, 1  ;;  %v5472_v28 = vld [vmem:[%s9168_s0 + $0x7c] sm:$0xf]  ;;  %v4619_v44 = vld [vmem:[%s9168_s0 + $0x84] sm:$0xf] }
 0x15f   :  { %3402 = vrot.lane.b32.xlu1 %v3330_v38, %s5510_s19  ;;  %v1993_v31 = vsel %vm668_vm0, %v1988_v63, %v1992_v57  ;;  %v1812_v2 = vrot.slane %v1810_v41, 1  ;;  %v4913_v13 = vcombine.low %v4593_v4, %v7679_v39  ;;  %v4897_v53 = vcombine.low %v4577_v7, %v5471_v3  ;;  %v7814_v39 = vld [vmem:[%s9168_s0 + $0x7c] sm:$0xf]  ;;  %v7855_v20 = vld [vmem:[%s9168_s0 + $0x88] sm:$0xf]  ;;  %v9401_v3 = vld [vmem:[#allocation5_spill] sm:$0xff] }
 0x160   :  { %3370 = vrot.lane.b32.xlu0 %v3282_v17, %s5510_s19  ;;  %v1801_v46 = vsel %vm668_vm0, %v1796_v62, %v1800_v27  ;;  %v1808_v32 = vor.u32 %v1807_v16, %v1803_v15  ;;  %v2005_v38 = vsel %vm668_vm0, %v2000_v24, %v2004_v9  ;;  %v2311_v61 = vrot.slane %v7733_v14, 1  ;;  %v4651_v17 = vld [vmem:[%s9168_s0 + $0x15c] sm:$0xf]  ;;  %v7860_v52 = vld [vmem:[%s9168_s0 + $0x158] ss:$0 sps:$4 sm:$0x11]  }
 0x161   :  { %v7765_v29 = vpop.permute.xlu1 %2116  ;;  %v2310_v1 = vrot.slane %v4913_v13, 1  ;;  %v4914_v12 = vcombine.low %v4594_v59, %v7710_v5  ;;  %v4898_v6 = vcombine.low %v4578_v37, %v5472_v28  ;;  %v2262_v14 = vrot.slane %v4897_v53, 1  ;;  %v7873_v49 = vld [vmem:[%s9168_s0 + $0x80] ss:$0 sps:$4 sm:$0x11]  }
 0x162   :  { %v7769_v18 = vpop.permute.xlu0 %2084  ;;  %v1813_v5 = vsel %vm668_vm0, %v1808_v32, %v1812_v2  ;;  %v2314_v8 = vrot.slane %v7753_v25, 1  ;;  %v2266_v15 = vrot.slane %v7762_v55, 1  ;;  %v7881_v16 = vcombine.low %v4619_v44, %v7855_v20 }
 0x163   :  { %3404 = vrot.lane.b32.xlu1 %v3333_v30, %s5510_s19  ;;  %v2263_v30 = vrot.slane %v7744_v34, 1  ;;  %v7865_v34 = vcombine.low %v4651_v17, %v7838_v22  ;;  %v2313_v19 = vrot.slane %v4914_v12, 1  ;;  %v2265_v63 = vrot.slane %v4898_v6, 1  ;;  %v9405_v6 = vld [vmem:[#allocation81_spill] sm:$0xff] }
 0x164   :  { %3372 = vrot.lane.b32.xlu0 %v3285_v10, %s5510_s19  ;;  %v2312_v10 = vsel %vm1213_vm1, %v2310_v1, %v2311_v61  ;;  %v3014_v4 = vshll.u32 %v7860_v52, 16  ;;  %v2829_v13 = vshll.u32 %v7881_v16, 16  ;;  %v3428_v53 = vsel %vm3422_vm3, %v9401_v3, %v6475_v11  ;;  %v9404_v61 = vld [vmem:[#allocation24_spill] sm:$0xff]  ;;  %v7911_v11 = vld [vmem:[%s9168_s0 + $0x164] ss:$0 sps:$4 sm:$0x11]  }
 0x165   :  { %v7776_v21 = vpop.permute.xlu1 %2370  ;;  %v2264_v41 = vsel %vm1213_vm1, %v2262_v14, %v2263_v30  ;;  %v3021_v7 = vshll.u32 %v7865_v34, 16  ;;  %v2315_v24 = vsel %vm1213_vm1, %v2313_v19, %v2314_v8  ;;  %v2267_v2 = vsel %vm1213_vm1, %v2265_v63, %v2266_v15  ;;  %v9406_v30 = vld [vmem:[#allocation67_spill] sm:$0xff] }
 0x166   :  { %v7784_v35 = vpop.permute.xlu0 %2338  ;;  %v3016_v37 = vrot.slane %v3014_v4, 1  ;;  %v3460_v12 = vsel %vm3422_vm3, %v9404_v61, %v6656_v43  ;;  %v3493_v44 = vsel %vm3487_vm4, %v3428_v53, %v9406_v30  ;;  %v2831_v8 = vrot.slane %v2829_v13, 1 }
 0x167   :  { %1584 = vrot.lane.b32.xlu1 %v4850_v60, %s5505_s23  ;;  %v7822_v60 = vcombine.low %v4649_v40, %v7793_v58  ;;  %v2822_v40 = vshll.u32 %v7873_v49, 16  ;;  %v3023_v17 = vrot.slane %v3021_v7, 1 }
 0x168   :  { %1582 = vrot.lane.b32.xlu0 %v7713_v26, %s5505_s23  ;;  %v4617_v26 = vld [vmem:[%s9168_s0 + $0x78] sm:$0xf] }
 0x169   :  { %v7802_v54 = vpop.permute.xlu1 %2372  ;;  %v7830_v36 = vcombine.low %v4617_v26, %v7814_v39  ;;  %v3009_v47 = vshll.u32 %v7822_v60, 16  ;;  %v3007_v25 = vshrl.u32 %v7822_v60, 16  ;;  %v2824_v43 = vrot.slane %v2822_v40, 1 }
 0x16a   :  { %v7819_v51 = vpop.permute.xlu0 %2340 }
 0x16b   :  { %2126 = vrot.lane.b32.xlu1 %v1993_v31, %s5506_s11  ;;  %v2817_v48 = vshll.u32 %v7830_v36, 16  ;;  %v3011_v27 = vrot.slane %v3009_v47, 1  ;;  %v2815_v55 = vshrl.u32 %v7830_v36, 16  ;;  %v9407_v47 = vld [vmem:[#allocation109_spill] sm:$0xff] }
 0x16c   :  { %2094 = vrot.lane.b32.xlu0 %v1801_v46, %s5506_s11  ;;  %v9402_v46 = vld [vmem:[#allocation7_spill] sm:$0xff] }
 0x16d   :  { %v7843_v56 = vpop.permute.xlu1 %2594  ;;  %v2819_v9 = vrot.slane %v2817_v48, 1  ;;  %v3430_v32 = vsel %vm3422_vm3, %v9402_v46, %v6483_v33  ;;  %v3012_v26 = vor.u32 %v3011_v27, %v3007_v25  ;;  %v3019_v33 = vshrl.u32 %v7865_v34, 16  ;;  %v9408_v48 = vld [vmem:[#allocation80_spill] sm:$0xff]  ;;  %v9411_v46 = vld [vmem:[#allocation94_spill] sm:$0xff] }
 0x16e   :  { %v7850_v42 = vpop.permute.xlu0 %2562  ;;  %v3495_v28 = vsel %vm3487_vm4, %v3430_v32, %v6903_v45  ;;  %v2827_v45 = vshrl.u32 %v7881_v16, 16 }
 0x16f   :  { %2128 = vrot.lane.b32.xlu1 %v2005_v38, %s5506_s11  ;;  %v9403_v38 = vld [vmem:[#allocation23_spill] sm:$0xff]  ;;  %v2820_v14 = vor.u32 %v2819_v9, %v2815_v55  ;;  %v3017_v4 = vsel %vm668_vm0, %v3012_v26, %v3016_v37  ;;  %v3024_v55 = vor.u32 %v3023_v17, %v3019_v33  ;;  %v3026_v9 = vshll.u32 %v7911_v11, 16 }
 0x170   :  { %2096 = vrot.lane.b32.xlu0 %v1813_v5, %s5506_s11  ;;  %v3462_v1 = vsel %vm3422_vm3, %v9403_v38, %v6650_v0  ;;  %v3525_v0 = vsel %vm3487_vm4, %v3460_v12, %v9405_v6  ;;  %v7922_v5 = vld [vmem:[%s9168_s0 + $0x8c] ss:$0 sps:$4 sm:$0x11]   ;;  %v7990_v12 = vld [vmem:[%s9168_s0 + $0x160] sm:$0xf] }
 0x171   :  { %v7876_v57 = vpop.permute.xlu1 %2596  ;;  %v3527_v63 = vsel %vm3487_vm4, %v3462_v1, %v9408_v48 }
 0x172   :  { %v7883_v62 = vpop.permute.xlu0 %2564 }
 0x173   :  { %2382 = vrot.lane.b32.xlu1 %v2312_v10, %s5507_s5  ;;  %v3590_v10 = vsel %vm3552_vm5, %v3525_v0, %v9407_v47 }
 0x174   :  { %2350 = vrot.lane.b32.xlu0 %v2264_v41, %s5507_s5  ;;  %v9409_v41 = vld [vmem:[#allocation95_spill] sm:$0xff]  ;;  %v3655_v25 = vsel %vm3617_vm6, %v3590_v10, %v7737_v50 }
 0x175   :  { %v3139_v31 = vpop.permute.xlu1 %3138  ;;  %v3558_v15 = vsel %vm3552_vm5, %v3493_v44, %v9409_v41  ;;  %v3335_v44 = vrot.slane %v7860_v52, 1  ;;  %v8026_v41 = vld [vmem:[%s9168_s0 + $0x16c] sm:$0xf] }
 0x176   :  { %v3107_v59 = vpop.permute.xlu0 %3106  ;;  %v3623_v7 = vsel %vm3617_vm6, %v3558_v15, %v7746_v23  ;;  %v2825_v23 = vsel %vm668_vm0, %v2820_v14, %v2824_v43  ;;  %v4706_v14 = vld [vmem:[%s9168_s0 + $0x84] sm:$0xe]  ;;  %v3338_v15 = vrot.slane %v7911_v11, 1  ;;  %v8049_v11 = vld [vmem:[%s9168_s0 + $0x8c] ss:$0 sps:$4 sm:$0x11]  }
 0x177   :  { %2384 = vrot.lane.b32.xlu1 %v2315_v24, %s5507_s5  ;;  %v3720_v24 = vsel %vm3682_vm7, %v3655_v25, %v7776_v21  ;;  %v3688_v40 = vsel %vm3682_vm7, %v3623_v7, %v7784_v35  ;;  %v9410_v21 = vld [vmem:[#allocation108_spill] sm:$0xff]  ;;  %v2832_v35 = vor.u32 %v2831_v8, %v2827_v45  ;;  %v3287_v8 = vrot.slane %v7873_v49, 1 }
 0x178   :  { %2352 = vrot.lane.b32.xlu0 %v2267_v2, %s5507_s5  ;;  %v3785_v50 = vsel %vm3747_vm8, %v3720_v24, %v7843_v56  ;;  %v2834_v2 = vshll.u32 %v7922_v5, 16  ;;  %v3592_v13 = vsel %vm3552_vm5, %v3527_v63, %v9410_v21  ;;  %v4721_v56 = vld [vmem:[%s9168_s0 + $0x150] sm:$0xe]  ;;  %v4994_v48 = vcombine.low %v4706_v14, %v7855_v20  ;;  %v4527_v63 = vld [vmem:[%s9168_s0 + $0x168] sm:$0xf] }
 0x179   :  { %v3141_v19 = vpop.permute.xlu1 %3140  ;;  %v3850_v3 = vsel %vm3812_vm9, %v3785_v50, %v3139_v31  ;;  %v3657_v32 = vsel %vm3617_vm6, %v3592_v13, %v7765_v29  ;;  %v4852_v25 = vcombine.low %v4527_v63, %v8026_v41  ;;  %v9413_v21 = vld [vmem:[#allocation45_spill] sm:$0xff] }
 0x17a   :  { %v3109_v27 = vpop.permute.xlu0 %3108  ;;  %v3722_v1 = vsel %vm3682_vm7, %v3657_v32, %v7802_v54  ;;  %v5009_v54 = vcombine.low %v4721_v56, %v7793_v58  ;;  %v2836_v33 = vrot.slane %v2834_v2, 1  ;;  %v4722_v58 = vld [vmem:[%s9168_s0 + $0x15c] sm:$0xe]  ;;  %v1829_v13 = vshll.u32 %v9413_v21, 16 }
 0x17b   :  { %2606 = vrot.lane.b32.xlu1 %v7822_v60, %s5508_s18  ;;  %v3753_v60 = vsel %vm3747_vm8, %v3688_v40, %v7850_v42  ;;  %v4705_v42 = vld [vmem:[%s9168_s0 + $0x78] sm:$0xe]  ;;  %v5010_v47 = vcombine.low %v4722_v58, %v7838_v22  ;;  %v3290_v40 = vrot.slane %v7922_v5, 1  ;;  %v1822_v32 = vshll.u32 %v8049_v11, 16  ;;  %v4596_v58 = vld [vmem:[%s9168_s0 + $0x168] sm:$0xe] }
 0x17c   :  { %2574 = vrot.lane.b32.xlu0 %v7830_v36, %s5508_s18  ;;  %v3560_v36 = vsel %vm3552_vm5, %v3495_v28, %v9411_v46  ;;  %v3818_v26 = vsel %vm3812_vm9, %v3753_v60, %v3107_v59  ;;  %v3787_v59 = vsel %vm3747_vm8, %v3722_v1, %v7876_v57  ;;  %v4993_v17 = vcombine.low %v4705_v42, %v7814_v39 }
 0x17d   :  { %v3395_v53 = vpop.permute.xlu1 %3394  ;;  %v3625_v31 = vsel %vm3617_vm6, %v3560_v36, %v7769_v18  ;;  %v3028_v18 = vrot.slane %v3026_v9, 1  ;;  %v3852_v57 = vsel %vm3812_vm9, %v3787_v59, %v3141_v19  ;;  %v3334_v30 = vrot.slane %v5009_v54, 1 }
 0x17e   :  { %v3915_v37 = vsel %vm3877_vm10, %v3850_v3, %v3395_v53  ;;  %v3363_v38 = vpop.permute.xlu0 %3362  ;;  %v3690_v29 = vsel %vm3682_vm7, %v3625_v31, %v7819_v51  ;;  %v2837_v19 = vsel %vm668_vm0, %v2832_v35, %v2836_v33  ;;  %v3286_v45 = vrot.slane %v4993_v17, 1  ;;  %v8062_v3 = vld [vmem:[%s9168_s0 + $0x170] ss:$0 sps:$4 sm:$0x11]   ;;  %v4580_v17 = vld [vmem:[%s9168_s0 + $0x90] sm:$0xe] }
 0x17f   :  { %v3883_v61 = vsel %vm3877_vm10, %v3818_v26, %v3363_v38  ;;  %2608 = vrot.lane.b32.xlu1 %v7865_v34, %s5508_s18  ;;  %5130 = vmatprep.mubr.msk.bf16.mxu1 %vm3969_vm11, %v3915_v37  ;;  %v4525_v34 = vld [vmem:[%s9168_s0 + $0x15c] sm:$0xf]  ;;  %v3755_v51 = vsel %vm3747_vm8, %v3690_v29, %v7883_v62  ;;  %v3029_v43 = vsel %vm668_vm0, %v3024_v55, %v3028_v18  ;;  %v3337_v20 = vrot.slane %v5010_v47, 1  ;;  %v8072_v26 = vld [vmem:[%s9168_s0 + $0x98] ss:$0 sps:$4 sm:$0x11]  }
 0x180   :  { %2576 = vrot.lane.b32.xlu0 %v7881_v16, %s5508_s18  ;;  %5098 = vmatprep.mubr.msk.bf16.mxu0 %vm3969_vm11, %v3883_v61  ;;  %v3820_v28 = vsel %vm3812_vm9, %v3755_v51, %v3109_v27  ;;  %v8008_v39 = vcombine.low %v4525_v34, %v7990_v12  ;;  %v3336_v49 = vsel %vm1213_vm1, %v3334_v30, %v3335_v44  ;;  %v8039_v27 = vld [vmem:[%s9168_s0 + $0x164] ss:$0 sps:$4 sm:$0x11]   ;;  %v3289_v9 = vrot.slane %v4994_v48, 1  ;;  %v5473_v30 = vld [vmem:[%s9168_s0 + $0x88] sm:$0xf] }
 0x181   :  { %v3397_v16 = vpop.permute.xlu1 %3396  ;;  %v3288_v55 = vsel %vm1213_vm1, %v3286_v45, %v3287_v8  ;;  %v3339_v60 = vsel %vm1213_vm1, %v3337_v20, %v3338_v15  ;;  %v2014_v5 = vshll.u32 %v8039_v27, 16  ;;  %v2021_v53 = vshll.u32 %v4852_v25, 16  ;;  %v5474_v45 = vld [vmem:[%s9168_s0 + $0x94] sm:$0xf] }
 0x182   :  { %v3917_v6 = vsel %vm3877_vm10, %v3852_v57, %v3397_v16  ;;  %v3365_v0 = vpop.permute.xlu0 %3364  ;;  %v2009_v22 = vshll.u32 %v8008_v39, 16  ;;  %v3291_v36 = vsel %vm1213_vm1, %v3289_v9, %v3290_v40  ;;  %v1827_v38 = vshrl.u32 %v9413_v21, 16  ;;  %v4595_v57 = vld [vmem:[%s9168_s0 + $0x15c] sm:$0xe]  ;;  %v4579_v16 = vld [vmem:[%s9168_s0 + $0x84] sm:$0xe] }
 0x183   :  { %v3885_v62 = vsel %vm3877_vm10, %v3820_v28, %v3365_v0  ;;  %3150 = vrot.lane.b32.xlu1 %v3017_v4, %s5509_s1  ;;  %5131 = vmatmul.mubr.msk.bf16.gmra.mrb[4].mxu1 %vm3969_vm11, %v3917_v6  ;;  %v9412_v4 = vld [vmem:[#allocation47_spill] sm:$0xff]  ;;  %v2016_v31 = vrot.slane %v2014_v5, 1  ;;  %v2019_v1 = vshrl.u32 %v4852_v25, 16  ;;  %v2023_v61 = vrot.slane %v2021_v53, 1  ;;  %v8132_v20 = vld [vmem:[%s9168_s0 + $0x94] sm:$0xf] }
 0x184   :  { %3118 = vrot.lane.b32.xlu0 %v2825_v23, %s5509_s1  ;;  %5099 = vmatmul.mubr.msk.bf16.gmra.mrb[4].mxu0 %vm3969_vm11, %v3885_v62  ;;  %v1817_v7 = vshll.u32 %v9412_v4, 16  ;;  %v2007_v23 = vshrl.u32 %v8008_v39, 16  ;;  %v2011_v2 = vrot.slane %v2009_v22, 1  ;;  %v1815_v35 = vshrl.u32 %v9412_v4, 16  ;;  %v4653_v62 = vld [vmem:[%s9168_s0 + $0x168] sm:$0xf] }
 0x185   :  { %v8015_v10 = vpop.permute.xlu1 %2118  ;;  %v2026_v29 = vshll.u32 %v8062_v3, 16  ;;  %v1831_v59 = vrot.slane %v1829_v13, 1  ;;  %v1824_v34 = vrot.slane %v1822_v32, 1  ;;  %v1834_v51 = vshll.u32 %v8072_v26, 16  ;;  %v4655_v13 = vld [vmem:[%s9168_s0 + $0x174] sm:$0xf] }
 0x186   :  { %v8028_v52 = vpop.permute.xlu0 %2086  ;;  %v1819_v56 = vrot.slane %v1817_v7, 1  ;;  %v2012_v42 = vor.u32 %v2011_v2, %v2007_v23  ;;  %v2024_v6 = vor.u32 %v2023_v61, %v2019_v1  ;;  %v4915_v14 = vcombine.low %v4595_v57, %v7990_v12  ;;  %v8162_v5 = vld [vmem:[%s9168_s0 + $0xa0] sm:$0xf]  ;;  %v9416_v32 = vld [vmem:[#allocation28_spill] sm:$0xff]  ;;  %v9418_v61 = vld [vmem:[#allocation50_spill] sm:$0xff] }
 0x187   :  { %3152 = vrot.lane.b32.xlu1 %v3029_v43, %s5509_s1  ;;  %v2028_v0 = vrot.slane %v2026_v29, 1  ;;  %v8108_v43 = vld [vmem:[%s9168_s0 + $0x16c] sm:$0xf]  ;;  %v1836_v12 = vrot.slane %v1834_v51, 1  ;;  %v4900_v8 = vcombine.low %v4580_v17, %v5474_v45  ;;  %v4916_v63 = vcombine.low %v4596_v58, %v8026_v41  ;;  %v9419_v29 = vld [vmem:[#allocation25_spill] sm:$0xff]  ;;  %v9425_v45 = vld [vmem:[#allocation83_spill] sm:$0xff] }
 0x188   :  { %3120 = vrot.lane.b32.xlu0 %v2837_v19, %s5509_s1  ;;  %v1820_v54 = vor.u32 %v1819_v56, %v1815_v35  ;;  %v2017_v28 = vsel %vm668_vm0, %v2012_v42, %v2016_v31  ;;  %v1832_v19 = vor.u32 %v1831_v59, %v1827_v38  ;;  %v8124_v22 = vcombine.low %v4653_v62, %v8108_v43  ;;  %v9414_v35 = vld [vmem:[#allocation27_spill] sm:$0xff]  ;;  %v9415_v56 = vld [vmem:[#allocation9_spill] sm:$0xff]  ;;  %v9417_v38 = vld [vmem:[#allocation10_spill] sm:$0xff] }
 0x189   :  { %v8042_v24 = vpop.permute.xlu1 %2120  ;;  %v2029_v15 = vsel %vm668_vm0, %v2024_v6, %v2028_v0  ;;  %v2317_v41 = vrot.slane %v8039_v27, 1  ;;  %v2269_v9 = vrot.slane %v8049_v11, 1  ;;  %v2271_v40 = vrot.slane %v4900_v8, 1  ;;  %v8152_v27 = vld [vmem:[%s9168_s0 + $0x178] sm:$0xf]  ;;  %v9422_v58 = vld [vmem:[#allocation68_spill] sm:$0xff] }
 0x18a   :  { %v8051_v50 = vpop.permute.xlu0 %2088  ;;  %v1825_v47 = vsel %vm668_vm0, %v1820_v54, %v1824_v34  ;;  %v2319_v2 = vrot.slane %v4916_v63, 1  ;;  %v2320_v11 = vrot.slane %v8062_v3, 1  ;;  %v3033_v53 = vshll.u32 %v8124_v22, 16  ;;  %v8176_v31 = vld [vmem:[%s9168_s0 + $0x170] ss:$0 sps:$4 sm:$0x11]  }
 0x18b   :  { %3406 = vrot.lane.b32.xlu1 %v3336_v49, %s5510_s19  ;;  %v4621_v49 = vld [vmem:[%s9168_s0 + $0x90] sm:$0xf]  ;;  %v3432_v42 = vsel %vm3422_vm3, %v9417_v38, %v9416_v32  ;;  %v8181_v1 = vld [vmem:[%s9168_s0 + $0x98] ss:$0 sps:$4 sm:$0x11]   ;;  %v3466_v59 = vsel %vm3422_vm3, %v9419_v29, %v9418_v61  ;;  %v9420_v54 = vld [vmem:[#allocation52_spill] sm:$0xff]  ;;  %v8196_v62 = vcombine.low %v4655_v13, %v8152_v27 }
 0x18c   :  { %3374 = vrot.lane.b32.xlu0 %v3288_v55, %s5510_s19  ;;  %v1837_v55 = vsel %vm668_vm0, %v1832_v19, %v1836_v12  ;;  %v8144_v21 = vcombine.low %v4621_v49, %v8132_v20  ;;  %v9421_v34 = vld [vmem:[#allocation26_spill] sm:$0xff]  ;;  %v2272_v17 = vrot.slane %v8072_v26, 1  ;;  %v9423_v6 = vld [vmem:[#allocation69_spill] sm:$0xff]  ;;  %v3031_v26 = vshrl.u32 %v8124_v22, 16 }
 0x18d   :  { %v8065_v46 = vpop.permute.xlu1 %2374  ;;  %v3464_v51 = vsel %vm3422_vm3, %v9421_v34, %v9420_v54  ;;  %v3497_v0 = vsel %vm3487_vm4, %v3432_v42, %v9423_v6  ;;  %v3035_v12 = vrot.slane %v3033_v53, 1  ;;  %v2321_v63 = vsel %vm1213_vm1, %v2319_v2, %v2320_v11 }
 0x18e   :  { %v8074_v37 = vpop.permute.xlu0 %2342  ;;  %v3529_v8 = vsel %vm3487_vm4, %v3464_v51, %v9425_v45  ;;  %v3038_v49 = vshll.u32 %v8176_v31, 16  ;;  %v2273_v53 = vsel %vm1213_vm1, %v2271_v40, %v2272_v17  ;;  %v2839_v11 = vshrl.u32 %v8144_v21, 16  ;;  %v8248_v51 = vld [vmem:[%s9168_s0 + $0xa4] ss:$0 sps:$4 sm:$0x11]  }
 0x18f   :  { %3408 = vrot.lane.b32.xlu1 %v3339_v60, %s5510_s19  ;;  %v4623_v60 = vld [vmem:[%s9168_s0 + $0x9c] sm:$0xf]  ;;  %v3036_v42 = vor.u32 %v3035_v12, %v3031_v26 }
 0x190   :  { %3376 = vrot.lane.b32.xlu0 %v3291_v36, %s5510_s19  ;;  %v3434_v36 = vsel %vm3422_vm3, %v9415_v56, %v9414_v35  ;;  %v8203_v19 = vcombine.low %v4623_v60, %v8162_v5  ;;  %v3040_v61 = vrot.slane %v3038_v49, 1 }
 0x191   :  { %v8080_v18 = vpop.permute.xlu1 %2376 }
 0x192   :  { %v8089_v33 = vpop.permute.xlu0 %2344  ;;  %v2853_v40 = vshll.u32 %v8203_v19, 16 }
 0x193   :  { %1588 = vrot.lane.b32.xlu1 %v4852_v25, %s5505_s23  ;;  %v2316_v25 = vrot.slane %v4915_v14, 1 }
 0x194   :  { %1586 = vrot.lane.b32.xlu0 %v8008_v39, %s5505_s23  ;;  %v4899_v39 = vcombine.low %v4579_v16, %v5473_v30  ;;  %v2841_v30 = vshll.u32 %v8144_v21, 16  ;;  %v2855_v26 = vrot.slane %v2853_v40, 1 }
 0x195   :  { %v8113_v44 = vpop.permute.xlu1 %2598  ;;  %v2318_v3 = vsel %vm1213_vm1, %v2316_v25, %v2317_v41  ;;  %v9426_v25 = vld [vmem:[#allocation96_spill] sm:$0xff] }
 0x196   :  { %v8119_v48 = vpop.permute.xlu0 %2566  ;;  %v2268_v4 = vrot.slane %v4899_v39, 1  ;;  %v9424_v39 = vld [vmem:[#allocation82_spill] sm:$0xff]  ;;  %v2843_v56 = vrot.slane %v2841_v30, 1 }
 0x197   :  { %2130 = vrot.lane.b32.xlu1 %v2017_v28, %s5506_s11  ;;  %v3499_v28 = vsel %vm3487_vm4, %v3434_v36, %v9422_v58  ;;  %v3045_v36 = vshll.u32 %v8196_v62, 16 }
 0x198   :  { %2098 = vrot.lane.b32.xlu0 %v1825_v47, %s5506_s11  ;;  %v2270_v16 = vsel %vm1213_vm1, %v2268_v4, %v2269_v9  ;;  %v3531_v47 = vsel %vm3487_vm4, %v3466_v59, %v9424_v39  ;;  %v3564_v41 = vsel %vm3552_vm5, %v3499_v28, %v9426_v25  ;;  %v9427_v4 = vld [vmem:[#allocation97_spill] sm:$0xff]  ;;  %v9428_v9 = vld [vmem:[#allocation111_spill] sm:$0xff]  ;;  %v2844_v6 = vor.u32 %v2843_v56, %v2839_v11 }
 0x199   :  { %v8137_v7 = vpop.permute.xlu1 %2600  ;;  %v3594_v13 = vsel %vm3552_vm5, %v3529_v8, %v9428_v9  ;;  %v4707_v8 = vld [vmem:[%s9168_s0 + $0x90] sm:$0xe]  ;;  %v3341_v11 = vrot.slane %v8176_v31, 1 }
 0x19a   :  { %v8141_v23 = vpop.permute.xlu0 %2568  ;;  %v3659_v35 = vsel %vm3617_vm6, %v3594_v13, %v8015_v10  ;;  %v4995_v13 = vcombine.low %v4707_v8, %v8132_v20 }
 0x19b   :  { %2132 = vrot.lane.b32.xlu1 %v2029_v15, %s5506_s11  ;;  %v2846_v15 = vshll.u32 %v8181_v1, 16  ;;  %v3724_v38 = vsel %vm3682_vm7, %v3659_v35, %v8065_v46  ;;  %v9429_v46 = vld [vmem:[#allocation110_spill] sm:$0xff] }
 0x19c   :  { %2100 = vrot.lane.b32.xlu0 %v1837_v55, %s5506_s11  ;;  %v3562_v55 = vsel %vm3552_vm5, %v3497_v0, %v9427_v4  ;;  %v3596_v59 = vsel %vm3552_vm5, %v3531_v47, %v9429_v46  ;;  %v8344_v46 = vld [vmem:[%s9168_s0 + $0x17c] ss:$0 sps:$4 sm:$0x11]  }
 0x19d   :  { %v3143_v57 = vpop.permute.xlu1 %3142  ;;  %v3627_v32 = vsel %vm3617_vm6, %v3562_v55, %v8028_v52  ;;  %v2848_v29 = vrot.slane %v2846_v15, 1  ;;  %v8237_v52 = vld [vmem:[%s9168_s0 + $0x17c] ss:$0 sps:$4 sm:$0x11]  }
 0x19e   :  { %v3111_v14 = vpop.permute.xlu0 %3110  ;;  %v3692_v10 = vsel %vm3682_vm7, %v3627_v32, %v8074_v37 }
 0x19f   :  { %2386 = vrot.lane.b32.xlu1 %v2318_v3, %s5507_s5  ;;  %v3789_v3 = vsel %vm3747_vm8, %v3724_v38, %v8113_v44  ;;  %v3757_v54 = vsel %vm3747_vm8, %v3692_v10, %v8119_v48  ;;  %v3043_v44 = vshrl.u32 %v8196_v62, 16  ;;  %v3629_v48 = vsel %vm3617_vm6, %v3564_v41, %v8051_v50  ;;  %v4529_v41 = vld [vmem:[%s9168_s0 + $0x174] sm:$0xf]  ;;  %v4531_v10 = vld [vmem:[%s9168_s0 + $0x180] sm:$0xf] }
 0x1a0   :  { %2354 = vrot.lane.b32.xlu0 %v2270_v16, %s5507_s5  ;;  %v3854_v37 = vsel %vm3812_vm9, %v3789_v3, %v3143_v57  ;;  %v3661_v16 = vsel %vm3617_vm6, %v3596_v59, %v8042_v24  ;;  %v3822_v17 = vsel %vm3812_vm9, %v3757_v54, %v3111_v14  ;;  %v3047_v24 = vrot.slane %v3045_v36, 1  ;;  %v8331_v3 = vld [vmem:[%s9168_s0 + $0x184] sm:$0xf] }
 0x1a1   :  { %v3145_v60 = vpop.permute.xlu1 %3144  ;;  %v3726_v57 = vsel %vm3682_vm7, %v3661_v16, %v8080_v18  ;;  %v3694_v14 = vsel %vm3682_vm7, %v3629_v48, %v8089_v33  ;;  %v3050_v50 = vshll.u32 %v8237_v52, 16  ;;  %v2851_v18 = vshrl.u32 %v8203_v19, 16  ;;  %v9430_v59 = vld [vmem:[#allocation51_spill] sm:$0xff] }
 0x1a2   :  { %v3113_v2 = vpop.permute.xlu0 %3112  ;;  %v3791_v30 = vsel %vm3747_vm8, %v3726_v57, %v8137_v7  ;;  %v2858_v33 = vshll.u32 %v8248_v51, 16  ;;  %v4723_v7 = vld [vmem:[%s9168_s0 + $0x168] sm:$0xe]  ;;  %v3048_v49 = vor.u32 %v3047_v24, %v3043_v44  ;;  %v3292_v38 = vrot.slane %v4995_v13, 1 }
 0x1a3   :  { %2388 = vrot.lane.b32.xlu1 %v2321_v63, %s5507_s5  ;;  %v3856_v39 = vsel %vm3812_vm9, %v3791_v30, %v3145_v60  ;;  %v3041_v63 = vsel %vm668_vm0, %v3036_v42, %v3040_v61  ;;  %v3052_v15 = vrot.slane %v3050_v50, 1  ;;  %v5011_v25 = vcombine.low %v4723_v7, %v8108_v43  ;;  %v4724_v43 = vld [vmem:[%s9168_s0 + $0x174] sm:$0xe] }
 0x1a4   :  { %2356 = vrot.lane.b32.xlu0 %v2273_v53, %s5507_s5  ;;  %v2856_v55 = vor.u32 %v2855_v26, %v2851_v18  ;;  %v2860_v9 = vrot.slane %v2858_v33, 1  ;;  %v4708_v53 = vld [vmem:[%s9168_s0 + $0x9c] sm:$0xe]  ;;  %v5012_v56 = vcombine.low %v4724_v43, %v8152_v27  ;;  %v3293_v42 = vrot.slane %v8181_v1, 1 }
 0x1a5   :  { %v3399_v34 = vpop.permute.xlu1 %3398  ;;  %v3340_v20 = vrot.slane %v5011_v25, 1  ;;  %v4996_v40 = vcombine.low %v4708_v53, %v8162_v5  ;;  %v3344_v61 = vrot.slane %v8237_v52, 1  ;;  %v1841_v54 = vshll.u32 %v9430_v59, 16  ;;  %v8354_v52 = vld [vmem:[%s9168_s0 + $0xa4] ss:$0 sps:$4 sm:$0x11]  }
 0x1a6   :  { %v3919_v58 = vsel %vm3877_vm10, %v3854_v37, %v3399_v34  ;;  %v3367_v28 = vpop.permute.xlu0 %3366  ;;  %v2861_v32 = vsel %vm668_vm0, %v2856_v55, %v2860_v9  ;;  %v3343_v5 = vrot.slane %v5012_v56, 1  ;;  %v3294_v34 = vsel %vm1213_vm1, %v3292_v38, %v3293_v42  ;;  %v4597_v25 = vld [vmem:[%s9168_s0 + $0x174] sm:$0xe]  ;;  %v4582_v55 = vld [vmem:[%s9168_s0 + $0xa8] sm:$0xe] }
 0x1a7   :  { %v3887_v0 = vsel %vm3877_vm10, %v3822_v17, %v3367_v28  ;;  %2610 = vrot.lane.b32.xlu1 %v8124_v22, %s5508_s18  ;;  %5134 = vmatprep.mubr.msk.bf16.mxu1 %vm3969_vm11, %v3919_v58  ;;  %v3759_v22 = vsel %vm3747_vm8, %v3694_v14, %v8141_v23  ;;  %v3342_v1 = vsel %vm1213_vm1, %v3340_v20, %v3341_v11  ;;  %v3295_v44 = vrot.slane %v4996_v40, 1  ;;  %v4598_v9 = vld [vmem:[%s9168_s0 + $0x180] sm:$0xe]  ;;  %v8413_v11 = vld [vmem:[%s9168_s0 + $0x184] sm:$0xf] }
 0x1a8   :  { %2578 = vrot.lane.b32.xlu0 %v8144_v21, %s5508_s18  ;;  %5102 = vmatprep.mubr.msk.bf16.mxu0 %vm3969_vm11, %v3887_v0  ;;  %v3824_v21 = vsel %vm3812_vm9, %v3759_v22, %v3113_v2  ;;  %v3053_v2 = vsel %vm668_vm0, %v3048_v49, %v3052_v15  ;;  %v3296_v16 = vrot.slane %v8248_v51, 1  ;;  %v3345_v57 = vsel %vm1213_vm1, %v3343_v5, %v3344_v61  ;;  %v8367_v0 = vld [vmem:[%s9168_s0 + $0x188] ss:$0 sps:$4 sm:$0x11]   ;;  %v4657_v20 = vld [vmem:[%s9168_s0 + $0x180] sm:$0xf] }
 0x1a9   :  { %v3401_v47 = vpop.permute.xlu1 %3400  ;;  %v2038_v51 = vshll.u32 %v8344_v46, 16  ;;  %v1839_v14 = vshrl.u32 %v9430_v59, 16  ;;  %v1843_v30 = vrot.slane %v1841_v54, 1  ;;  %v1846_v22 = vshll.u32 %v8354_v52, 16  ;;  %v5475_v56 = vld [vmem:[%s9168_s0 + $0xa0] sm:$0xf] }
 0x1aa   :  { %v3921_v12 = vsel %vm3877_vm10, %v3856_v39, %v3401_v47  ;;  %v3369_v45 = vpop.permute.xlu0 %3368  ;;  %v3297_v18 = vsel %vm1213_vm1, %v3295_v44, %v3296_v16  ;;  %v8377_v39 = vld [vmem:[%s9168_s0 + $0xb0] ss:$0 sps:$4 sm:$0x11]   ;;  %v5476_v40 = vld [vmem:[%s9168_s0 + $0xac] sm:$0xf]  ;;  %v8429_v5 = vcombine.low %v4657_v20, %v8413_v11 }
 0x1ab   :  { %v3889_v23 = vsel %vm3877_vm10, %v3824_v21, %v3369_v45  ;;  %2612 = vrot.lane.b32.xlu1 %v8196_v62, %s5508_s18  ;;  %5135 = vmatmul.mubr.msk.bf16.gmra.mrb[8].mxu1 %vm3969_vm11, %v3921_v12  ;;  %v8298_v62 = vld [vmem:[%s9168_s0 + $0x178] sm:$0xf]  ;;  %v2040_v7 = vrot.slane %v2038_v51, 1  ;;  %v2050_v45 = vshll.u32 %v8367_v0, 16  ;;  %v1848_v49 = vrot.slane %v1846_v22, 1  ;;  %v9433_v22 = vld [vmem:[#allocation11_spill] sm:$0xff] }
 0x1ac   :  { %2580 = vrot.lane.b32.xlu0 %v8203_v19, %s5508_s18  ;;  %5103 = vmatmul.mubr.msk.bf16.gmra.mrb[8].mxu0 %vm3969_vm11, %v3889_v23  ;;  %v2849_v19 = vsel %vm668_vm0, %v2844_v6, %v2848_v29  ;;  %v8314_v35 = vcombine.low %v4529_v41, %v8298_v62  ;;  %v4854_v29 = vcombine.low %v4531_v10, %v8331_v3  ;;  %v9431_v6 = vld [vmem:[#allocation48_spill] sm:$0xff]  ;;  %v1858_v15 = vshll.u32 %v8377_v39, 16  ;;  %v4581_v41 = vld [vmem:[%s9168_s0 + $0x9c] sm:$0xe] }
 0x1ad   :  { %v8300_v4 = vpop.permute.xlu1 %1580  ;;  %v1853_v48 = vshll.u32 %v9431_v6, 16  ;;  %v1851_v26 = vshrl.u32 %v9431_v6, 16  ;;  %v2052_v53 = vrot.slane %v2050_v45, 1  ;;  %v4902_v10 = vcombine.low %v4582_v55, %v5476_v40  ;;  %v4625_v61 = vld [vmem:[%s9168_s0 + $0xa8] sm:$0xf] }
 0x1ae   :  { %v8307_v60 = vpop.permute.xlu0 %1578  ;;  %v2033_v27 = vshll.u32 %v8314_v35, 16  ;;  %v2031_v58 = vshrl.u32 %v8314_v35, 16  ;;  %v2045_v24 = vshll.u32 %v4854_v29, 16  ;;  %v2043_v21 = vshrl.u32 %v4854_v29, 16  ;;  %v4659_v51 = vld [vmem:[%s9168_s0 + $0x18c] sm:$0xf] }
 0x1af   :  { %3154 = vrot.lane.b32.xlu1 %v3041_v63, %s5509_s1  ;;  %v1855_v8 = vrot.slane %v1853_v48, 1  ;;  %v1844_v63 = vor.u32 %v1843_v30, %v1839_v14  ;;  %v8467_v14 = vld [vmem:[%s9168_s0 + $0xb8] sm:$0xf]  ;;  %v3057_v30 = vshll.u32 %v8429_v5, 16 }
 0x1b0   :  { %3122 = vrot.lane.b32.xlu0 %v2849_v19, %s5509_s1  ;;  %v2035_v28 = vrot.slane %v2033_v27, 1  ;;  %v2047_v12 = vrot.slane %v2045_v24, 1  ;;  %v4627_v24 = vld [vmem:[%s9168_s0 + $0xb4] sm:$0xf] }
 0x1b1   :  { %v8320_v36 = vpop.permute.xlu1 %2122  ;;  %v1849_v38 = vsel %vm668_vm0, %v1844_v63, %v1848_v49  ;;  %v1856_v42 = vor.u32 %v1855_v8, %v1851_v26  ;;  %v8486_v45 = vld [vmem:[%s9168_s0 + $0xb0] ss:$0 sps:$4 sm:$0x11]   ;;  %v8508_v40 = vcombine.low %v4627_v24, %v8467_v14 }
 0x1b2   :  { %v8333_v31 = vpop.permute.xlu0 %2090  ;;  %v2036_v33 = vor.u32 %v2035_v28, %v2031_v58  ;;  %v2048_v43 = vor.u32 %v2047_v12, %v2043_v21  ;;  %v2275_v58 = vrot.slane %v8354_v52, 1  ;;  %v2277_v28 = vrot.slane %v4902_v10, 1  ;;  %v8481_v12 = vld [vmem:[%s9168_s0 + $0x188] ss:$0 sps:$4 sm:$0x11]   ;;  %v9436_v8 = vld [vmem:[#allocation57_spill] sm:$0xff] }
 0x1b3   :  { %3156 = vrot.lane.b32.xlu1 %v3053_v2, %s5509_s1  ;;  %v4917_v2 = vcombine.low %v4597_v25, %v8298_v62  ;;  %v1860_v62 = vrot.slane %v1858_v15, 1  ;;  %v2326_v52 = vrot.slane %v8367_v0, 1  ;;  %v9437_v63 = vld [vmem:[#allocation29_spill] sm:$0xff]  ;;  %v9438_v15 = vld [vmem:[#allocation58_spill] sm:$0xff]  ;;  %v9439_v25 = vld [vmem:[#allocation31_spill] sm:$0xff]  ;;  %v3059_v10 = vrot.slane %v3057_v30, 1 }
 0x1b4   :  { %3124 = vrot.lane.b32.xlu0 %v2861_v32, %s5509_s1  ;;  %v2041_v13 = vsel %vm668_vm0, %v2036_v33, %v2040_v7  ;;  %v2053_v59 = vsel %vm668_vm0, %v2048_v43, %v2052_v53  ;;  %v9434_v33 = vld [vmem:[#allocation32_spill] sm:$0xff]  ;;  %v3470_v49 = vsel %vm3422_vm3, %v9437_v63, %v9436_v8  ;;  %v9440_v43 = vld [vmem:[#allocation70_spill] sm:$0xff] }
 0x1b5   :  { %v8347_v37 = vpop.permute.xlu1 %2124  ;;  %v2322_v54 = vrot.slane %v4917_v2, 1  ;;  %v1861_v16 = vsel %vm668_vm0, %v1856_v42, %v1860_v62  ;;  %v9435_v7 = vld [vmem:[#allocation12_spill] sm:$0xff]  ;;  %v9441_v2 = vld [vmem:[#allocation71_spill] sm:$0xff] }
 0x1b6   :  { %v8356_v17 = vpop.permute.xlu0 %2092  ;;  %v3436_v21 = vsel %vm3422_vm3, %v9435_v7, %v9434_v33  ;;  %v9442_v42 = vld [vmem:[#allocation84_spill] sm:$0xff] }
 0x1b7   :  { %3410 = vrot.lane.b32.xlu1 %v3342_v1, %s5510_s19  ;;  %v4918_v1 = vcombine.low %v4598_v9, %v8331_v3  ;;  %v2323_v3 = vrot.slane %v8344_v46, 1  ;;  %v8457_v46 = vld [vmem:[%s9168_s0 + $0x190] sm:$0xf]  ;;  %v3501_v20 = vsel %vm3487_vm4, %v3436_v21, %v9441_v2  ;;  %v3535_v62 = vsel %vm3487_vm4, %v3470_v49, %v9442_v42 }
 0x1b8   :  { %3378 = vrot.lane.b32.xlu0 %v3294_v34, %s5510_s19 }
 0x1b9   :  { %v8370_v50 = vpop.permute.xlu1 %2378  ;;  %v2325_v48 = vrot.slane %v4918_v1, 1  ;;  %v2324_v0 = vsel %vm1213_vm1, %v2322_v54, %v2323_v3  ;;  %v9443_v1 = vld [vmem:[#allocation85_spill] sm:$0xff]  ;;  %v3062_v54 = vshll.u32 %v8481_v12, 16  ;;  %v2870_v3 = vshll.u32 %v8486_v45, 16 }
 0x1ba   :  { %v8379_v47 = vpop.permute.xlu0 %2346 }
 0x1bb   :  { %3412 = vrot.lane.b32.xlu1 %v3345_v57, %s5510_s19  ;;  %v3064_v8 = vrot.slane %v3062_v54, 1  ;;  %v2872_v63 = vrot.slane %v2870_v3, 1  ;;  %v4533_v3 = vld [vmem:[%s9168_s0 + $0x18c] sm:$0xf] }
 0x1bc   :  { %3380 = vrot.lane.b32.xlu0 %v3297_v18, %s5510_s19  ;;  %v9432_v18 = vld [vmem:[#allocation30_spill] sm:$0xff] }
 0x1bd   :  { %v8385_v23 = vpop.permute.xlu1 %2380  ;;  %v3438_v26 = vsel %vm3422_vm3, %v9433_v22, %v9432_v18 }
 0x1be   :  { %v8394_v19 = vpop.permute.xlu0 %2348  ;;  %v3503_v53 = vsel %vm3487_vm4, %v3438_v26, %v9440_v43 }
 0x1bf   :  { %1592 = vrot.lane.b32.xlu1 %v4854_v29, %s5505_s23  ;;  %v8437_v29 = vld [vmem:[%s9168_s0 + $0xac] sm:$0xf] }
 0x1c0   :  { %1590 = vrot.lane.b32.xlu0 %v8314_v35, %s5505_s23  ;;  %v4901_v35 = vcombine.low %v4581_v41, %v5475_v56  ;;  %v8449_v57 = vcombine.low %v4625_v61, %v8437_v29  ;;  %v3468_v41 = vsel %vm3422_vm3, %v9439_v25, %v9438_v15  ;;  %v8553_v25 = vld [vmem:[%s9168_s0 + $0xbc] ss:$0 sps:$4 sm:$0x11]  }
 0x1c1   :  { %v8418_v32 = vpop.permute.xlu1 %2602  ;;  %v3533_v61 = vsel %vm3487_vm4, %v3468_v41, %v9443_v1 }
 0x1c2   :  { %v8424_v27 = vpop.permute.xlu0 %2570  ;;  %v2274_v34 = vrot.slane %v4901_v35, 1  ;;  %v8501_v35 = vcombine.low %v4659_v51, %v8457_v46  ;;  %v3598_v24 = vsel %vm3552_vm5, %v3533_v61, %v8307_v60 }
 0x1c3   :  { %2134 = vrot.lane.b32.xlu1 %v2041_v13, %s5506_s11  ;;  %v2278_v13 = vrot.slane %v8377_v39, 1  ;;  %v3055_v39 = vshrl.u32 %v8429_v5, 16  ;;  %v3663_v22 = vsel %vm3617_vm6, %v3598_v24, %v8320_v36 }
 0x1c4   :  { %2102 = vrot.lane.b32.xlu0 %v1849_v38, %s5506_s11  ;;  %v2276_v9 = vsel %vm1213_vm1, %v2274_v34, %v2275_v58  ;;  %v2865_v38 = vshll.u32 %v8449_v57, 16  ;;  %v9444_v34 = vld [vmem:[#allocation98_spill] sm:$0xff]  ;;  %v9445_v58 = vld [vmem:[#allocation99_spill] sm:$0xff]  ;;  %v3069_v33 = vshll.u32 %v8501_v35, 16  ;;  %v3728_v21 = vsel %vm3682_vm7, %v3663_v22, %v8370_v50 }
 0x1c5   :  { %v8442_v44 = vpop.permute.xlu1 %2604  ;;  %v3566_v51 = vsel %vm3552_vm5, %v3501_v20, %v9445_v58  ;;  %v2279_v18 = vsel %vm1213_vm1, %v2277_v28, %v2278_v13  ;;  %v3060_v60 = vor.u32 %v3059_v10, %v3055_v39  ;;  %v2877_v28 = vshll.u32 %v8508_v40, 16  ;;  %v4709_v10 = vld [vmem:[%s9168_s0 + $0xa8] sm:$0xe] }
 0x1c6   :  { %v8446_v6 = vpop.permute.xlu0 %2572  ;;  %v2867_v26 = vrot.slane %v2865_v38, 1  ;;  %v3631_v7 = vsel %vm3617_vm6, %v3566_v51, %v8333_v31  ;;  %v8542_v31 = vld [vmem:[%s9168_s0 + $0x194] ss:$0 sps:$4 sm:$0x11]   ;;  %v3600_v50 = vsel %vm3552_vm5, %v3535_v62, %v8300_v4  ;;  %v4997_v51 = vcombine.low %v4709_v10, %v8437_v29 }
 0x1c7   :  { %2136 = vrot.lane.b32.xlu1 %v2053_v59, %s5506_s11  ;;  %v2327_v59 = vsel %vm1213_vm1, %v2325_v48, %v2326_v52  ;;  %v2863_v52 = vshrl.u32 %v8449_v57, 16  ;;  %v3696_v36 = vsel %vm3682_vm7, %v3631_v7, %v8379_v47  ;;  %v3665_v41 = vsel %vm3617_vm6, %v3600_v50, %v8347_v37  ;;  %v9446_v50 = vld [vmem:[#allocation56_spill] sm:$0xff] }
 0x1c8   :  { %2104 = vrot.lane.b32.xlu0 %v1861_v16, %s5506_s11  ;;  %v3568_v16 = vsel %vm3552_vm5, %v3503_v53, %v9444_v34  ;;  %v3761_v49 = vsel %vm3747_vm8, %v3696_v36, %v8424_v27  ;;  %v3071_v37 = vrot.slane %v3069_v33, 1  ;;  %v2879_v42 = vrot.slane %v2877_v28, 1  ;;  %v4535_v28 = vld [vmem:[%s9168_s0 + $0x198] sm:$0xf]  ;;  %v8636_v36 = vld [vmem:[%s9168_s0 + $0x19c] sm:$0xf] }
 0x1c9   :  { %v3147_v55 = vpop.permute.xlu1 %3146  ;;  %v2868_v43 = vor.u32 %v2867_v26, %v2863_v52  ;;  %v3633_v27 = vsel %vm3617_vm6, %v3568_v16, %v8356_v17  ;;  %v3074_v17 = vshll.u32 %v8542_v31, 16  ;;  %v3065_v1 = vsel %vm668_vm0, %v3060_v60, %v3064_v8 }
 0x1ca   :  { %v3115_v56 = vpop.permute.xlu0 %3114  ;;  %v3698_v2 = vsel %vm3682_vm7, %v3633_v27, %v8394_v19  ;;  %v2882_v19 = vshll.u32 %v8553_v25, 16  ;;  %v3298_v7 = vrot.slane %v4997_v51, 1  ;;  %v4856_v8 = vcombine.low %v4535_v28, %v8636_v36 }
 0x1cb   :  { %2390 = vrot.lane.b32.xlu1 %v2324_v0, %s5507_s5  ;;  %v3793_v0 = vsel %vm3747_vm8, %v3728_v21, %v8418_v32  ;;  %v3067_v32 = vshrl.u32 %v8501_v35, 16  ;;  %v3299_v21 = vrot.slane %v8486_v45, 1 }
 0x1cc   :  { %2358 = vrot.lane.b32.xlu0 %v2276_v9, %s5507_s5  ;;  %v3858_v47 = vsel %vm3812_vm9, %v3793_v0, %v3147_v55  ;;  %v3826_v9 = vsel %vm3812_vm9, %v3761_v49, %v3115_v56  ;;  %v3730_v55 = vsel %vm3682_vm7, %v3665_v41, %v8385_v23  ;;  %v2875_v23 = vshrl.u32 %v8508_v40, 16 }
 0x1cd   :  { %v3149_v30 = vpop.permute.xlu1 %3148  ;;  %v3795_v20 = vsel %vm3747_vm8, %v3730_v55, %v8442_v44  ;;  %v4725_v44 = vld [vmem:[%s9168_s0 + $0x180] sm:$0xe]  ;;  %v3072_v61 = vor.u32 %v3071_v37, %v3067_v32  ;;  %v2884_v58 = vrot.slane %v2882_v19, 1  ;;  %v3350_v0 = vrot.slane %v8542_v31, 1 }
 0x1ce   :  { %v3117_v48 = vpop.permute.xlu0 %3116  ;;  %v3860_v56 = vsel %vm3812_vm9, %v3795_v20, %v3149_v30  ;;  %v5013_v54 = vcombine.low %v4725_v44, %v8413_v11  ;;  %v2880_v16 = vor.u32 %v2879_v42, %v2875_v23  ;;  %v4726_v11 = vld [vmem:[%s9168_s0 + $0x18c] sm:$0xe]  ;;  %v4710_v30 = vld [vmem:[%s9168_s0 + $0xb4] sm:$0xe]  ;;  %v1865_v49 = vshll.u32 %v9446_v50, 16 }
 0x1cf   :  { %2392 = vrot.lane.b32.xlu1 %v2327_v59, %s5507_s5  ;;  %v3076_v59 = vrot.slane %v3074_v17, 1  ;;  %v5014_v52 = vcombine.low %v4726_v11, %v8457_v46  ;;  %v4998_v60 = vcombine.low %v4710_v30, %v8467_v14  ;;  %v3302_v41 = vrot.slane %v8553_v25, 1  ;;  %v8659_v31 = vld [vmem:[%s9168_s0 + $0xbc] ss:$0 sps:$4 sm:$0x11]  }
 0x1d0   :  { %2360 = vrot.lane.b32.xlu0 %v2279_v18, %s5507_s5  ;;  %v3346_v29 = vrot.slane %v5013_v54, 1  ;;  %v2885_v33 = vsel %vm668_vm0, %v2880_v16, %v2884_v58  ;;  %v2069_v37 = vshll.u32 %v4856_v8, 16  ;;  %v1867_v20 = vrot.slane %v1865_v49, 1  ;;  %v4599_v54 = vld [vmem:[%s9168_s0 + $0x18c] sm:$0xe] }
 0x1d1   :  { %v3403_v15 = vpop.permute.xlu1 %3402  ;;  %v3077_v22 = vsel %vm668_vm0, %v3072_v61, %v3076_v59  ;;  %v3349_v14 = vrot.slane %v5014_v52, 1  ;;  %v3301_v32 = vrot.slane %v4998_v60, 1  ;;  %v4584_v16 = vld [vmem:[%s9168_s0 + $0xc0] sm:$0xe]  ;;  %v4600_v58 = vld [vmem:[%s9168_s0 + $0x198] sm:$0xe] }
 0x1d2   :  { %v3923_v4 = vsel %vm3877_vm10, %v3858_v47, %v3403_v15  ;;  %v3371_v13 = vpop.permute.xlu0 %3370  ;;  %v3300_v15 = vsel %vm1213_vm1, %v3298_v7, %v3299_v21  ;;  %v5477_v52 = vld [vmem:[%s9168_s0 + $0xb8] sm:$0xf]  ;;  %v5478_v60 = vld [vmem:[%s9168_s0 + $0xc4] sm:$0xf] }
 0x1d3   :  { %v3891_v53 = vsel %vm3877_vm10, %v3826_v9, %v3371_v13  ;;  %2614 = vrot.lane.b32.xlu1 %v8429_v5, %s5508_s18  ;;  %5138 = vmatprep.mubr.msk.bf16.mxu1 %vm3969_vm11, %v3923_v4  ;;  %v3763_v5 = vsel %vm3747_vm8, %v3698_v2, %v8446_v6  ;;  %v3351_v55 = vsel %vm1213_vm1, %v3349_v14, %v3350_v0  ;;  %v1863_v2 = vshrl.u32 %v9446_v50, 16  ;;  %v4629_v0 = vld [vmem:[%s9168_s0 + $0xc0] sm:$0xf] }
 0x1d4   :  { %2582 = vrot.lane.b32.xlu0 %v8449_v57, %s5508_s18  ;;  %5106 = vmatprep.mubr.msk.bf16.mxu0 %vm3969_vm11, %v3891_v53  ;;  %v3828_v57 = vsel %vm3812_vm9, %v3763_v5, %v3117_v48  ;;  %v3347_v48 = vrot.slane %v8481_v12, 1  ;;  %v8672_v53 = vld [vmem:[%s9168_s0 + $0x1a0] ss:$0 sps:$4 sm:$0x11]   ;;  %v3303_v23 = vsel %vm1213_vm1, %v3301_v32, %v3302_v41  ;;  %v1870_v5 = vshll.u32 %v8659_v31, 16 }
 0x1d5   :  { %v3405_v38 = vpop.permute.xlu1 %3404  ;;  %v4904_v28 = vcombine.low %v4584_v16, %v5478_v60 }
 0x1d6   :  { %v3925_v62 = vsel %vm3877_vm10, %v3860_v56, %v3405_v38  ;;  %v3373_v39 = vpop.permute.xlu0 %3372  ;;  %v3348_v45 = vsel %vm1213_vm1, %v3346_v29, %v3347_v48  ;;  %v8682_v56 = vld [vmem:[%s9168_s0 + $0xc8] ss:$0 sps:$4 sm:$0x11]   ;;  %v1872_v61 = vrot.slane %v1870_v5, 1  ;;  %v4661_v29 = vld [vmem:[%s9168_s0 + $0x198] sm:$0xf] }
 0x1d7   :  { %v3893_v6 = vsel %vm3877_vm10, %v3828_v57, %v3373_v39  ;;  %2616 = vrot.lane.b32.xlu1 %v8501_v35, %s5508_s18  ;;  %5139 = vmatmul.mubr.msk.bf16.gmra.mrb[12].mxu1 %vm3969_vm11, %v3925_v62  ;;  %v8603_v35 = vld [vmem:[%s9168_s0 + $0x190] sm:$0xf]  ;;  %v2067_v57 = vshrl.u32 %v4856_v8, 16  ;;  %v2071_v62 = vrot.slane %v2069_v37, 1  ;;  %v2074_v39 = vshll.u32 %v8672_v53, 16 }
 0x1d8   :  { %2584 = vrot.lane.b32.xlu0 %v8508_v40, %s5508_s18  ;;  %5107 = vmatmul.mubr.msk.bf16.gmra.mrb[12].mxu0 %vm3969_vm11, %v3893_v6  ;;  %v2873_v40 = vsel %vm668_vm0, %v2868_v43, %v2872_v63  ;;  %v8619_v18 = vcombine.low %v4533_v3, %v8603_v35  ;;  %v8649_v63 = vld [vmem:[%s9168_s0 + $0x194] ss:$0 sps:$4 sm:$0x11]   ;;  %v9447_v43 = vld [vmem:[#allocation54_spill] sm:$0xff]  ;;  %v1882_v59 = vshll.u32 %v8682_v56, 16 }
 0x1d9   :  { %v8605_v34 = vpop.permute.xlu1 %1584  ;;  %v1877_v27 = vshll.u32 %v9447_v43, 16  ;;  %v2062_v25 = vshll.u32 %v8649_v63, 16  ;;  %v1875_v42 = vshrl.u32 %v9447_v43, 16  ;;  %v4583_v3 = vld [vmem:[%s9168_s0 + $0xb4] sm:$0xe]  ;;  %v2072_v11 = vor.u32 %v2071_v62, %v2067_v57 }
 0x1da   :  { %v8612_v24 = vpop.permute.xlu0 %1582  ;;  %v2057_v46 = vshll.u32 %v8619_v18, 16  ;;  %v2055_v4 = vshrl.u32 %v8619_v18, 16  ;;  %v2076_v30 = vrot.slane %v2074_v39, 1  ;;  %v8718_v48 = vld [vmem:[%s9168_s0 + $0x19c] sm:$0xf]  ;;  %v9449_v5 = vld [vmem:[#allocation13_spill] sm:$0xff] }
 0x1db   :  { %3158 = vrot.lane.b32.xlu1 %v3065_v1, %s5509_s1  ;;  %v2064_v44 = vrot.slane %v2062_v25, 1  ;;  %v1879_v10 = vrot.slane %v1877_v27, 1  ;;  %v1868_v1 = vor.u32 %v1867_v20, %v1863_v2  ;;  %v8734_v14 = vcombine.low %v4661_v29, %v8718_v48  ;;  %v4663_v25 = vld [vmem:[%s9168_s0 + $0x1a4] sm:$0xf]  ;;  %v4631_v37 = vld [vmem:[%s9168_s0 + $0xcc] sm:$0xf] }
 0x1dc   :  { %3126 = vrot.lane.b32.xlu0 %v2873_v40, %s5509_s1  ;;  %v2059_v13 = vrot.slane %v2057_v46, 1  ;;  %v2077_v50 = vsel %vm668_vm0, %v2072_v11, %v2076_v30  ;;  %v8772_v2 = vld [vmem:[%s9168_s0 + $0xd0] sm:$0xf]  ;;  %v8786_v62 = vld [vmem:[%s9168_s0 + $0x1a0] ss:$0 sps:$4 sm:$0x11]  }
 0x1dd   :  { %v8625_v26 = vpop.permute.xlu1 %2126  ;;  %v1873_v7 = vsel %vm668_vm0, %v1868_v1, %v1872_v61  ;;  %v1880_v21 = vor.u32 %v1879_v10, %v1875_v42  ;;  %v3081_v20 = vshll.u32 %v8734_v14, 16  ;;  %v8791_v39 = vld [vmem:[%s9168_s0 + $0xc8] ss:$0 sps:$4 sm:$0x11]   ;;  %v9452_v10 = vld [vmem:[#allocation59_spill] sm:$0xff]  ;;  %v9453_v1 = vld [vmem:[#allocation34_spill] sm:$0xff]  ;;  %v8813_v60 = vcombine.low %v4631_v37, %v8772_v2 }
 0x1de   :  { %v8638_v12 = vpop.permute.xlu0 %2094  ;;  %v2060_v19 = vor.u32 %v2059_v13, %v2055_v4  ;;  %v2281_v4 = vrot.slane %v8659_v31, 1  ;;  %v2283_v13 = vrot.slane %v4904_v28, 1  ;;  %v2332_v31 = vrot.slane %v8672_v53, 1  ;;  %v9456_v11 = vld [vmem:[#allocation72_spill] sm:$0xff] }
 0x1df   :  { %3160 = vrot.lane.b32.xlu1 %v3077_v22, %s5509_s1  ;;  %v4919_v22 = vcombine.low %v4599_v54, %v8603_v35  ;;  %v1884_v35 = vrot.slane %v1882_v59, 1  ;;  %v3474_v61 = vsel %vm3422_vm3, %v9453_v1, %v9452_v10  ;;  %v9454_v59 = vld [vmem:[#allocation60_spill] sm:$0xff]  ;;  %v9455_v54 = vld [vmem:[#allocation37_spill] sm:$0xff]  ;;  %v3083_v28 = vrot.slane %v3081_v20, 1 }
 0x1e0   :  { %3128 = vrot.lane.b32.xlu0 %v2885_v33, %s5509_s1  ;;  %v2065_v51 = vsel %vm668_vm0, %v2060_v19, %v2064_v44  ;;  %v9450_v19 = vld [vmem:[#allocation35_spill] sm:$0xff]  ;;  %v9451_v44 = vld [vmem:[#allocation14_spill] sm:$0xff] }
 0x1e1   :  { %v8652_v47 = vpop.permute.xlu1 %2128  ;;  %v2328_v49 = vrot.slane %v4919_v22, 1  ;;  %v1885_v41 = vsel %vm668_vm0, %v1880_v21, %v1884_v35  ;;  %v3440_v57 = vsel %vm3422_vm3, %v9451_v44, %v9450_v19  ;;  %v9457_v22 = vld [vmem:[#allocation73_spill] sm:$0xff]  ;;  %v9458_v21 = vld [vmem:[#allocation86_spill] sm:$0xff] }
 0x1e2   :  { %v8661_v9 = vpop.permute.xlu0 %2096  ;;  %v3505_v29 = vsel %vm3487_vm4, %v3440_v57, %v9457_v22  ;;  %v3539_v35 = vsel %vm3487_vm4, %v3474_v61, %v9458_v21 }
 0x1e3   :  { %3414 = vrot.lane.b32.xlu1 %v3348_v45, %s5510_s19  ;;  %v4920_v45 = vcombine.low %v4600_v58, %v8636_v36  ;;  %v2329_v36 = vrot.slane %v8649_v63, 1  ;;  %v8762_v63 = vld [vmem:[%s9168_s0 + $0x1a8] sm:$0xf] }
 0x1e4   :  { %3382 = vrot.lane.b32.xlu0 %v3300_v15, %s5510_s19 }
 0x1e5   :  { %v8675_v17 = vpop.permute.xlu1 %2382  ;;  %v2331_v27 = vrot.slane %v4920_v45, 1  ;;  %v2330_v53 = vsel %vm1213_vm1, %v2328_v49, %v2329_v36  ;;  %v9459_v45 = vld [vmem:[#allocation87_spill] sm:$0xff]  ;;  %v3086_v49 = vshll.u32 %v8786_v62, 16  ;;  %v2894_v36 = vshll.u32 %v8791_v39, 16 }
 0x1e6   :  { %v8684_v38 = vpop.permute.xlu0 %2350 }
 0x1e7   :  { %3416 = vrot.lane.b32.xlu1 %v3351_v55, %s5510_s19  ;;  %v3088_v10 = vrot.slane %v3086_v49, 1  ;;  %v2896_v1 = vrot.slane %v2894_v36, 1 }
 0x1e8   :  { %3384 = vrot.lane.b32.xlu0 %v3303_v23, %s5510_s19  ;;  %v9448_v23 = vld [vmem:[#allocation33_spill] sm:$0xff] }
 0x1e9   :  { %v8690_v6 = vpop.permute.xlu1 %2384  ;;  %v3442_v42 = vsel %vm3422_vm3, %v9449_v5, %v9448_v23 }
 0x1ea   :  { %v8699_v40 = vpop.permute.xlu0 %2352  ;;  %v3507_v30 = vsel %vm3487_vm4, %v3442_v42, %v9456_v11 }
 0x1eb   :  { %1596 = vrot.lane.b32.xlu1 %v4856_v8, %s5505_s23  ;;  %v8742_v8 = vld [vmem:[%s9168_s0 + $0xc4] sm:$0xf] }
 0x1ec   :  { %1594 = vrot.lane.b32.xlu0 %v8619_v18, %s5505_s23  ;;  %v4903_v18 = vcombine.low %v4583_v3, %v5477_v52  ;;  %v8754_v55 = vcombine.low %v4629_v0, %v8742_v8  ;;  %v3472_v3 = vsel %vm3422_vm3, %v9455_v54, %v9454_v59  ;;  %v8858_v54 = vld [vmem:[%s9168_s0 + $0xd4] ss:$0 sps:$4 sm:$0x11]  }
 0x1ed   :  { %v8723_v33 = vpop.permute.xlu1 %2606  ;;  %v3537_v0 = vsel %vm3487_vm4, %v3472_v3, %v9459_v45 }
 0x1ee   :  { %v8729_v46 = vpop.permute.xlu0 %2574  ;;  %v2280_v15 = vrot.slane %v4903_v18, 1  ;;  %v8806_v18 = vcombine.low %v4663_v25, %v8762_v63  ;;  %v3602_v37 = vsel %vm3552_vm5, %v3537_v0, %v8612_v24 }
 0x1ef   :  { %2138 = vrot.lane.b32.xlu1 %v2065_v51, %s5506_s11  ;;  %v2284_v51 = vrot.slane %v8682_v56, 1  ;;  %v3079_v56 = vshrl.u32 %v8734_v14, 16  ;;  %v3667_v5 = vsel %vm3617_vm6, %v3602_v37, %v8625_v26  ;;  %v4712_v37 = vld [vmem:[%s9168_s0 + $0xcc] sm:$0xe] }
 0x1f0   :  { %2106 = vrot.lane.b32.xlu0 %v1873_v7, %s5506_s11  ;;  %v2282_v58 = vsel %vm1213_vm1, %v2280_v15, %v2281_v4  ;;  %v2889_v7 = vshll.u32 %v8754_v55, 16  ;;  %v9460_v15 = vld [vmem:[#allocation100_spill] sm:$0xff]  ;;  %v9461_v4 = vld [vmem:[#allocation101_spill] sm:$0xff]  ;;  %v3093_v19 = vshll.u32 %v8806_v18, 16  ;;  %v3732_v57 = vsel %vm3682_vm7, %v3667_v5, %v8675_v17 }
 0x1f1   :  { %v8747_v32 = vpop.permute.xlu1 %2608  ;;  %v3570_v25 = vsel %vm3552_vm5, %v3505_v29, %v9461_v4  ;;  %v2285_v23 = vsel %vm1213_vm1, %v2283_v13, %v2284_v51  ;;  %v3084_v24 = vor.u32 %v3083_v28, %v3079_v56  ;;  %v2901_v13 = vshll.u32 %v8813_v60, 16  ;;  %v4711_v28 = vld [vmem:[%s9168_s0 + $0xc0] sm:$0xe] }
 0x1f2   :  { %v8751_v43 = vpop.permute.xlu0 %2576  ;;  %v2891_v42 = vrot.slane %v2889_v7, 1  ;;  %v3635_v44 = vsel %vm3617_vm6, %v3570_v25, %v8638_v12  ;;  %v8847_v12 = vld [vmem:[%s9168_s0 + $0x1ac] ss:$0 sps:$4 sm:$0x11]   ;;  %v3604_v17 = vsel %vm3552_vm5, %v3539_v35, %v8605_v34 }
 0x1f3   :  { %2140 = vrot.lane.b32.xlu1 %v2077_v50, %s5506_s11  ;;  %v2333_v50 = vsel %vm1213_vm1, %v2331_v27, %v2332_v31  ;;  %v2887_v31 = vshrl.u32 %v8754_v55, 16  ;;  %v3700_v26 = vsel %vm3682_vm7, %v3635_v44, %v8684_v38  ;;  %v3669_v3 = vsel %vm3617_vm6, %v3604_v17, %v8652_v47 }
 0x1f4   :  { %2108 = vrot.lane.b32.xlu0 %v1885_v41, %s5506_s11  ;;  %v3572_v41 = vsel %vm3552_vm5, %v3507_v30, %v9460_v15  ;;  %v3765_v61 = vsel %vm3747_vm8, %v3700_v26, %v8729_v46  ;;  %v3095_v47 = vrot.slane %v3093_v19, 1  ;;  %v2903_v21 = vrot.slane %v2901_v13, 1 }
 0x1f5   :  { %v3151_v16 = vpop.permute.xlu1 %3150  ;;  %v2892_v11 = vor.u32 %v2891_v42, %v2887_v31  ;;  %v3637_v46 = vsel %vm3617_vm6, %v3572_v41, %v8661_v9  ;;  %v3098_v9 = vshll.u32 %v8847_v12, 16  ;;  %v3089_v45 = vsel %vm668_vm0, %v3084_v24, %v3088_v10 }
 0x1f6   :  { %v3119_v52 = vpop.permute.xlu0 %3118  ;;  %v3702_v22 = vsel %vm3682_vm7, %v3637_v46, %v8699_v40  ;;  %v2906_v40 = vshll.u32 %v8858_v54, 16  ;;  %v3305_v42 = vrot.slane %v8791_v39, 1  ;;  %v5000_v19 = vcombine.low %v4712_v37, %v8772_v2  ;;  %v9464_v46 = vld [vmem:[#allocation38_spill] sm:$0xff] }
 0x1f7   :  { %2394 = vrot.lane.b32.xlu1 %v2330_v53, %s5507_s5  ;;  %v3797_v53 = vsel %vm3747_vm8, %v3732_v57, %v8723_v33  ;;  %v3091_v33 = vshrl.u32 %v8806_v18, 16  ;;  %v2897_v15 = vsel %vm668_vm0, %v2892_v11, %v2896_v1 }
 0x1f8   :  { %2362 = vrot.lane.b32.xlu0 %v2282_v58, %s5507_s5  ;;  %v3862_v38 = vsel %vm3812_vm9, %v3797_v53, %v3151_v16  ;;  %v3830_v58 = vsel %vm3812_vm9, %v3765_v61, %v3119_v52  ;;  %v3734_v16 = vsel %vm3682_vm7, %v3669_v3, %v8690_v6  ;;  %v2899_v6 = vshrl.u32 %v8813_v60, 16 }
 0x1f9   :  { %v3153_v20 = vpop.permute.xlu1 %3152  ;;  %v3799_v29 = vsel %vm3747_vm8, %v3734_v16, %v8747_v32  ;;  %v4727_v32 = vld [vmem:[%s9168_s0 + $0x198] sm:$0xe]  ;;  %v3096_v0 = vor.u32 %v3095_v47, %v3091_v33  ;;  %v2908_v4 = vrot.slane %v2906_v40, 1  ;;  %v3307_v26 = vrot.slane %v5000_v19, 1  ;;  %v9465_v16 = vld [vmem:[#allocation16_spill] sm:$0xff]  ;;  %v9466_v47 = vld [vmem:[#allocation89_spill] sm:$0xff] }
 0x1fa   :  { %v3121_v27 = vpop.permute.xlu0 %3120  ;;  %v3864_v52 = vsel %vm3812_vm9, %v3799_v29, %v3153_v20  ;;  %v5015_v49 = vcombine.low %v4727_v32, %v8718_v48  ;;  %v2904_v41 = vor.u32 %v2903_v21, %v2899_v6  ;;  %v3308_v53 = vrot.slane %v8858_v54, 1  ;;  %v9467_v29 = vld [vmem:[#allocation75_spill] sm:$0xff]  ;;  %v9469_v32 = vld [vmem:[#allocation61_spill] sm:$0xff] }
 0x1fb   :  { %2396 = vrot.lane.b32.xlu1 %v2333_v50, %s5507_s5  ;;  %v3100_v50 = vrot.slane %v3098_v9, 1 }
 0x1fc   :  { %2364 = vrot.lane.b32.xlu0 %v2285_v23, %s5507_s5  ;;  %v3352_v20 = vrot.slane %v5015_v49, 1  ;;  %v3353_v23 = vrot.slane %v8786_v62, 1  ;;  %v3356_v62 = vrot.slane %v8847_v12, 1  ;;  %v3309_v1 = vsel %vm1213_vm1, %v3307_v26, %v3308_v53 }
 0x1fd   :  { %v3407_v59 = vpop.permute.xlu1 %3406  ;;  %v3101_v48 = vsel %vm668_vm0, %v3096_v0, %v3100_v50  ;;  %v9473_v50 = vld [vmem:[#allocation88_spill] sm:$0xff] }
 0x1fe   :  { %v3927_v34 = vsel %vm3877_vm10, %v3862_v38, %v3407_v59  ;;  %v3375_v51 = vpop.permute.xlu0 %3374  ;;  %v3354_v57 = vsel %vm1213_vm1, %v3352_v20, %v3353_v23  ;;  %v9475_v20 = vld [vmem:[#allocation102_spill] sm:$0xff] }
 0x1ff   :  { %v3895_v30 = vsel %vm3877_vm10, %v3830_v58, %v3375_v51  ;;  %2618 = vrot.lane.b32.xlu1 %v8734_v14, %s5508_s18  ;;  %5142 = vmatprep.mubr.msk.bf16.mxu1 %vm3969_vm11, %v3927_v34  ;;  %v3767_v14 = vsel %vm3747_vm8, %v3702_v22, %v8751_v43  ;;  %v9462_v34 = vld [vmem:[#allocation62_spill] sm:$0xff]  ;;  %v9463_v51 = vld [vmem:[#allocation43_spill] sm:$0xff] }
 0x200   :  { %2586 = vrot.lane.b32.xlu0 %v8754_v55, %s5508_s18  ;;  %5110 = vmatprep.mubr.msk.bf16.mxu0 %vm3969_vm11, %v3895_v30  ;;  %v3832_v55 = vsel %vm3812_vm9, %v3767_v14, %v3121_v27  ;;  %v2909_v27 = vsel %vm668_vm0, %v2904_v41, %v2908_v4  ;;  %v3476_v11 = vsel %vm3422_vm3, %v9463_v51, %v9462_v34  ;;  %v9474_v4 = vld [vmem:[#allocation74_spill] sm:$0xff] }
 0x201   :  { %v3409_v7 = vpop.permute.xlu1 %3408  ;;  %v3444_v30 = vsel %vm3422_vm3, %v9465_v16, %v9464_v46  ;;  %v3541_v22 = vsel %vm3487_vm4, %v3476_v11, %v9466_v47 }
 0x202   :  { %v3929_v35 = vsel %vm3877_vm10, %v3864_v52, %v3409_v7  ;;  %v3377_v56 = vpop.permute.xlu0 %3376  ;;  %v3509_v9 = vsel %vm3487_vm4, %v3444_v30, %v9467_v29  ;;  %v9468_v52 = vld [vmem:[#allocation103_spill] sm:$0xff] }
 0x203   :  { %v3897_v43 = vsel %vm3877_vm10, %v3832_v55, %v3377_v56  ;;  %2620 = vrot.lane.b32.xlu1 %v8806_v18, %s5508_s18  ;;  %5143 = vmatmul.mubr.msk.bf16.gmra.mrb[16].mxu1 %vm3969_vm11, %v3929_v35  ;;  %v4999_v18 = vcombine.low %v4711_v28, %v8742_v8  ;;  %v3574_v7 = vsel %vm3552_vm5, %v3509_v9, %v9468_v52  ;;  %v9470_v55 = vld [vmem:[#allocation41_spill] sm:$0xff] }
 0x204   :  { %2588 = vrot.lane.b32.xlu0 %v8813_v60, %s5508_s18  ;;  %5111 = vmatmul.mubr.msk.bf16.gmra.mrb[16].mxu0 %vm3969_vm11, %v3897_v43  ;;  %v4728_v60 = vld [vmem:[%s9168_s0 + $0x1a4] sm:$0xe]  ;;  %v3478_v35 = vsel %vm3422_vm3, %v9470_v55, %v9469_v32  ;;  %v9471_v43 = vld [vmem:[#allocation36_spill] sm:$0xff] }
 0x205   :  { %v8902_v36 = vpop.permute.xlu1 %1588  ;;  %v5016_v8 = vcombine.low %v4728_v60, %v8762_v63  ;;  %v3304_v31 = vrot.slane %v4999_v18, 1  ;;  %v3543_v49 = vsel %vm3487_vm4, %v3478_v35, %v9473_v50 }
 0x206   :  { %v1587_v25 = vpop.permute.xlu0 %1586  ;;  %v3608_v60 = vsel %vm3552_vm5, %v3543_v49, %v8902_v36 }
 0x207   :  { %3162 = vrot.lane.b32.xlu1 %v3089_v45, %s5509_s1  ;;  %v3355_v24 = vrot.slane %v5016_v8, 1  ;;  %v3306_v63 = vsel %vm1213_vm1, %v3304_v31, %v3305_v42  ;;  %v3606_v6 = vsel %vm3552_vm5, %v3541_v22, %v1587_v25  ;;  %v9472_v45 = vld [vmem:[#allocation15_spill] sm:$0xff] }
 0x208   :  { %3130 = vrot.lane.b32.xlu0 %v2897_v15, %s5509_s1  ;;  %v3446_v0 = vsel %vm3422_vm3, %v9472_v45, %v9471_v43 }
 0x209   :  { %v2131_v5 = vpop.permute.xlu1 %2130  ;;  %v3357_v2 = vsel %vm1213_vm1, %v3355_v24, %v3356_v62  ;;  %v3511_v18 = vsel %vm3487_vm4, %v3446_v0, %v9474_v4  ;;  %v8979_v24 = vld [vmem:[%s9170_s2] ss:$0 sm:$0xff]  ;;  %v9476_v4 = vld [vmem:[#allocation64_spill] sm:$0xff]  ;;  %s5511_s2 = smov [#allocation2]  }
 0x20a   :  { %v2099_v44 = vpop.permute.xlu0 %2098  ;;  %v3671_v21 = vsel %vm3617_vm6, %v3606_v6, %v2131_v5  ;;  %v3576_v23 = vsel %vm3552_vm5, %v3511_v18, %v9475_v20  ;;  %v9477_v18 = vld [vmem:[#allocation49_spill] sm:$0xff]  ;;  %v9479_v20 = vld [vmem:[#allocation40_spill] sm:$0xff] }
 0x20b   :  { %3164 = vrot.lane.b32.xlu1 %v3101_v48, %s5509_s1  ;;  %v3639_v56 = vsel %vm3617_vm6, %v3574_v7, %v2099_v44 }
 0x20c   :  { %3132 = vrot.lane.b32.xlu0 %v2909_v27, %s5509_s1 }
 0x20d   :  { %v2133_v13 = vpop.permute.xlu1 %2132 }
 0x20e   :  { %v2101_v10 = vpop.permute.xlu0 %2100  ;;  %v3673_v8 = vsel %vm3617_vm6, %v3608_v60, %v2133_v13  ;;  %v3480_v60 = vsel %vm3422_vm3, %v9477_v18, %v9476_v4 }
 0x20f   :  { %3418 = vrot.lane.b32.xlu1 %v3354_v57, %s5510_s19  ;;  %v3641_v42 = vsel %vm3617_vm6, %v3576_v23, %v2101_v10  ;;  %v9480_v23 = vld [vmem:[#allocation18_spill] sm:$0xff] }
 0x210   :  { %3386 = vrot.lane.b32.xlu0 %v3306_v63, %s5510_s19 }
 0x211   :  { %v2387_v39 = vpop.permute.xlu1 %2386 }
 0x212   :  { %v2355_v17 = vpop.permute.xlu0 %2354  ;;  %v3736_v28 = vsel %vm3682_vm7, %v3671_v21, %v2387_v39 }
 0x213   :  { %3420 = vrot.lane.b32.xlu1 %v3357_v2, %s5510_s19  ;;  %v3704_v15 = vsel %vm3682_vm7, %v3639_v56, %v2355_v17 }
 0x214   :  { %3388 = vrot.lane.b32.xlu0 %v3309_v1, %s5510_s19  ;;  %s4460_s19 = sshll.u32 %s5511_s2, 4  ;;  %s4461_s19 = int_to_ptr.vmem [resolvable:$true] %s4460_s19 }
 0x215   :  { %v2389_v12 = vpop.permute.xlu1 %2388  ;;  %s5479_s26 = scalar_lea.vmem %s4461_s19, 8192  ;;  %p5484_p1 = scmp.lt.s32.totalorder %s4461_s19, %s4461_s19 }
 0x216   :  { %v2357_v61 = vpop.permute.xlu0 %2356  ;;  %v3738_v19 = vsel %vm3682_vm7, %v3673_v8, %v2389_v12  ;;  %v3448_v8 = vsel %vm3422_vm3, %v9480_v23, %v9479_v20  ;;  %p5480_p0 = scmp.ne.s32.totalorder %s4461_s19, %s5479_s26  ;;  %p5485_p2 = scmp.lt.s32.totalorder %s5479_s26, %s5479_s26 }
 0x217   :  { %v3706_v44 = vsel %vm3682_vm7, %v3641_v42, %v2357_v61 }
 0x218   :  { %p5486_p3 = por %p5485_p2, %p5484_p1 }
 0x219   :  { %v2611_v38 = vpop.permute.xlu1 %2610 }
 0x21a   :  { %v2579_v59 = vpop.permute.xlu0 %2578  ;;  %v3801_v41 = vsel %vm3747_vm8, %v3736_v28, %v2611_v38  ;;  %p5487_p4 = pnand %p5486_p3, %p5480_p0 }
 0x21b   :  { %v3769_v25 = vsel %vm3747_vm8, %v3704_v15, %v2579_v59 }
 0x21d   :  { %v2613_v33 = vpop.permute.xlu1 %2612 }
 0x21e   :  { %v2581_v54 = vpop.permute.xlu0 %2580  ;;  %v3803_v57 = vsel %vm3747_vm8, %v3738_v19, %v2613_v33 }
 0x21f   :  { %v3771_v62 = vsel %vm3747_vm8, %v3706_v44, %v2581_v54  ;;  %v9483_v44 = vld [vmem:[#allocation17_spill] sm:$0xff] }
 0x221   :  { %v3155_v3 = vpop.permute.xlu1 %3154 }
 0x222   :  { %v3123_v58 = vpop.permute.xlu0 %3122  ;;  %v3866_v37 = vsel %vm3812_vm9, %v3801_v41, %v3155_v3 }
 0x223   :  { %v3834_v5 = vsel %vm3812_vm9, %v3769_v25, %v3123_v58 }
 0x225   :  { %v3157_v14 = vpop.permute.xlu1 %3156 }
 0x226   :  { %v3125_v40 = vpop.permute.xlu0 %3124  ;;  %v3868_v13 = vsel %vm3812_vm9, %v3803_v57, %v3157_v14 }
 0x227   :  { %v3836_v26 = vsel %vm3812_vm9, %v3771_v62, %v3125_v40  ;;  %v9484_v62 = vld [vmem:[#allocation63_spill] sm:$0xff] }
 0x229   :  { %v3411_v48 = vpop.permute.xlu1 %3410 }
 0x22a   :  { %v3931_v27 = vsel %vm3877_vm10, %v3866_v37, %v3411_v48  ;;  %v3379_v31 = vpop.permute.xlu0 %3378  ;;  %v9478_v37 = vld [vmem:[#allocation91_spill] sm:$0xff] }
 0x22b   :  { %v3899_v36 = vsel %vm3877_vm10, %v3834_v5, %v3379_v31  ;;  %5146 = vmatprep.mubr.msk.bf16.mxu1 %vm3969_vm11, %v3931_v27  ;;  %v3545_v48 = vsel %vm3487_vm4, %v3480_v60, %v9478_v37  ;;  %v9481_v31 = vld [vmem:[#allocation77_spill] sm:$0xff] }
 0x22c   :  { %5114 = vmatprep.mubr.msk.bf16.mxu0 %vm3969_vm11, %v3899_v36  ;;  %v3513_v42 = vsel %vm3487_vm4, %v3448_v8, %v9481_v31  ;;  %v9482_v36 = vld [vmem:[#allocation39_spill] sm:$0xff] }
 0x22d   :  { %v3413_v63 = vpop.permute.xlu1 %3412  ;;  %v3450_v57 = vsel %vm3422_vm3, %v9483_v44, %v9482_v36 }
 0x22e   :  { %v3933_v53 = vsel %vm3877_vm10, %v3868_v13, %v3413_v63  ;;  %v3381_v10 = vpop.permute.xlu0 %3380  ;;  %v5128_v2 = vpop.f32.mrb[0].mxu1  ;;  %v9485_v13 = vld [vmem:[#allocation46_spill] sm:$0xff] }
 0x22f   :  { %v3901_v39 = vsel %vm3877_vm10, %v3836_v26, %v3381_v10  ;;  %v5096_v1 = vpop.f32.mrb[0].mxu0  ;;  %v4209_v17 = vadd.f32 %v5128_v2, %v8979_v24  ;;  %v4200_v12 = vpop.f32.mrb[1].mxu1  ;;  %5147 = vmatmul.mubr.msk.bf16.gmra.mrb[20].mxu1 %vm3969_vm11, %v3933_v53  ;;  %v3482_v63 = vsel %vm3422_vm3, %v9485_v13, %v9484_v62  ;;  %v9486_v26 = vld [vmem:[#allocation105_spill] sm:$0xff] }
 0x230   :  { %v4081_v61 = vadd.f32 %v5096_v1, %v8979_v24  ;;  %v4072_v38 = vpop.f32.mrb[1].mxu0  ;;  %5115 = vmatmul.mubr.msk.bf16.gmra.mrb[20].mxu0 %vm3969_vm11, %v3901_v39  ;;  %v4201_v59 = vadd.f32 %v8979_v24, %v4200_v12  ;;  %v5129_v33 = vpop.f32.mrb[2].mxu1  ;;  %v3578_v53 = vsel %vm3552_vm5, %v3513_v42, %v9486_v26  ;;  %v9487_v39 = vld [vmem:[#allocation76_spill] sm:$0xff] }
 0x231   :  { %v4361_v54 = vmax.f32 %v4209_v17, 0.0  ;;  %v4073_v3 = vadd.f32 %v8979_v24, %v4072_v38  ;;  %v5097_v58 = vpop.f32.mrb[2].mxu0  ;;  %v4212_v34 = vadd.f32 %v5129_v33, %v8979_v24  ;;  %v1593_v51 = vpop.permute.xlu1 %1592  ;;  %v3515_v1 = vsel %vm3487_vm4, %v3450_v57, %v9487_v39  ;;  %v9488_v17 = vld [vmem:[#allocation90_spill] sm:$0xff] }
 0x232   :  { %v4329_v11 = vmax.f32 %v4081_v61, 0.0  ;;  %v4359_v46 = vmax.f32 %v4201_v59, 0.0  ;;  %v4084_v16 = vadd.f32 %v5097_v58, %v8979_v24  ;;  %v4075_v30 = vpop.f32.mrb[3].mxu0  ;;  %v4203_v47 = vpop.f32.mrb[3].mxu1  ;;  %v3547_v12 = vsel %vm3487_vm4, %v3482_v63, %v9488_v17  ;;  %v9489_v59 = vld [vmem:[#allocation104_spill] sm:$0xff] }
 0x233   :  { %4425 = vst [vmem:[#allocation2 + $0x110] sm:$0xff] %v4361_v54  ;;  %v4327_v22 = vmax.f32 %v4073_v3, 0.0  ;;  %v4362_v29 = vmax.f32 %v4212_v34, 0.0  ;;  %v4076_v9 = vadd.f32 %v8979_v24, %v4075_v30  ;;  %v4204_v6 = vadd.f32 %v8979_v24, %v4203_v47  ;;  %v1591_v14 = vpop.permute.xlu0 %1590 }
 0x234   :  { %4393 = vst [vmem:[#allocation2 + $0x10] sm:$0xff] %v4329_v11  ;;  %4423 = vst [vmem:[#allocation2 + $0x100] sm:$0xff] %v4359_v46  ;;  %v4330_v52 = vmax.f32 %v4084_v16, 0.0  ;;  %v3610_v5 = vsel %vm3552_vm5, %v3545_v48, %v1591_v14  ;;  %v3580_v33 = vsel %vm3552_vm5, %v3515_v1, %v9489_v59  ;;  %v3612_v54 = vsel %vm3552_vm5, %v3547_v12, %v1593_v51  ;;  %v9491_v59 = vld [vmem:[#allocation20_spill] sm:$0xff] }
 0x235   :  { %4391 = vst [vmem:[#allocation2] sm:$0xff] %v4327_v22  ;;  %4426 = vst [vmem:[#allocation2 + $0x118] sm:$0xff] %v4362_v29  ;;  %v4328_v7 = vmax.f32 %v4076_v9, 0.0  ;;  %v4360_v21 = vmax.f32 %v4204_v6, 0.0  ;;  %v2135_v40 = vpop.permute.xlu1 %2134 }
 0x236   :  { %4394 = vst [vmem:[#allocation2 + $0x18] sm:$0xff] %v4330_v52  ;;  %v3675_v19 = vsel %vm3617_vm6, %v3610_v5, %v2135_v40 }
 0x237   :  { %4392 = vst [vmem:[#allocation2 + $0x8] sm:$0xff] %v4328_v7  ;;  %4424 = vst [vmem:[#allocation2 + $0x108] sm:$0xff] %v4360_v21  ;;  %v2103_v32 = vpop.permute.xlu0 %2102 }
 0x238   :  { %v3643_v61 = vsel %vm3617_vm6, %v3578_v53, %v2103_v32 }
 0x239   :  { %v2137_v55 = vpop.permute.xlu1 %2136 }
 0x23a   :  { %v3677_v11 = vsel %vm3617_vm6, %v3612_v54, %v2137_v55  ;;  %v9492_v54 = vld [vmem:[#allocation65_spill] sm:$0xff] }
 0x23b   :  { %v2105_v35 = vpop.permute.xlu0 %2104 }
 0x23c   :  { %v3645_v46 = vsel %vm3617_vm6, %v3580_v33, %v2105_v35 }
 0x23d   :  { %v2391_v56 = vpop.permute.xlu1 %2390 }
 0x23e   :  { %v3740_v10 = vsel %vm3682_vm7, %v3675_v19, %v2391_v56 }
 0x23f   :  { %v2359_v28 = vpop.permute.xlu0 %2358 }
 0x240   :  { %v3708_v3 = vsel %vm3682_vm7, %v3643_v61, %v2359_v28 }
 0x241   :  { %v2393_v43 = vpop.permute.xlu1 %2392 }
 0x242   :  { %v3742_v22 = vsel %vm3682_vm7, %v3677_v11, %v2393_v43  ;;  %v9495_v11 = vld [vmem:[#allocation55_spill] sm:$0xff] }
 0x243   :  { %v2361_v45 = vpop.permute.xlu0 %2360 }
 0x244   :  { %v3710_v29 = vsel %vm3682_vm7, %v3645_v46, %v2361_v45 }
 0x245   :  { %v2615_v0 = vpop.permute.xlu1 %2614 }
 0x246   :  { %v3805_v38 = vsel %vm3747_vm8, %v3740_v10, %v2615_v0 }
 0x247   :  { %v2583_v50 = vpop.permute.xlu0 %2582 }
 0x248   :  { %v3773_v16 = vsel %vm3747_vm8, %v3708_v3, %v2583_v50  ;;  %v9493_v3 = vld [vmem:[#allocation53_spill] sm:$0xff] }
 0x249   :  { %v2617_v49 = vpop.permute.xlu1 %2616 }
 0x24a   :  { %v3807_v52 = vsel %vm3747_vm8, %v3742_v22, %v2617_v49 }
 0x24b   :  { %v2585_v15 = vpop.permute.xlu0 %2584 }
 0x24c   :  { %v3775_v7 = vsel %vm3747_vm8, %v3710_v29, %v2585_v15  ;;  %v9498_v29 = vld [vmem:[#allocation79_spill] sm:$0xff] }
 0x24d   :  { %v3159_v41 = vpop.permute.xlu1 %3158 }
 0x24e   :  { %v3870_v58 = vsel %vm3812_vm9, %v3805_v38, %v3159_v41  ;;  %v9490_v38 = vld [vmem:[#allocation44_spill] sm:$0xff] }
 0x24f   :  { %v3127_v25 = vpop.permute.xlu0 %3126  ;;  %v3452_v33 = vsel %vm3422_vm3, %v9491_v59, %v9490_v38 }
 0x250   :  { %v3838_v51 = vsel %vm3812_vm9, %v3773_v16, %v3127_v25 }
 0x251   :  { %v3161_v27 = vpop.permute.xlu1 %3160 }
 0x252   :  { %v3872_v35 = vsel %vm3812_vm9, %v3807_v52, %v3161_v27 }
 0x253   :  { %v3129_v2 = vpop.permute.xlu0 %3128 }
 0x254   :  { %v3840_v50 = vsel %vm3812_vm9, %v3775_v7, %v3129_v2  ;;  %v9501_v7 = vld [vmem:[#allocation78_spill] sm:$0xff] }
 0x255   :  { %v3415_v34 = vpop.permute.xlu1 %3414 }
 0x256   :  { %v3935_v30 = vsel %vm3877_vm10, %v3870_v58, %v3415_v34  ;;  %v5132_v47 = vpop.f32.mrb[4].mxu1  ;;  %v3486_v58 = vsel %vm3422_vm3, %v9493_v3, %v9492_v54  ;;  %v9494_v34 = vld [vmem:[#allocation66_spill] sm:$0xff] }
 0x257   :  { %v3383_v9 = vpop.permute.xlu0 %3382  ;;  %v5100_v6 = vpop.f32.mrb[4].mxu0  ;;  %v4225_v14 = vadd.f32 %v5132_v47, %v8979_v24  ;;  %5150 = vmatprep.mubr.msk.bf16.mxu1 %vm3969_vm11, %v3935_v30  ;;  %v3484_v46 = vsel %vm3422_vm3, %v9495_v11, %v9494_v34  ;;  %v9496_v30 = vld [vmem:[#allocation42_spill] sm:$0xff]  ;;  %v9497_v47 = vld [vmem:[#allocation19_spill] sm:$0xff] }
 0x258   :  { %v3903_v21 = vsel %vm3877_vm10, %v3838_v51, %v3383_v9  ;;  %v4097_v40 = vadd.f32 %v5100_v6, %v8979_v24  ;;  %v4088_v32 = vpop.f32.mrb[5].mxu0  ;;  %v4216_v55 = vpop.f32.mrb[5].mxu1  ;;  %v3454_v22 = vsel %vm3422_vm3, %v9497_v47, %v9496_v30  ;;  %v3517_v51 = vsel %vm3487_vm4, %v3452_v33, %v9498_v29  ;;  %v9499_v9 = vld [vmem:[#allocation92_spill] sm:$0xff] }
 0x259   :  { %v4365_v56 = vmax.f32 %v4225_v14, 0.0  ;;  %v4089_v28 = vadd.f32 %v8979_v24, %v4088_v32  ;;  %5118 = vmatprep.mubr.msk.bf16.mxu0 %vm3969_vm11, %v3903_v21  ;;  %v4217_v43 = vadd.f32 %v8979_v24, %v4216_v55  ;;  %v5101_v45 = vpop.f32.mrb[6].mxu0  ;;  %v5133_v0 = vpop.f32.mrb[6].mxu1  ;;  %v3551_v6 = vsel %vm3487_vm4, %v3486_v58, %v9499_v9  ;;  %v9500_v14 = vld [vmem:[#allocation93_spill] sm:$0xff] }
 0x25a   :  { %v4333_v49 = vmax.f32 %v4097_v40, 0.0  ;;  %v4100_v15 = vadd.f32 %v5101_v45, %v8979_v24  ;;  %v4228_v41 = vadd.f32 %v5133_v0, %v8979_v24  ;;  %v3417_v4 = vpop.permute.xlu1 %3416  ;;  %v4091_v18 = vpop.f32.mrb[7].mxu0  ;;  %v3549_v52 = vsel %vm3487_vm4, %v3484_v46, %v9500_v14  ;;  %v9502_v40 = vld [vmem:[#allocation107_spill] sm:$0xff] }
 0x25b   :  { %4429 = vst [vmem:[#allocation2 + $0x130] sm:$0xff] %v4365_v56  ;;  %v4331_v60 = vmax.f32 %v4089_v28, 0.0  ;;  %v4363_v25 = vmax.f32 %v4217_v43, 0.0  ;;  %v3937_v37 = vsel %vm3877_vm10, %v3872_v35, %v3417_v4  ;;  %v4092_v48 = vadd.f32 %v8979_v24, %v4091_v18  ;;  %v4219_v20 = vpop.f32.mrb[7].mxu1  ;;  %v3385_v23 = vpop.permute.xlu0 %3384  ;;  %v9503_v56 = vld [vmem:[#allocation106_spill] sm:$0xff] }
 0x25c   :  { %4397 = vst [vmem:[#allocation2 + $0x30] sm:$0xff] %v4333_v49  ;;  %v4334_v8 = vmax.f32 %v4100_v15, 0.0  ;;  %v4366_v5 = vmax.f32 %v4228_v41, 0.0  ;;  %v4220_v27 = vadd.f32 %v8979_v24, %v4219_v20  ;;  %v3905_v31 = vsel %vm3877_vm10, %v3840_v50, %v3385_v23  ;;  %5151 = vmatmul.mubr.msk.bf16.gmra.mrb[24].mxu1 %vm3969_vm11, %v3937_v37 }
 0x25d   :  { %4395 = vst [vmem:[#allocation2 + $0x20] sm:$0xff] %v4331_v60  ;;  %4427 = vst [vmem:[#allocation2 + $0x120] sm:$0xff] %v4363_v25  ;;  %v4332_v42 = vmax.f32 %v4092_v48, 0.0  ;;  %5119 = vmatmul.mubr.msk.bf16.gmra.mrb[24].mxu0 %vm3969_vm11, %v3905_v31  ;;  %v3519_v21 = vsel %vm3487_vm4, %v3454_v22, %v9501_v7  ;;  %v3582_v32 = vsel %vm3552_vm5, %v3517_v51, %v9502_v40 }
 0x25e   :  { %4398 = vst [vmem:[#allocation2 + $0x38] sm:$0xff] %v4334_v8  ;;  %4430 = vst [vmem:[#allocation2 + $0x138] sm:$0xff] %v4366_v5  ;;  %v4364_v19 = vmax.f32 %v4220_v27, 0.0  ;;  %v1597_v36 = vpop.permute.xlu1 %1596  ;;  %v3584_v28 = vsel %vm3552_vm5, %v3519_v21, %v9503_v56 }
 0x25f   :  { %4396 = vst [vmem:[#allocation2 + $0x28] sm:$0xff] %v4332_v42  ;;  %v1595_v44 = vpop.permute.xlu0 %1594  ;;  %v3616_v55 = vsel %vm3552_vm5, %v3551_v6, %v1597_v36 }
 0x260   :  { %4428 = vst [vmem:[#allocation2 + $0x128] sm:$0xff] %v4364_v19  ;;  %v3614_v35 = vsel %vm3552_vm5, %v3549_v52, %v1595_v44 }
 0x262   :  { %v2139_v57 = vpop.permute.xlu1 %2138 }
 0x263   :  { %v2107_v62 = vpop.permute.xlu0 %2106  ;;  %v3679_v43 = vsel %vm3617_vm6, %v3614_v35, %v2139_v57 }
 0x264   :  { %v3647_v45 = vsel %vm3617_vm6, %v3582_v32, %v2107_v62 }
 0x266   :  { %v2141_v13 = vpop.permute.xlu1 %2140 }
 0x267   :  { %v2109_v63 = vpop.permute.xlu0 %2108  ;;  %v3681_v0 = vsel %vm3617_vm6, %v3616_v55, %v2141_v13 }
 0x268   :  { %v3649_v15 = vsel %vm3617_vm6, %v3584_v28, %v2109_v63 }
 0x26a   :  { %v2395_v26 = vpop.permute.xlu1 %2394 }
 0x26b   :  { %v2363_v53 = vpop.permute.xlu0 %2362  ;;  %v3744_v41 = vsel %vm3682_vm7, %v3679_v43, %v2395_v26 }
 0x26c   :  { %v3712_v4 = vsel %vm3682_vm7, %v3647_v45, %v2363_v53 }
 0x26e   :  { %v2397_v10 = vpop.permute.xlu1 %2396 }
 0x26f   :  { %v2365_v2 = vpop.permute.xlu0 %2364  ;;  %v3746_v37 = vsel %vm3682_vm7, %v3681_v0, %v2397_v10 }
 0x270   :  { %v3714_v34 = vsel %vm3682_vm7, %v3649_v15, %v2365_v2 }
 0x272   :  { %v2619_v39 = vpop.permute.xlu1 %2618 }
 0x273   :  { %v2587_v1 = vpop.permute.xlu0 %2586  ;;  %v3809_v48 = vsel %vm3747_vm8, %v3744_v41, %v2619_v39 }
 0x274   :  { %v3777_v20 = vsel %vm3747_vm8, %v3712_v4, %v2587_v1 }
 0x276   :  { %v2621_v17 = vpop.permute.xlu1 %2620 }
 0x277   :  { %v9054_v12 = vpop.permute.xlu0 %2588  ;;  %v3811_v11 = vsel %vm3747_vm8, %v3746_v37, %v2621_v17 }
 0x27a   :  { %v3163_v61 = vpop.permute.xlu1 %3162 }
 0x27b   :  { %v3131_v16 = vpop.permute.xlu0 %3130  ;;  %v3874_v27 = vsel %vm3812_vm9, %v3809_v48, %v3163_v61 }
 0x27c   :  { %v3842_v57 = vsel %vm3812_vm9, %v3777_v20, %v3131_v16  ;;  %v3779_v16 = vsel %vm3747_vm8, %v3714_v34, %v9054_v12 }
 0x27e   :  { %v3165_v50 = vpop.permute.xlu1 %3164  ;;  %v5136_v49 = vpop.f32.mrb[8].mxu1 }
 0x27f   :  { %v3133_v18 = vpop.permute.xlu0 %3132  ;;  %v5104_v60 = vpop.f32.mrb[8].mxu0  ;;  %v4241_v25 = vadd.f32 %v5136_v49, %v8979_v24  ;;  %v3876_v30 = vsel %vm3812_vm9, %v3811_v11, %v3165_v50 }
 0x280   :  { %v4113_v23 = vadd.f32 %v5104_v60, %v8979_v24  ;;  %v4104_v8 = vpop.f32.mrb[9].mxu0  ;;  %v4232_v5 = vpop.f32.mrb[9].mxu1  ;;  %v3844_v29 = vsel %vm3812_vm9, %v3779_v16, %v3133_v18 }
 0x281   :  { %v4369_v31 = vmax.f32 %v4241_v25, 0.0  ;;  %v4105_v42 = vadd.f32 %v8979_v24, %v4104_v8  ;;  %v4233_v19 = vadd.f32 %v8979_v24, %v4232_v5  ;;  %v5105_v36 = vpop.f32.mrb[10].mxu0  ;;  %v5137_v44 = vpop.f32.mrb[10].mxu1 }
 0x282   :  { %v4337_v62 = vmax.f32 %v4113_v23, 0.0  ;;  %v4116_v13 = vadd.f32 %v5105_v36, %v8979_v24  ;;  %v4244_v63 = vadd.f32 %v5137_v44, %v8979_v24  ;;  %v3419_v26 = vpop.permute.xlu1 %3418  ;;  %v4107_v53 = vpop.f32.mrb[11].mxu0 }
 0x283   :  { %4433 = vst [vmem:[#allocation2 + $0x150] sm:$0xff] %v4369_v31  ;;  %v4335_v10 = vmax.f32 %v4105_v42, 0.0  ;;  %v4367_v39 = vmax.f32 %v4233_v19, 0.0  ;;  %v3939_v1 = vsel %vm3877_vm10, %v3874_v27, %v3419_v26  ;;  %v4108_v61 = vadd.f32 %v8979_v24, %v4107_v53  ;;  %v4235_v38 = vpop.f32.mrb[11].mxu1  ;;  %v3387_v59 = vpop.permute.xlu0 %3386 }
 0x284   :  { %4401 = vst [vmem:[#allocation2 + $0x50] sm:$0xff] %v4337_v62  ;;  %v4338_v33 = vmax.f32 %v4116_v13, 0.0  ;;  %v4370_v54 = vmax.f32 %v4244_v63, 0.0  ;;  %v4236_v3 = vadd.f32 %v8979_v24, %v4235_v38  ;;  %v3907_v58 = vsel %vm3877_vm10, %v3842_v57, %v3387_v59  ;;  %5154 = vmatprep.mubr.msk.bf16.mxu1 %vm3969_vm11, %v3939_v1 }
 0x285   :  { %4399 = vst [vmem:[#allocation2 + $0x40] sm:$0xff] %v4335_v10  ;;  %4431 = vst [vmem:[#allocation2 + $0x140] sm:$0xff] %v4367_v39  ;;  %v4336_v46 = vmax.f32 %v4108_v61, 0.0  ;;  %5122 = vmatprep.mubr.msk.bf16.mxu0 %vm3969_vm11, %v3907_v58 }
 0x286   :  { %4402 = vst [vmem:[#allocation2 + $0x58] sm:$0xff] %v4338_v33  ;;  %4434 = vst [vmem:[#allocation2 + $0x158] sm:$0xff] %v4370_v54  ;;  %v4368_v47 = vmax.f32 %v4236_v3, 0.0  ;;  %v3421_v22 = vpop.permute.xlu1 %3420 }
 0x287   :  { %4400 = vst [vmem:[#allocation2 + $0x48] sm:$0xff] %v4336_v46  ;;  %v3941_v2 = vsel %vm3877_vm10, %v3876_v30, %v3421_v22  ;;  %v3389_v17 = vpop.permute.xlu0 %3388 }
 0x288   :  { %4432 = vst [vmem:[#allocation2 + $0x148] sm:$0xff] %v4368_v47  ;;  %v3909_v51 = vsel %vm3877_vm10, %v3844_v29, %v3389_v17  ;;  %5155 = vmatmul.mubr.msk.bf16.gmra.mrb[28].mxu1 %vm3969_vm11, %v3941_v2 }
 0x289   :  { %5123 = vmatmul.mubr.msk.bf16.gmra.mrb[28].mxu0 %vm3969_vm11, %v3909_v51 }
 0x2aa   :  { %v5140_v12 = vpop.f32.mrb[12].mxu1 }
 0x2ab   :  { %v5108_v9 = vpop.f32.mrb[12].mxu0  ;;  %v4257_v6 = vadd.f32 %v5140_v12, %v8979_v24  ;;  %v4248_v14 = vpop.f32.mrb[13].mxu1 }
 0x2ac   :  { %v4129_v52 = vadd.f32 %v5108_v9, %v8979_v24  ;;  %v4120_v7 = vpop.f32.mrb[13].mxu0  ;;  %v4249_v21 = vadd.f32 %v8979_v24, %v4248_v14  ;;  %v5141_v40 = vpop.f32.mrb[14].mxu1 }
 0x2ad   :  { %v4373_v32 = vmax.f32 %v4257_v6, 0.0  ;;  %v4121_v55 = vadd.f32 %v8979_v24, %v4120_v7  ;;  %v5109_v35 = vpop.f32.mrb[14].mxu0  ;;  %v4260_v56 = vadd.f32 %v5141_v40, %v8979_v24  ;;  %v4251_v28 = vpop.f32.mrb[15].mxu1 }
 0x2ae   :  { %v4341_v43 = vmax.f32 %v4129_v52, 0.0  ;;  %v4371_v45 = vmax.f32 %v4249_v21, 0.0  ;;  %v4132_v0 = vadd.f32 %v5109_v35, %v8979_v24  ;;  %v4123_v50 = vpop.f32.mrb[15].mxu0  ;;  %v4252_v49 = vadd.f32 %v8979_v24, %v4251_v28 }
 0x2af   :  { %4437 = vst [vmem:[#allocation2 + $0x170] sm:$0xff] %v4373_v32  ;;  %v4339_v15 = vmax.f32 %v4121_v55, 0.0  ;;  %v4374_v41 = vmax.f32 %v4260_v56, 0.0  ;;  %v4124_v4 = vadd.f32 %v8979_v24, %v4123_v50 }
 0x2b0   :  { %4405 = vst [vmem:[#allocation2 + $0x70] sm:$0xff] %v4341_v43  ;;  %4435 = vst [vmem:[#allocation2 + $0x160] sm:$0xff] %v4371_v45  ;;  %v4342_v18 = vmax.f32 %v4132_v0, 0.0  ;;  %v4372_v60 = vmax.f32 %v4252_v49, 0.0 }
 0x2b1   :  { %4403 = vst [vmem:[#allocation2 + $0x60] sm:$0xff] %v4339_v15  ;;  %4438 = vst [vmem:[#allocation2 + $0x178] sm:$0xff] %v4374_v41  ;;  %v4340_v25 = vmax.f32 %v4124_v4, 0.0 }
 0x2b2   :  { %4406 = vst [vmem:[#allocation2 + $0x78] sm:$0xff] %v4342_v18  ;;  %4436 = vst [vmem:[#allocation2 + $0x168] sm:$0xff] %v4372_v60 }
 0x2b3   :  { %4404 = vst [vmem:[#allocation2 + $0x68] sm:$0xff] %v4340_v25 }
 0x2d6   :  { %v5144_v37 = vpop.f32.mrb[16].mxu1 }
 0x2d7   :  { %v5112_v48 = vpop.f32.mrb[16].mxu0  ;;  %v4273_v20 = vadd.f32 %v5144_v37, %v8979_v24  ;;  %v4264_v23 = vpop.f32.mrb[17].mxu1 }
 0x2d8   :  { %v4145_v8 = vadd.f32 %v5112_v48, %v8979_v24  ;;  %v4136_v5 = vpop.f32.mrb[17].mxu0  ;;  %v4265_v27 = vadd.f32 %v8979_v24, %v4264_v23  ;;  %v5145_v31 = vpop.f32.mrb[18].mxu1 }
 0x2d9   :  { %v4377_v42 = vmax.f32 %v4273_v20, 0.0  ;;  %v4137_v19 = vadd.f32 %v8979_v24, %v4136_v5  ;;  %v5113_v36 = vpop.f32.mrb[18].mxu0  ;;  %v4276_v44 = vadd.f32 %v5145_v31, %v8979_v24  ;;  %v4267_v57 = vpop.f32.mrb[19].mxu1 }
 0x2da   :  { %v4345_v62 = vmax.f32 %v4145_v8, 0.0  ;;  %v4375_v13 = vmax.f32 %v4265_v27, 0.0  ;;  %v4148_v63 = vadd.f32 %v5113_v36, %v8979_v24  ;;  %v4139_v26 = vpop.f32.mrb[19].mxu0  ;;  %v4268_v53 = vadd.f32 %v8979_v24, %v4267_v57 }
 0x2db   :  { %4441 = vst [vmem:[#allocation2 + $0x190] sm:$0xff] %v4377_v42  ;;  %v4343_v10 = vmax.f32 %v4137_v19, 0.0  ;;  %v4378_v39 = vmax.f32 %v4276_v44, 0.0  ;;  %v4140_v1 = vadd.f32 %v8979_v24, %v4139_v26 }
 0x2dc   :  { %4409 = vst [vmem:[#allocation2 + $0x90] sm:$0xff] %v4345_v62  ;;  %4439 = vst [vmem:[#allocation2 + $0x180] sm:$0xff] %v4375_v13  ;;  %v4346_v61 = vmax.f32 %v4148_v63, 0.0  ;;  %v4376_v38 = vmax.f32 %v4268_v53, 0.0 }
 0x2dd   :  { %4407 = vst [vmem:[#allocation2 + $0x80] sm:$0xff] %v4343_v10  ;;  %4442 = vst [vmem:[#allocation2 + $0x198] sm:$0xff] %v4378_v39  ;;  %v4344_v59 = vmax.f32 %v4140_v1, 0.0 }
 0x2de   :  { %4410 = vst [vmem:[#allocation2 + $0x98] sm:$0xff] %v4346_v61  ;;  %4440 = vst [vmem:[#allocation2 + $0x188] sm:$0xff] %v4376_v38 }
 0x2df   :  { %4408 = vst [vmem:[#allocation2 + $0x88] sm:$0xff] %v4344_v59 }
 0x302   :  { %v5148_v33 = vpop.f32.mrb[20].mxu1 }
 0x303   :  { %v5116_v54 = vpop.f32.mrb[20].mxu0  ;;  %v4289_v3 = vadd.f32 %v5148_v33, %v8979_v24  ;;  %v4280_v58 = vpop.f32.mrb[21].mxu1 }
 0x304   :  { %v4161_v34 = vadd.f32 %v5116_v54, %v8979_v24  ;;  %v4152_v11 = vpop.f32.mrb[21].mxu0  ;;  %v4281_v46 = vadd.f32 %v8979_v24, %v4280_v58  ;;  %v5149_v16 = vpop.f32.mrb[22].mxu1 }
 0x305   :  { %v4381_v30 = vmax.f32 %v4289_v3, 0.0  ;;  %v4153_v47 = vadd.f32 %v8979_v24, %v4152_v11  ;;  %v5117_v22 = vpop.f32.mrb[22].mxu0  ;;  %v4292_v29 = vadd.f32 %v5149_v16, %v8979_v24  ;;  %v4283_v2 = vpop.f32.mrb[23].mxu1 }
 0x306   :  { %v4349_v17 = vmax.f32 %v4161_v34, 0.0  ;;  %v4379_v51 = vmax.f32 %v4281_v46, 0.0  ;;  %v4164_v12 = vadd.f32 %v5117_v22, %v8979_v24  ;;  %v4155_v9 = vpop.f32.mrb[23].mxu0  ;;  %v4284_v6 = vadd.f32 %v8979_v24, %v4283_v2 }
 0x307   :  { %4445 = vst [vmem:[#allocation2 + $0x1b0] sm:$0xff] %v4381_v30  ;;  %v4347_v14 = vmax.f32 %v4153_v47, 0.0  ;;  %v4382_v52 = vmax.f32 %v4292_v29, 0.0  ;;  %v4156_v7 = vadd.f32 %v8979_v24, %v4155_v9 }
 0x308   :  { %4413 = vst [vmem:[#allocation2 + $0xb0] sm:$0xff] %v4349_v17  ;;  %4443 = vst [vmem:[#allocation2 + $0x1a0] sm:$0xff] %v4379_v51  ;;  %v4350_v21 = vmax.f32 %v4164_v12, 0.0  ;;  %v4380_v40 = vmax.f32 %v4284_v6, 0.0 }
 0x309   :  { %4411 = vst [vmem:[#allocation2 + $0xa0] sm:$0xff] %v4347_v14  ;;  %4446 = vst [vmem:[#allocation2 + $0x1b8] sm:$0xff] %v4382_v52  ;;  %v4348_v32 = vmax.f32 %v4156_v7, 0.0 }
 0x30a   :  { %4414 = vst [vmem:[#allocation2 + $0xb8] sm:$0xff] %v4350_v21  ;;  %4444 = vst [vmem:[#allocation2 + $0x1a8] sm:$0xff] %v4380_v40 }
 0x30b   :  { %4412 = vst [vmem:[#allocation2 + $0xa8] sm:$0xff] %v4348_v32 }
 0x32f   :  { %v5152_v55 = vpop.f32.mrb[24].mxu1 }
 0x330   :  { %v5120_v35 = vpop.f32.mrb[24].mxu0  ;;  %v4305_v56 = vadd.f32 %v5152_v55, %v8979_v24  ;;  %v4296_v28 = vpop.f32.mrb[25].mxu1 }
 0x331   :  { %v4177_v43 = vadd.f32 %v5120_v35, %v8979_v24  ;;  %v4168_v45 = vpop.f32.mrb[25].mxu0  ;;  %v4297_v0 = vadd.f32 %v8979_v24, %v4296_v28  ;;  %v5153_v50 = vpop.f32.mrb[26].mxu1 }
 0x332   :  { %v4385_v49 = vmax.f32 %v4305_v56, 0.0  ;;  %v4169_v15 = vadd.f32 %v8979_v24, %v4168_v45  ;;  %v5121_v41 = vpop.f32.mrb[26].mxu0  ;;  %v4308_v4 = vadd.f32 %v5153_v50, %v8979_v24  ;;  %v4299_v18 = vpop.f32.mrb[27].mxu1 }
 0x333   :  { %v4353_v60 = vmax.f32 %v4177_v43, 0.0  ;;  %v4383_v25 = vmax.f32 %v4297_v0, 0.0  ;;  %v4180_v37 = vadd.f32 %v5121_v41, %v8979_v24  ;;  %v4171_v48 = vpop.f32.mrb[27].mxu0  ;;  %v4300_v20 = vadd.f32 %v8979_v24, %v4299_v18 }
 0x334   :  { %4449 = vst [vmem:[#allocation2 + $0x1d0] sm:$0xff] %v4385_v49  ;;  %v4351_v23 = vmax.f32 %v4169_v15, 0.0  ;;  %v4386_v8 = vmax.f32 %v4308_v4, 0.0  ;;  %v4172_v5 = vadd.f32 %v8979_v24, %v4171_v48 }
 0x335   :  { %4417 = vst [vmem:[#allocation2 + $0xd0] sm:$0xff] %v4353_v60  ;;  %4447 = vst [vmem:[#allocation2 + $0x1c0] sm:$0xff] %v4383_v25  ;;  %v4354_v27 = vmax.f32 %v4180_v37, 0.0  ;;  %v4384_v31 = vmax.f32 %v4300_v20, 0.0 }
 0x336   :  { %4415 = vst [vmem:[#allocation2 + $0xc0] sm:$0xff] %v4351_v23  ;;  %4450 = vst [vmem:[#allocation2 + $0x1d8] sm:$0xff] %v4386_v8  ;;  %v4352_v42 = vmax.f32 %v4172_v5, 0.0 }
 0x337   :  { %4418 = vst [vmem:[#allocation2 + $0xd8] sm:$0xff] %v4354_v27  ;;  %4448 = vst [vmem:[#allocation2 + $0x1c8] sm:$0xff] %v4384_v31 }
 0x338   :  { %4416 = vst [vmem:[#allocation2 + $0xc8] sm:$0xff] %v4352_v42 }
 0x35b   :  { %v5156_v19 = vpop.f32.mrb[28].mxu1 }
 0x35c   :  { %v5124_v36 = vpop.f32.mrb[28].mxu0  ;;  %v4321_v44 = vadd.f32 %v5156_v19, %v8979_v24  ;;  %v4312_v57 = vpop.f32.mrb[29].mxu1 }
 0x35d   :  { %v4193_v62 = vadd.f32 %v5124_v36, %v8979_v24  ;;  %v4184_v13 = vpop.f32.mrb[29].mxu0  ;;  %v4313_v63 = vadd.f32 %v8979_v24, %v4312_v57  ;;  %v5157_v26 = vpop.f32.mrb[30].mxu1 }
 0x35e   :  { %v4389_v53 = vmax.f32 %v4321_v44, 0.0  ;;  %v4185_v10 = vadd.f32 %v8979_v24, %v4184_v13  ;;  %v5125_v39 = vpop.f32.mrb[30].mxu0  ;;  %v4324_v1 = vadd.f32 %v5157_v26, %v8979_v24  ;;  %v4315_v61 = vpop.f32.mrb[31].mxu1 }
 0x35f   :  { %v4357_v38 = vmax.f32 %v4193_v62, 0.0  ;;  %v4387_v59 = vmax.f32 %v4313_v63, 0.0  ;;  %v4196_v33 = vadd.f32 %v5125_v39, %v8979_v24  ;;  %v4187_v54 = vpop.f32.mrb[31].mxu0  ;;  %v4316_v3 = vadd.f32 %v8979_v24, %v4315_v61 }
 0x360   :  { %4453 = vst [vmem:[#allocation2 + $0x1f0] sm:$0xff] %v4389_v53  ;;  %v4355_v58 = vmax.f32 %v4185_v10, 0.0  ;;  %v4390_v34 = vmax.f32 %v4324_v1, 0.0  ;;  %v4188_v11 = vadd.f32 %v8979_v24, %v4187_v54 }
 0x361   :  { %4421 = vst [vmem:[#allocation2 + $0xf0] sm:$0xff] %v4357_v38  ;;  %4451 = vst [vmem:[#allocation2 + $0x1e0] sm:$0xff] %v4387_v59  ;;  %v4358_v46 = vmax.f32 %v4196_v33, 0.0  ;;  %v4388_v16 = vmax.f32 %v4316_v3, 0.0 }
 0x362   :  { %4419 = vst [vmem:[#allocation2 + $0xe0] sm:$0xff] %v4355_v58  ;;  %4454 = vst [vmem:[#allocation2 + $0x1f8] sm:$0xff] %v4390_v34  ;;  %v4356_v30 = vmax.f32 %v4188_v11, 0.0 }
 0x363   :  { %4422 = vst [vmem:[#allocation2 + $0xf8] sm:$0xff] %v4358_v46  ;;  %4452 = vst [vmem:[#allocation2 + $0x1e8] sm:$0xff] %v4388_v16 }
 0x364   :  { %4420 = vst [vmem:[#allocation2 + $0xe8] sm:$0xff] %v4356_v30 }
 0x365   :  { %5490 = shalt.err (!%p5487_p4)
}
 0x366   :  { %s5491_s29 = scalar_lea.hbm %s9171_s3, 8192 }
 0x367   :  { %p5492_p5 = scmp.ne.s32.totalorder %s9171_s3, %s5491_s29  ;;  %p5495_p6 = scmp.lt.u32.totalorder %s5491_s29, %s9171_s3 }
 0x369   :  { %p5497_p7 = pnand %p5495_p6, %p5492_p5 }
 0x36b   :  { %5500 = shalt.err (!%p5497_p7)
}
 0x36c   :  { %s5512_s8 = smov 128  }
 0x36d   :  { %4466 = dma.vmem_to_hbm [thread:$0]  %s4461_s19, 8192, %s9171_s3, [#allocation3], %s5512_s8, %s5512_s8, %s5504_s25  }
 0x36e   :  { %5501 = dma.done.wait [#allocation3], 8192  }
 0x36f   :  { %5502 = vsyncadd [#allocation3], 4294959104 }
 0x370   :  { %4470 = vsyncpa [#allocation3], 1 }

</bundles_post_ra>
